<compile_context>
chip_gen: v5e
topology: v5e:2x2
jax: 0.10.0
libtpu: 0.0.40
codegen_flags: <defaults>
</compile_context>

<pallas_src>
import functools
import math

import jax
import jax.numpy as jnp
import numpy as np
from jax.experimental import pallas as pl
from jax.experimental.pallas import tpu as pltpu


def _autocorr_kernel(top_k, q_ref, k_ref, v_ref, fwd_ref, icos_ref, isinn_ref, o_ref):
    """One row tile of flattened (batch*head*channel) rows.

    q/k/v refs : (RT, L) f32, channel rows on sublanes, time on lanes.
    fwd_ref    : (L, 2*Fp)  columns [cos | -sin]   (real-DFT half spectrum, zero-padded)
    icos_ref   : (Fp, L)    (w[f]/L) * cos(2*pi*f*n/L)    (rfft fold: w=1 for DC/Nyquist, 2 else)
    isinn_ref  : (Fp, L)   -(w[f]/L) * sin(2*pi*f*n/L)
    """
    Q = q_ref[...]
    K = k_ref[...]
    V = v_ref[...]
    RT, L = Q.shape
    Fp = icos_ref.shape[0]

    # ---- batched forward real-DFT of Q, K, V: one MXU matmul with M = 3*RT ----
    X = jnp.concatenate([Q, K, V], axis=0)                                   # (3RT, L)
    XW = jnp.dot(X, fwd_ref[...], preferred_element_type=jnp.float32)        # (3RT, 2Fp)
    qr, qi = XW[0:RT, 0:Fp], XW[0:RT, Fp:]
    kr, ki = XW[RT:2 * RT, 0:Fp], XW[RT:2 * RT, Fp:]
    vr, vi = XW[2 * RT:3 * RT, 0:Fp], XW[2 * RT:3 * RT, Fp:]

    # ---- circular cross-correlation: corr = Re(IDFT(Qf * conj(Kf))) ----
    pr = qr * kr + qi * ki                                                    # Re(Qf conj(Kf))
    pim = qi * kr - qr * ki                                                   # Im(Qf conj(Kf))
    corr = (jnp.dot(pr, icos_ref[...], preferred_element_type=jnp.float32)
            + jnp.dot(pim, isinn_ref[...], preferred_element_type=jnp.float32))   # (RT, L)

    # ---- per-channel top-k delays (iterative argmax, first-index tie-break) ----
    iota = jax.lax.broadcasted_iota(jnp.int32, (RT, L), 1)
    work = corr
    vals, delays = [], []
    for _ in range(top_k):
        m = jnp.max(work, axis=-1, keepdims=True)                             # (RT, 1)
        idx = jnp.min(jnp.where(work == m, iota, L), axis=-1, keepdims=True)  # (RT, 1) i32
        vals.append(m)
        delays.append(idx)
        work = jnp.where(iota == idx, -jnp.inf, work)

    # ---- softmax over the top-k correlation weights ----
    mx = vals[0]
    for v in vals[1:]:
        mx = jnp.maximum(mx, v)
    exps = [jnp.exp(v - mx) for v in vals]
    denom = exps[0]
    for e in exps[1:]:
        denom = denom + e
    sm = [e / denom for e in exps]                                            # top_k x (RT, 1)

    # ---- delay aggregation on the MXU ----
    # h[c, j] = sum_i sm_i[c] * (j == delay_i[c])
    # agg[c, t] = sum_j h[c, j] * V[c, (t + j) % L] = Re(IDFT(Vf * conj(Hf)))[c, t]
    h = jnp.zeros((RT, L), jnp.float32)
    for i in range(top_k):
        h = h + jnp.where(iota == delays[i], sm[i], 0.0)

    HW = jnp.dot(h, fwd_ref[...], preferred_element_type=jnp.float32)         # (RT, 2Fp)
    hr, hi = HW[:, 0:Fp], HW[:, Fp:]
    ar = vr * hr + vi * hi
    ai = vi * hr - vr * hi
    agg = (jnp.dot(ar, icos_ref[...], preferred_element_type=jnp.float32)
           + jnp.dot(ai, isinn_ref[...], preferred_element_type=jnp.float32))  # (RT, L)

    o_ref[...] = agg.astype(o_ref.dtype)


def _tpu_vmem_bytes():
    try:
        info = pltpu.get_tpu_info()
        return int(getattr(info, "vmem_capacity_bytes", 128 * 1024 * 1024))
    except Exception:
        return 128 * 1024 * 1024


def _pick_row_tile(rows, L, vmem_bytes):
    cap = 256
    if L >= 1024 and vmem_bytes <= 64 * 1024 * 1024:   # v7x-class VMEM: smaller tiles
        cap = 128
    for rt in (256, 128, 64, 32, 16, 8):
        if rt <= cap and rows % rt == 0:
            return rt
    return rows  # full dim (allowed even if not a multiple of 8)


def _vmem_limit_bytes(rt, L, Fp, vmem_bytes):
    f32 = 4
    io = 2 * 4 * rt * L * f32                      # double-buffered q/k/v/out tiles
    consts = (L * 2 * Fp + 2 * Fp * L) * f32       # fwd + icos + isinn (one copy)
    temps = 24 * rt * max(L, 2 * Fp) * f32         # kernel temporaries headroom
    est = io + 2 * consts + temps + (4 << 20)
    return int(min(max(est, 32 << 20), int(vmem_bytes * 0.8)))


def _dft_matrices(L):
    """Host-precomputed (f64 angles) half-spectrum real-DFT matrices, lane-padded."""
    F = L // 2 + 1
    Fp = ((F + 127) // 128) * 128
    n = np.arange(L, dtype=np.float64)
    f = np.arange(F, dtype=np.float64)
    ang_f = 2.0 * np.pi * np.outer(n, f) / L                 # (L, F)
    fwd = np.zeros((L, 2 * Fp), np.float32)
    fwd[:, :F] = np.cos(ang_f)
    fwd[:, Fp:Fp + F] = -np.sin(ang_f)
    w = np.full((F,), 2.0, np.float64)                       # rfft symmetry folding
    w[0] = 1.0
    if L % 2 == 0:
        w[-1] = 1.0
    ang_i = 2.0 * np.pi * np.outer(f, n) / L                 # (F, L)
    icos = np.zeros((Fp, L), np.float32)
    isinn = np.zeros((Fp, L), np.float32)
    icos[:F] = (w[:, None] / L) * np.cos(ang_i)
    isinn[:F] = -(w[:, None] / L) * np.sin(ang_i)
    return jnp.asarray(fwd), jnp.asarray(icos), jnp.asarray(isinn), Fp


def autocorrelation_attention(queries, keys, values, params, *, scale=1):
    B, L, _ = queries.shape
    _, S, _ = keys.shape
    assert S == L, "AutoCorrelation attention requires key/value length == query length"
    HE = params["wq"].shape[1]
    top_k = max(int(scale * math.log(L)), 1)
    assert top_k < L, "top_k must be smaller than the sequence length"

    # ---- input projections fused with the (B,L,HE)->(B,HE,L) transpose (XLA/MXU) ----
    def proj_cmajor(x, w, b):
        return jnp.einsum("bld,dh->bhl", x.astype(jnp.float32), w) + b.reshape(1, -1, 1)

    Qc = proj_cmajor(queries, params["wq"], params["bq"]).reshape(B * HE, L)
    Kc = proj_cmajor(keys, params["wk"], params["bk"]).reshape(B * HE, L)
    Vc = proj_cmajor(values, params["wv"], params["bv"]).reshape(B * HE, L)

    fwd, icos, isinn, Fp = _dft_matrices(L)

    vmem_bytes = _tpu_vmem_bytes()
    rows = B * HE
    rt = _pick_row_tile(rows, L, vmem_bytes)
    grid = (rows // rt,)
    kernel = functools.partial(_autocorr_kernel, top_k)

    def build(single_buffer_consts):
        const_kw = {}
        if single_buffer_consts and hasattr(pl, "Buffered"):
            # Grid-invariant matrices: no point double-buffering them.
            const_kw = dict(pipeline_mode=pl.Buffered(1))
        return pl.pallas_call(
            kernel,
            out_shape=jax.ShapeDtypeStruct((rows, L), jnp.float32),
            grid_spec=pltpu.PrefetchScalarGridSpec(
                num_scalar_prefetch=0,
                grid=grid,
                in_specs=[
                    pl.BlockSpec((rt, L), lambda r: (r, 0)),
                    pl.BlockSpec((rt, L), lambda r: (r, 0)),
                    pl.BlockSpec((rt, L), lambda r: (r, 0)),
                    pl.BlockSpec((L, 2 * Fp), lambda r: (0, 0), **const_kw),
                    pl.BlockSpec((Fp, L), lambda r: (0, 0), **const_kw),
                    pl.BlockSpec((Fp, L), lambda r: (0, 0), **const_kw),
                ],
                out_specs=pl.BlockSpec((rt, L), lambda r: (r, 0)),
            ),
            compiler_params=pltpu.CompilerParams(
                dimension_semantics=("parallel",),
                vmem_limit_bytes=_vmem_limit_bytes(rt, L, Fp, vmem_bytes),
            ),
        )

    try:
        agg = build(True)(Qc, Kc, Vc, fwd, icos, isinn)
    except Exception:
        # Fallback if single-buffered pipeline_mode is unsupported on this jax build.
        agg = build(False)(Qc, Kc, Vc, fwd, icos, isinn)

    # ---- output projection fused with the (B,HE,L)->(B,L,HE) transpose (XLA/MXU) ----
    agg = agg.reshape(B, HE, L)
    out = jnp.einsum("bhl,hd->bld", agg, params["wo"]) + params["bo"].reshape(1, 1, -1)
    return out.astype(queries.dtype)


def init_params(key, query_dim, key_dim, value_dim, num_heads):
    head_dim = query_dim // num_heads
    HE = num_heads * head_dim
    ks = jax.random.split(key, 8)

    def lin(kw, kb, din, dout):
        w = jax.random.normal(kw, (din, dout), jnp.float32) * (1.0 / math.sqrt(din))
        b = jax.random.normal(kb, (1, dout), jnp.float32) * 0.01
        return w, b

    wq, bq = lin(ks[0], ks[1], query_dim, HE)
    wk, bk = lin(ks[2], ks[3], key_dim, HE)
    wv, bv = lin(ks[4], ks[5], value_dim, HE)
    wo, bo = lin(ks[6], ks[7], HE, query_dim)
    return dict(wq=wq, bq=bq, wk=wk, bk=bk, wv=wv, bv=bv, wo=wo, bo=bo)


def reference_forward(queries, keys, values, params, *, num_heads, scale=1):
    """Pure-JAX replica of the PyTorch forward (FFT correlation + per-channel top-k gather)."""
    B, L, _ = queries.shape
    Q = queries @ params["wq"] + params["bq"]
    K = keys @ params["wk"] + params["bk"]
    V = values @ params["wv"] + params["bv"]
    HE = Q.shape[-1]
    E = HE // num_heads
    Qh = Q.reshape(B, L, num_heads, E).transpose(0, 2, 3, 1)    # (B,H,E,L)
    Kh = K.reshape(B, L, num_heads, E).transpose(0, 2, 3, 1)
    Vh = V.reshape(B, L, num_heads, E).transpose(0, 2, 3, 1)

    qf = jnp.fft.rfft(Qh, axis=-1)
    kf = jnp.fft.rfft(Kh, axis=-1)
    corr = jnp.fft.irfft(qf * jnp.conj(kf), n=L, axis=-1)

    top_k = max(int(scale * math.log(L)), 1)
    wts, delay = jax.lax.top_k(corr, top_k)
    tmp_corr = jax.nn.softmax(wts, axis=-1)
    init_index = jnp.arange(L)[None, None, None, :]
    tmp_values = jnp.concatenate([Vh, Vh], axis=-1)
    agg = jnp.zeros_like(Vh)
    for i in range(top_k):
        idx = init_index + delay[..., i:i + 1]
        pattern = jnp.take_along_axis(tmp_values, idx, axis=-1)
        agg = agg + pattern * tmp_corr[..., i:i + 1]
    out = agg.transpose(0, 3, 1, 2).reshape(B, L, HE)
    return out @ params["wo"] + params["bo"]


if __name__ == "__main__":
    # Small, lane-friendly shapes: B=2, L=128 (time), dims=32, 2 heads -> top_k=4.
    B, L, num_heads, scale = 2, 128, 2, 1
    query_dim = key_dim = value_dim = 32

    root = jax.random.PRNGKey(0)
    kq, kk, kv, kp = jax.random.split(root, 4)
    queries = jax.random.normal(kq, (B, L, query_dim), jnp.float32)
    keys = jax.random.normal(kk, (B, L, key_dim), jnp.float32)
    values = jax.random.normal(kv, (B, L, value_dim), jnp.float32)
    params = init_params(kp, query_dim, key_dim, value_dim, num_heads)

    out = autocorrelation_attention(queries, keys, values, params, scale=scale)
    out = jax.block_until_ready(out)

    ref = reference_forward(queries, keys, values, params, num_heads=num_heads, scale=scale)
    np.testing.assert_allclose(np.asarray(out), np.asarray(ref), rtol=2e-3, atol=2e-3)
    print("KERNEL_OK")
</pallas_src>

<mosaic_0001>
module attributes {stable_mosaic.version = 11 : i64} {
  func.func @_autocorr_kernel(%arg0: i32, %arg1: memref<64x128xf32, #tpu.memory_space<vmem>>, %arg2: memref<64x128xf32, #tpu.memory_space<vmem>>, %arg3: memref<64x128xf32, #tpu.memory_space<vmem>>, %arg4: memref<128x256xf32, #tpu.memory_space<vmem>>, %arg5: memref<128x128xf32, #tpu.memory_space<vmem>>, %arg6: memref<128x128xf32, #tpu.memory_space<vmem>>, %arg7: memref<64x128xf32, #tpu.memory_space<vmem>>) attributes {dimension_semantics = [#tpu.dimension_semantics<parallel>], iteration_bounds = array<i64: 1>, scalar_prefetch = 0 : i64, scratch_operands = 0 : i64, tpu.core_type = #tpu.core_type<tc>, window_params = [{transform_indices = @transform_0, window_bounds = array<i64: 64, 128>}, {transform_indices = @transform_1, window_bounds = array<i64: 64, 128>}, {transform_indices = @transform_2, window_bounds = array<i64: 64, 128>}, {pipeline_mode = #tpu.pipeline_mode<synchronous>, transform_indices = @transform_3, window_bounds = array<i64: 128, 256>}, {pipeline_mode = #tpu.pipeline_mode<synchronous>, transform_indices = @transform_4, window_bounds = array<i64: 128, 128>}, {pipeline_mode = #tpu.pipeline_mode<synchronous>, transform_indices = @transform_5, window_bounds = array<i64: 128, 128>}, {transform_indices = @transform_6, window_bounds = array<i64: 64, 128>}]} {
    %c0 = arith.constant 0 : index
    %c0_0 = arith.constant 0 : index
    %0 = vector.load %arg1[%c0, %c0_0] : memref<64x128xf32, #tpu.memory_space<vmem>>, vector<64x128xf32>
    %c0_1 = arith.constant 0 : index
    %c0_2 = arith.constant 0 : index
    %1 = vector.load %arg2[%c0_1, %c0_2] : memref<64x128xf32, #tpu.memory_space<vmem>>, vector<64x128xf32>
    %c0_3 = arith.constant 0 : index
    %c0_4 = arith.constant 0 : index
    %2 = vector.load %arg3[%c0_3, %c0_4] : memref<64x128xf32, #tpu.memory_space<vmem>>, vector<64x128xf32>
    %3 = tpu.concatenate %0, %1, %2 in 0 : vector<64x128xf32>, vector<64x128xf32>, vector<64x128xf32> -> vector<192x128xf32>
    %c0_5 = arith.constant 0 : index
    %c0_6 = arith.constant 0 : index
    %4 = vector.load %arg4[%c0_5, %c0_6] : memref<128x256xf32, #tpu.memory_space<vmem>>, vector<128x256xf32>
    %cst = arith.constant dense<0.000000e+00> : vector<192x256xf32>
    %5 = tpu.matmul %3, %4, %cst {dimension_numbers = #tpu.dot_dimension_numbers<[1], [0], [0], [1], [0, 0, 1, 1], [], []>} : vector<192x128xf32>, vector<128x256xf32>, vector<192x256xf32> -> vector<192x256xf32>
    %6 = vector.extract_strided_slice %5 {offsets = [0, 0], sizes = [64, 128], strides = [1, 1]} : vector<192x256xf32> to vector<64x128xf32>
    %7 = vector.extract_strided_slice %5 {offsets = [0, 128], sizes = [64, 128], strides = [1, 1]} : vector<192x256xf32> to vector<64x128xf32>
    %8 = vector.extract_strided_slice %5 {offsets = [64, 0], sizes = [64, 128], strides = [1, 1]} : vector<192x256xf32> to vector<64x128xf32>
    %9 = vector.extract_strided_slice %5 {offsets = [64, 128], sizes = [64, 128], strides = [1, 1]} : vector<192x256xf32> to vector<64x128xf32>
    %10 = vector.extract_strided_slice %5 {offsets = [128, 0], sizes = [64, 128], strides = [1, 1]} : vector<192x256xf32> to vector<64x128xf32>
    %11 = vector.extract_strided_slice %5 {offsets = [128, 128], sizes = [64, 128], strides = [1, 1]} : vector<192x256xf32> to vector<64x128xf32>
    %12 = arith.mulf %6, %8 : vector<64x128xf32>
    %13 = arith.mulf %7, %9 : vector<64x128xf32>
    %14 = arith.addf %12, %13 : vector<64x128xf32>
    %15 = arith.mulf %7, %8 : vector<64x128xf32>
    %16 = arith.mulf %6, %9 : vector<64x128xf32>
    %17 = arith.subf %15, %16 : vector<64x128xf32>
    %c0_7 = arith.constant 0 : index
    %c0_8 = arith.constant 0 : index
    %18 = vector.load %arg5[%c0_7, %c0_8] : memref<128x128xf32, #tpu.memory_space<vmem>>, vector<128x128xf32>
    %cst_9 = arith.constant dense<0.000000e+00> : vector<64x128xf32>
    %19 = tpu.matmul %14, %18, %cst_9 {dimension_numbers = #tpu.dot_dimension_numbers<[1], [0], [0], [1], [0, 0, 1, 1], [], []>} : vector<64x128xf32>, vector<128x128xf32>, vector<64x128xf32> -> vector<64x128xf32>
    %c0_10 = arith.constant 0 : index
    %c0_11 = arith.constant 0 : index
    %20 = vector.load %arg6[%c0_10, %c0_11] : memref<128x128xf32, #tpu.memory_space<vmem>>, vector<128x128xf32>
    %cst_12 = arith.constant dense<0.000000e+00> : vector<64x128xf32>
    %21 = tpu.matmul %17, %20, %cst_12 {dimension_numbers = #tpu.dot_dimension_numbers<[1], [0], [0], [1], [0, 0, 1, 1], [], []>} : vector<64x128xf32>, vector<128x128xf32>, vector<64x128xf32> -> vector<64x128xf32>
    %22 = arith.addf %19, %21 : vector<64x128xf32>
    %23 = tpu.iota {dimensions = array<i32: 1>} : vector<64x128xi32>
    %cst_13 = arith.constant dense<0xFF800000> : vector<64xf32>
    %24 = vector.multi_reduction <maximumf>, %22, %cst_13 [1] : vector<64x128xf32> to vector<64xf32>
    %25 = vector.shape_cast %24 : vector<64xf32> to vector<64x1xf32>
    %26 = vector.broadcast %25 : vector<64x1xf32> to vector<64x128xf32>
    %27 = arith.cmpf oeq, %22, %26 : vector<64x128xf32>
    %c128_i32 = arith.constant 128 : i32
    %28 = vector.broadcast %c128_i32 : i32 to vector<64x128xi32>
    %29 = arith.select %27, %23, %28 : vector<64x128xi1>, vector<64x128xi32>
    %cst_14 = arith.constant dense<2147483647> : vector<64xi32>
    %30 = vector.multi_reduction <minsi>, %29, %cst_14 [1] : vector<64x128xi32> to vector<64xi32>
    %31 = vector.shape_cast %30 : vector<64xi32> to vector<64x1xi32>
    %32 = vector.broadcast %31 : vector<64x1xi32> to vector<64x128xi32>
    %33 = arith.cmpi eq, %23, %32 : vector<64x128xi32>
    %cst_15 = arith.constant 0xFF800000 : f32
    %34 = vector.broadcast %cst_15 : f32 to vector<64x128xf32>
    %35 = arith.select %33, %34, %22 : vector<64x128xi1>, vector<64x128xf32>
    %cst_16 = arith.constant dense<0xFF800000> : vector<64xf32>
    %36 = vector.multi_reduction <maximumf>, %35, %cst_16 [1] : vector<64x128xf32> to vector<64xf32>
    %37 = vector.shape_cast %36 : vector<64xf32> to vector<64x1xf32>
    %38 = vector.broadcast %37 : vector<64x1xf32> to vector<64x128xf32>
    %39 = arith.cmpf oeq, %35, %38 : vector<64x128xf32>
    %c128_i32_17 = arith.constant 128 : i32
    %40 = vector.broadcast %c128_i32_17 : i32 to vector<64x128xi32>
    %41 = arith.select %39, %23, %40 : vector<64x128xi1>, vector<64x128xi32>
    %cst_18 = arith.constant dense<2147483647> : vector<64xi32>
    %42 = vector.multi_reduction <minsi>, %41, %cst_18 [1] : vector<64x128xi32> to vector<64xi32>
    %43 = vector.shape_cast %42 : vector<64xi32> to vector<64x1xi32>
    %44 = vector.broadcast %43 : vector<64x1xi32> to vector<64x128xi32>
    %45 = arith.cmpi eq, %23, %44 : vector<64x128xi32>
    %cst_19 = arith.constant 0xFF800000 : f32
    %46 = vector.broadcast %cst_19 : f32 to vector<64x128xf32>
    %47 = arith.select %45, %46, %35 : vector<64x128xi1>, vector<64x128xf32>
    %cst_20 = arith.constant dense<0xFF800000> : vector<64xf32>
    %48 = vector.multi_reduction <maximumf>, %47, %cst_20 [1] : vector<64x128xf32> to vector<64xf32>
    %49 = vector.shape_cast %48 : vector<64xf32> to vector<64x1xf32>
    %50 = vector.broadcast %49 : vector<64x1xf32> to vector<64x128xf32>
    %51 = arith.cmpf oeq, %47, %50 : vector<64x128xf32>
    %c128_i32_21 = arith.constant 128 : i32
    %52 = vector.broadcast %c128_i32_21 : i32 to vector<64x128xi32>
    %53 = arith.select %51, %23, %52 : vector<64x128xi1>, vector<64x128xi32>
    %cst_22 = arith.constant dense<2147483647> : vector<64xi32>
    %54 = vector.multi_reduction <minsi>, %53, %cst_22 [1] : vector<64x128xi32> to vector<64xi32>
    %55 = vector.shape_cast %54 : vector<64xi32> to vector<64x1xi32>
    %56 = vector.broadcast %55 : vector<64x1xi32> to vector<64x128xi32>
    %57 = arith.cmpi eq, %23, %56 : vector<64x128xi32>
    %cst_23 = arith.constant 0xFF800000 : f32
    %58 = vector.broadcast %cst_23 : f32 to vector<64x128xf32>
    %59 = arith.select %57, %58, %47 : vector<64x128xi1>, vector<64x128xf32>
    %cst_24 = arith.constant dense<0xFF800000> : vector<64xf32>
    %60 = vector.multi_reduction <maximumf>, %59, %cst_24 [1] : vector<64x128xf32> to vector<64xf32>
    %61 = vector.shape_cast %60 : vector<64xf32> to vector<64x1xf32>
    %62 = vector.broadcast %61 : vector<64x1xf32> to vector<64x128xf32>
    %63 = arith.cmpf oeq, %59, %62 : vector<64x128xf32>
    %c128_i32_25 = arith.constant 128 : i32
    %64 = vector.broadcast %c128_i32_25 : i32 to vector<64x128xi32>
    %65 = arith.select %63, %23, %64 : vector<64x128xi1>, vector<64x128xi32>
    %cst_26 = arith.constant dense<2147483647> : vector<64xi32>
    %66 = vector.multi_reduction <minsi>, %65, %cst_26 [1] : vector<64x128xi32> to vector<64xi32>
    %67 = vector.shape_cast %66 : vector<64xi32> to vector<64x1xi32>
    %68 = arith.maximumf %25, %37 : vector<64x1xf32>
    %69 = arith.maximumf %68, %49 : vector<64x1xf32>
    %70 = arith.maximumf %69, %61 : vector<64x1xf32>
    %71 = arith.subf %25, %70 : vector<64x1xf32>
    %72 = math.exp %71 : vector<64x1xf32>
    %73 = arith.subf %37, %70 : vector<64x1xf32>
    %74 = math.exp %73 : vector<64x1xf32>
    %75 = arith.subf %49, %70 : vector<64x1xf32>
    %76 = math.exp %75 : vector<64x1xf32>
    %77 = arith.subf %61, %70 : vector<64x1xf32>
    %78 = math.exp %77 : vector<64x1xf32>
    %79 = arith.addf %72, %74 : vector<64x1xf32>
    %80 = arith.addf %79, %76 : vector<64x1xf32>
    %81 = arith.addf %80, %78 : vector<64x1xf32>
    %82 = arith.divf %72, %81 : vector<64x1xf32>
    %83 = arith.divf %74, %81 : vector<64x1xf32>
    %84 = arith.divf %76, %81 : vector<64x1xf32>
    %85 = arith.divf %78, %81 : vector<64x1xf32>
    %cst_27 = arith.constant 0.000000e+00 : f32
    %86 = vector.broadcast %cst_27 : f32 to vector<64x128xf32>
    %87 = vector.broadcast %31 : vector<64x1xi32> to vector<64x128xi32>
    %88 = arith.cmpi eq, %23, %87 : vector<64x128xi32>
    %cst_28 = arith.constant 0.000000e+00 : f32
    %89 = vector.shape_cast %82 : vector<64x1xf32> to vector<64x1xf32>
    %90 = vector.broadcast %89 : vector<64x1xf32> to vector<64x128xf32>
    %91 = vector.broadcast %cst_28 : f32 to vector<64x128xf32>
    %92 = arith.select %88, %90, %91 : vector<64x128xi1>, vector<64x128xf32>
    %93 = arith.addf %86, %92 : vector<64x128xf32>
    %94 = vector.broadcast %43 : vector<64x1xi32> to vector<64x128xi32>
    %95 = arith.cmpi eq, %23, %94 : vector<64x128xi32>
    %cst_29 = arith.constant 0.000000e+00 : f32
    %96 = vector.shape_cast %83 : vector<64x1xf32> to vector<64x1xf32>
    %97 = vector.broadcast %96 : vector<64x1xf32> to vector<64x128xf32>
    %98 = vector.broadcast %cst_29 : f32 to vector<64x128xf32>
    %99 = arith.select %95, %97, %98 : vector<64x128xi1>, vector<64x128xf32>
    %100 = arith.addf %93, %99 : vector<64x128xf32>
    %101 = vector.broadcast %55 : vector<64x1xi32> to vector<64x128xi32>
    %102 = arith.cmpi eq, %23, %101 : vector<64x128xi32>
    %cst_30 = arith.constant 0.000000e+00 : f32
    %103 = vector.shape_cast %84 : vector<64x1xf32> to vector<64x1xf32>
    %104 = vector.broadcast %103 : vector<64x1xf32> to vector<64x128xf32>
    %105 = vector.broadcast %cst_30 : f32 to vector<64x128xf32>
    %106 = arith.select %102, %104, %105 : vector<64x128xi1>, vector<64x128xf32>
    %107 = arith.addf %100, %106 : vector<64x128xf32>
    %108 = vector.broadcast %67 : vector<64x1xi32> to vector<64x128xi32>
    %109 = arith.cmpi eq, %23, %108 : vector<64x128xi32>
    %cst_31 = arith.constant 0.000000e+00 : f32
    %110 = vector.shape_cast %85 : vector<64x1xf32> to vector<64x1xf32>
    %111 = vector.broadcast %110 : vector<64x1xf32> to vector<64x128xf32>
    %112 = vector.broadcast %cst_31 : f32 to vector<64x128xf32>
    %113 = arith.select %109, %111, %112 : vector<64x128xi1>, vector<64x128xf32>
    %114 = arith.addf %107, %113 : vector<64x128xf32>
    %c0_32 = arith.constant 0 : index
    %c0_33 = arith.constant 0 : index
    %115 = vector.load %arg4[%c0_32, %c0_33] : memref<128x256xf32, #tpu.memory_space<vmem>>, vector<128x256xf32>
    %cst_34 = arith.constant dense<0.000000e+00> : vector<64x256xf32>
    %116 = tpu.matmul %114, %115, %cst_34 {dimension_numbers = #tpu.dot_dimension_numbers<[1], [0], [0], [1], [0, 0, 1, 1], [], []>} : vector<64x128xf32>, vector<128x256xf32>, vector<64x256xf32> -> vector<64x256xf32>
    %117 = vector.extract_strided_slice %116 {offsets = [0, 0], sizes = [64, 128], strides = [1, 1]} : vector<64x256xf32> to vector<64x128xf32>
    %118 = vector.extract_strided_slice %116 {offsets = [0, 128], sizes = [64, 128], strides = [1, 1]} : vector<64x256xf32> to vector<64x128xf32>
    %119 = arith.mulf %10, %117 : vector<64x128xf32>
    %120 = arith.mulf %11, %118 : vector<64x128xf32>
    %121 = arith.addf %119, %120 : vector<64x128xf32>
    %122 = arith.mulf %11, %117 : vector<64x128xf32>
    %123 = arith.mulf %10, %118 : vector<64x128xf32>
    %124 = arith.subf %122, %123 : vector<64x128xf32>
    %c0_35 = arith.constant 0 : index
    %c0_36 = arith.constant 0 : index
    %125 = vector.load %arg5[%c0_35, %c0_36] : memref<128x128xf32, #tpu.memory_space<vmem>>, vector<128x128xf32>
    %cst_37 = arith.constant dense<0.000000e+00> : vector<64x128xf32>
    %126 = tpu.matmul %121, %125, %cst_37 {dimension_numbers = #tpu.dot_dimension_numbers<[1], [0], [0], [1], [0, 0, 1, 1], [], []>} : vector<64x128xf32>, vector<128x128xf32>, vector<64x128xf32> -> vector<64x128xf32>
    %c0_38 = arith.constant 0 : index
    %c0_39 = arith.constant 0 : index
    %127 = vector.load %arg6[%c0_38, %c0_39] : memref<128x128xf32, #tpu.memory_space<vmem>>, vector<128x128xf32>
    %cst_40 = arith.constant dense<0.000000e+00> : vector<64x128xf32>
    %128 = tpu.matmul %124, %127, %cst_40 {dimension_numbers = #tpu.dot_dimension_numbers<[1], [0], [0], [1], [0, 0, 1, 1], [], []>} : vector<64x128xf32>, vector<128x128xf32>, vector<64x128xf32> -> vector<64x128xf32>
    %129 = arith.addf %126, %128 : vector<64x128xf32>
    %c0_41 = arith.constant 0 : index
    %c0_42 = arith.constant 0 : index
    %130 = vector.load %arg7[%c0_41, %c0_42] : memref<64x128xf32, #tpu.memory_space<vmem>>, vector<64x128xf32>
    tpu.vector_store %arg7[%c0_41, %c0_42], %129 {strides = array<i32>} : memref<64x128xf32, #tpu.memory_space<vmem>>, vector<64x128xf32>,
    return
  }
  func.func @transform_0(%arg0: i32) -> (i32, i32) {
    %c0_i32 = arith.constant 0 : i32
    %c0_i32_0 = arith.constant 0 : i32
    return %arg0, %c0_i32 : i32, i32
  }
  func.func @transform_1(%arg0: i32) -> (i32, i32) {
    %c0_i32 = arith.constant 0 : i32
    %c0_i32_0 = arith.constant 0 : i32
    return %arg0, %c0_i32 : i32, i32
  }
  func.func @transform_2(%arg0: i32) -> (i32, i32) {
    %c0_i32 = arith.constant 0 : i32
    %c0_i32_0 = arith.constant 0 : i32
    return %arg0, %c0_i32 : i32, i32
  }
  func.func @transform_3(%arg0: i32) -> (i32, i32) {
    %c0_i32 = arith.constant 0 : i32
    %c0_i32_0 = arith.constant 0 : i32
    %c0_i32_1 = arith.constant 0 : i32
    return %c0_i32, %c0_i32_0 : i32, i32
  }
  func.func @transform_4(%arg0: i32) -> (i32, i32) {
    %c0_i32 = arith.constant 0 : i32
    %c0_i32_0 = arith.constant 0 : i32
    %c0_i32_1 = arith.constant 0 : i32
    return %c0_i32, %c0_i32_0 : i32, i32
  }
  func.func @transform_5(%arg0: i32) -> (i32, i32) {
    %c0_i32 = arith.constant 0 : i32
    %c0_i32_0 = arith.constant 0 : i32
    %c0_i32_1 = arith.constant 0 : i32
    return %c0_i32, %c0_i32_0 : i32, i32
  }
  func.func @transform_6(%arg0: i32) -> (i32, i32) {
    %c0_i32 = arith.constant 0 : i32
    %c0_i32_0 = arith.constant 0 : i32
    return %arg0, %c0_i32 : i32, i32
  }
}

module attributes {stable_mosaic.version = 11 : i64} {
  func.func @_autocorr_kernel(%arg0: i32, %arg1: memref<64x128xf32, #tpu.memory_space<vmem>>, %arg2: memref<64x128xf32, #tpu.memory_space<vmem>>, %arg3: memref<64x128xf32, #tpu.memory_space<vmem>>, %arg4: memref<128x256xf32, #tpu.memory_space<vmem>>, %arg5: memref<128x128xf32, #tpu.memory_space<vmem>>, %arg6: memref<128x128xf32, #tpu.memory_space<vmem>>, %arg7: memref<64x128xf32, #tpu.memory_space<vmem>>) attributes {dimension_semantics = [#tpu.dimension_semantics<parallel>], iteration_bounds = array<i64: 1>, scalar_prefetch = 0 : i64, scratch_operands = 0 : i64, tpu.core_type = #tpu.core_type<tc>, window_params = [{transform_indices = @transform_0, window_bounds = array<i64: 64, 128>}, {transform_indices = @transform_1, window_bounds = array<i64: 64, 128>}, {transform_indices = @transform_2, window_bounds = array<i64: 64, 128>}, {pipeline_mode = #tpu.pipeline_mode<synchronous>, transform_indices = @transform_3, window_bounds = array<i64: 128, 256>}, {pipeline_mode = #tpu.pipeline_mode<synchronous>, transform_indices = @transform_4, window_bounds = array<i64: 128, 128>}, {pipeline_mode = #tpu.pipeline_mode<synchronous>, transform_indices = @transform_5, window_bounds = array<i64: 128, 128>}, {transform_indices = @transform_6, window_bounds = array<i64: 64, 128>}]} {
    %c0 = arith.constant 0 : index
    %c0_0 = arith.constant 0 : index
    %0 = vector.load %arg1[%c0, %c0_0] : memref<64x128xf32, #tpu.memory_space<vmem>>, vector<64x128xf32>
    %c0_1 = arith.constant 0 : index
    %c0_2 = arith.constant 0 : index
    %1 = vector.load %arg2[%c0_1, %c0_2] : memref<64x128xf32, #tpu.memory_space<vmem>>, vector<64x128xf32>
    %c0_3 = arith.constant 0 : index
    %c0_4 = arith.constant 0 : index
    %2 = vector.load %arg3[%c0_3, %c0_4] : memref<64x128xf32, #tpu.memory_space<vmem>>, vector<64x128xf32>
    %3 = tpu.concatenate %0, %1, %2 in 0 : vector<64x128xf32>, vector<64x128xf32>, vector<64x128xf32> -> vector<192x128xf32>
    %c0_5 = arith.constant 0 : index
    %c0_6 = arith.constant 0 : index
    %4 = vector.load %arg4[%c0_5, %c0_6] : memref<128x256xf32, #tpu.memory_space<vmem>>, vector<128x256xf32>
    %cst = arith.constant dense<0.000000e+00> : vector<192x256xf32>
    %5 = tpu.matmul %3, %4, %cst {dimension_numbers = #tpu.dot_dimension_numbers<[1], [0], [0], [1], [0, 0, 1, 1], [], []>} : vector<192x128xf32>, vector<128x256xf32>, vector<192x256xf32> -> vector<192x256xf32>
    %6 = vector.extract_strided_slice %5 {offsets = [0, 0], sizes = [64, 128], strides = [1, 1]} : vector<192x256xf32> to vector<64x128xf32>
    %7 = vector.extract_strided_slice %5 {offsets = [0, 128], sizes = [64, 128], strides = [1, 1]} : vector<192x256xf32> to vector<64x128xf32>
    %8 = vector.extract_strided_slice %5 {offsets = [64, 0], sizes = [64, 128], strides = [1, 1]} : vector<192x256xf32> to vector<64x128xf32>
    %9 = vector.extract_strided_slice %5 {offsets = [64, 128], sizes = [64, 128], strides = [1, 1]} : vector<192x256xf32> to vector<64x128xf32>
    %10 = vector.extract_strided_slice %5 {offsets = [128, 0], sizes = [64, 128], strides = [1, 1]} : vector<192x256xf32> to vector<64x128xf32>
    %11 = vector.extract_strided_slice %5 {offsets = [128, 128], sizes = [64, 128], strides = [1, 1]} : vector<192x256xf32> to vector<64x128xf32>
    %12 = arith.mulf %6, %8 : vector<64x128xf32>
    %13 = arith.mulf %7, %9 : vector<64x128xf32>
    %14 = arith.addf %12, %13 : vector<64x128xf32>
    %15 = arith.mulf %7, %8 : vector<64x128xf32>
    %16 = arith.mulf %6, %9 : vector<64x128xf32>
    %17 = arith.subf %15, %16 : vector<64x128xf32>
    %c0_7 = arith.constant 0 : index
    %c0_8 = arith.constant 0 : index
    %18 = vector.load %arg5[%c0_7, %c0_8] : memref<128x128xf32, #tpu.memory_space<vmem>>, vector<128x128xf32>
    %cst_9 = arith.constant dense<0.000000e+00> : vector<64x128xf32>
    %19 = tpu.matmul %14, %18, %cst_9 {dimension_numbers = #tpu.dot_dimension_numbers<[1], [0], [0], [1], [0, 0, 1, 1], [], []>} : vector<64x128xf32>, vector<128x128xf32>, vector<64x128xf32> -> vector<64x128xf32>
    %c0_10 = arith.constant 0 : index
    %c0_11 = arith.constant 0 : index
    %20 = vector.load %arg6[%c0_10, %c0_11] : memref<128x128xf32, #tpu.memory_space<vmem>>, vector<128x128xf32>
    %cst_12 = arith.constant dense<0.000000e+00> : vector<64x128xf32>
    %21 = tpu.matmul %17, %20, %cst_12 {dimension_numbers = #tpu.dot_dimension_numbers<[1], [0], [0], [1], [0, 0, 1, 1], [], []>} : vector<64x128xf32>, vector<128x128xf32>, vector<64x128xf32> -> vector<64x128xf32>
    %22 = arith.addf %19, %21 : vector<64x128xf32>
    %23 = tpu.iota {dimensions = array<i32: 1>} : vector<64x128xi32>
    %cst_13 = arith.constant dense<0xFF800000> : vector<64xf32>
    %24 = vector.multi_reduction <maximumf>, %22, %cst_13 [1] : vector<64x128xf32> to vector<64xf32>
    %25 = vector.shape_cast %24 : vector<64xf32> to vector<64x1xf32>
    %26 = vector.broadcast %25 : vector<64x1xf32> to vector<64x128xf32>
    %27 = arith.cmpf oeq, %22, %26 : vector<64x128xf32>
    %c128_i32 = arith.constant 128 : i32
    %28 = vector.broadcast %c128_i32 : i32 to vector<64x128xi32>
    %29 = arith.select %27, %23, %28 : vector<64x128xi1>, vector<64x128xi32>
    %cst_14 = arith.constant dense<2147483647> : vector<64xi32>
    %30 = vector.multi_reduction <minsi>, %29, %cst_14 [1] : vector<64x128xi32> to vector<64xi32>
    %31 = vector.shape_cast %30 : vector<64xi32> to vector<64x1xi32>
    %32 = vector.broadcast %31 : vector<64x1xi32> to vector<64x128xi32>
    %33 = arith.cmpi eq, %23, %32 : vector<64x128xi32>
    %cst_15 = arith.constant 0xFF800000 : f32
    %34 = vector.broadcast %cst_15 : f32 to vector<64x128xf32>
    %35 = arith.select %33, %34, %22 : vector<64x128xi1>, vector<64x128xf32>
    %cst_16 = arith.constant dense<0xFF800000> : vector<64xf32>
    %36 = vector.multi_reduction <maximumf>, %35, %cst_16 [1] : vector<64x128xf32> to vector<64xf32>
    %37 = vector.shape_cast %36 : vector<64xf32> to vector<64x1xf32>
    %38 = vector.broadcast %37 : vector<64x1xf32> to vector<64x128xf32>
    %39 = arith.cmpf oeq, %35, %38 : vector<64x128xf32>
    %c128_i32_17 = arith.constant 128 : i32
    %40 = vector.broadcast %c128_i32_17 : i32 to vector<64x128xi32>
    %41 = arith.select %39, %23, %40 : vector<64x128xi1>, vector<64x128xi32>
    %cst_18 = arith.constant dense<2147483647> : vector<64xi32>
    %42 = vector.multi_reduction <minsi>, %41, %cst_18 [1] : vector<64x128xi32> to vector<64xi32>
    %43 = vector.shape_cast %42 : vector<64xi32> to vector<64x1xi32>
    %44 = vector.broadcast %43 : vector<64x1xi32> to vector<64x128xi32>
    %45 = arith.cmpi eq, %23, %44 : vector<64x128xi32>
    %cst_19 = arith.constant 0xFF800000 : f32
    %46 = vector.broadcast %cst_19 : f32 to vector<64x128xf32>
    %47 = arith.select %45, %46, %35 : vector<64x128xi1>, vector<64x128xf32>
    %cst_20 = arith.constant dense<0xFF800000> : vector<64xf32>
    %48 = vector.multi_reduction <maximumf>, %47, %cst_20 [1] : vector<64x128xf32> to vector<64xf32>
    %49 = vector.shape_cast %48 : vector<64xf32> to vector<64x1xf32>
    %50 = vector.broadcast %49 : vector<64x1xf32> to vector<64x128xf32>
    %51 = arith.cmpf oeq, %47, %50 : vector<64x128xf32>
    %c128_i32_21 = arith.constant 128 : i32
    %52 = vector.broadcast %c128_i32_21 : i32 to vector<64x128xi32>
    %53 = arith.select %51, %23, %52 : vector<64x128xi1>, vector<64x128xi32>
    %cst_22 = arith.constant dense<2147483647> : vector<64xi32>
    %54 = vector.multi_reduction <minsi>, %53, %cst_22 [1] : vector<64x128xi32> to vector<64xi32>
    %55 = vector.shape_cast %54 : vector<64xi32> to vector<64x1xi32>
    %56 = vector.broadcast %55 : vector<64x1xi32> to vector<64x128xi32>
    %57 = arith.cmpi eq, %23, %56 : vector<64x128xi32>
    %cst_23 = arith.constant 0xFF800000 : f32
    %58 = vector.broadcast %cst_23 : f32 to vector<64x128xf32>
    %59 = arith.select %57, %58, %47 : vector<64x128xi1>, vector<64x128xf32>
    %cst_24 = arith.constant dense<0xFF800000> : vector<64xf32>
    %60 = vector.multi_reduction <maximumf>, %59, %cst_24 [1] : vector<64x128xf32> to vector<64xf32>
    %61 = vector.shape_cast %60 : vector<64xf32> to vector<64x1xf32>
    %62 = vector.broadcast %61 : vector<64x1xf32> to vector<64x128xf32>
    %63 = arith.cmpf oeq, %59, %62 : vector<64x128xf32>
    %c128_i32_25 = arith.constant 128 : i32
    %64 = vector.broadcast %c128_i32_25 : i32 to vector<64x128xi32>
    %65 = arith.select %63, %23, %64 : vector<64x128xi1>, vector<64x128xi32>
    %cst_26 = arith.constant dense<2147483647> : vector<64xi32>
    %66 = vector.multi_reduction <minsi>, %65, %cst_26 [1] : vector<64x128xi32> to vector<64xi32>
    %67 = vector.shape_cast %66 : vector<64xi32> to vector<64x1xi32>
    %68 = arith.maximumf %25, %37 : vector<64x1xf32>
    %69 = arith.maximumf %68, %49 : vector<64x1xf32>
    %70 = arith.maximumf %69, %61 : vector<64x1xf32>
    %71 = arith.subf %25, %70 : vector<64x1xf32>
    %72 = math.exp %71 : vector<64x1xf32>
    %73 = arith.subf %37, %70 : vector<64x1xf32>
    %74 = math.exp %73 : vector<64x1xf32>
    %75 = arith.subf %49, %70 : vector<64x1xf32>
    %76 = math.exp %75 : vector<64x1xf32>
    %77 = arith.subf %61, %70 : vector<64x1xf32>
    %78 = math.exp %77 : vector<64x1xf32>
    %79 = arith.addf %72, %74 : vector<64x1xf32>
    %80 = arith.addf %79, %76 : vector<64x1xf32>
    %81 = arith.addf %80, %78 : vector<64x1xf32>
    %82 = arith.divf %72, %81 : vector<64x1xf32>
    %83 = arith.divf %74, %81 : vector<64x1xf32>
    %84 = arith.divf %76, %81 : vector<64x1xf32>
    %85 = arith.divf %78, %81 : vector<64x1xf32>
    %cst_27 = arith.constant 0.000000e+00 : f32
    %86 = vector.broadcast %cst_27 : f32 to vector<64x128xf32>
    %87 = vector.broadcast %31 : vector<64x1xi32> to vector<64x128xi32>
    %88 = arith.cmpi eq, %23, %87 : vector<64x128xi32>
    %cst_28 = arith.constant 0.000000e+00 : f32
    %89 = vector.shape_cast %82 : vector<64x1xf32> to vector<64x1xf32>
    %90 = vector.broadcast %89 : vector<64x1xf32> to vector<64x128xf32>
    %91 = vector.broadcast %cst_28 : f32 to vector<64x128xf32>
    %92 = arith.select %88, %90, %91 : vector<64x128xi1>, vector<64x128xf32>
    %93 = arith.addf %86, %92 : vector<64x128xf32>
    %94 = vector.broadcast %43 : vector<64x1xi32> to vector<64x128xi32>
    %95 = arith.cmpi eq, %23, %94 : vector<64x128xi32>
    %cst_29 = arith.constant 0.000000e+00 : f32
    %96 = vector.shape_cast %83 : vector<64x1xf32> to vector<64x1xf32>
    %97 = vector.broadcast %96 : vector<64x1xf32> to vector<64x128xf32>
    %98 = vector.broadcast %cst_29 : f32 to vector<64x128xf32>
    %99 = arith.select %95, %97, %98 : vector<64x128xi1>, vector<64x128xf32>
    %100 = arith.addf %93, %99 : vector<64x128xf32>
    %101 = vector.broadcast %55 : vector<64x1xi32> to vector<64x128xi32>
    %102 = arith.cmpi eq, %23, %101 : vector<64x128xi32>
    %cst_30 = arith.constant 0.000000e+00 : f32
    %103 = vector.shape_cast %84 : vector<64x1xf32> to vector<64x1xf32>
    %104 = vector.broadcast %103 : vector<64x1xf32> to vector<64x128xf32>
    %105 = vector.broadcast %cst_30 : f32 to vector<64x128xf32>
    %106 = arith.select %102, %104, %105 : vector<64x128xi1>, vector<64x128xf32>
    %107 = arith.addf %100, %106 : vector<64x128xf32>
    %108 = vector.broadcast %67 : vector<64x1xi32> to vector<64x128xi32>
    %109 = arith.cmpi eq, %23, %108 : vector<64x128xi32>
    %cst_31 = arith.constant 0.000000e+00 : f32
    %110 = vector.shape_cast %85 : vector<64x1xf32> to vector<64x1xf32>
    %111 = vector.broadcast %110 : vector<64x1xf32> to vector<64x128xf32>
    %112 = vector.broadcast %cst_31 : f32 to vector<64x128xf32>
    %113 = arith.select %109, %111, %112 : vector<64x128xi1>, vector<64x128xf32>
    %114 = arith.addf %107, %113 : vector<64x128xf32>
    %c0_32 = arith.constant 0 : index
    %c0_33 = arith.constant 0 : index
    %115 = vector.load %arg4[%c0_32, %c0_33] : memref<128x256xf32, #tpu.memory_space<vmem>>, vector<128x256xf32>
    %cst_34 = arith.constant dense<0.000000e+00> : vector<64x256xf32>
    %116 = tpu.matmul %114, %115, %cst_34 {dimension_numbers = #tpu.dot_dimension_numbers<[1], [0], [0], [1], [0, 0, 1, 1], [], []>} : vector<64x128xf32>, vector<128x256xf32>, vector<64x256xf32> -> vector<64x256xf32>
    %117 = vector.extract_strided_slice %116 {offsets = [0, 0], sizes = [64, 128], strides = [1, 1]} : vector<64x256xf32> to vector<64x128xf32>
    %118 = vector.extract_strided_slice %116 {offsets = [0, 128], sizes = [64, 128], strides = [1, 1]} : vector<64x256xf32> to vector<64x128xf32>
    %119 = arith.mulf %10, %117 : vector<64x128xf32>
    %120 = arith.mulf %11, %118 : vector<64x128xf32>
    %121 = arith.addf %119, %120 : vector<64x128xf32>
    %122 = arith.mulf %11, %117 : vector<64x128xf32>
    %123 = arith.mulf %10, %118 : vector<64x128xf32>
    %124 = arith.subf %122, %123 : vector<64x128xf32>
    %c0_35 = arith.constant 0 : index
    %c0_36 = arith.constant 0 : index
    %125 = vector.load %arg5[%c0_35, %c0_36] : memref<128x128xf32, #tpu.memory_space<vmem>>, vector<128x128xf32>
    %cst_37 = arith.constant dense<0.000000e+00> : vector<64x128xf32>
    %126 = tpu.matmul %121, %125, %cst_37 {dimension_numbers = #tpu.dot_dimension_numbers<[1], [0], [0], [1], [0, 0, 1, 1], [], []>} : vector<64x128xf32>, vector<128x128xf32>, vector<64x128xf32> -> vector<64x128xf32>
    %c0_38 = arith.constant 0 : index
    %c0_39 = arith.constant 0 : index
    %127 = vector.load %arg6[%c0_38, %c0_39] : memref<128x128xf32, #tpu.memory_space<vmem>>, vector<128x128xf32>
    %cst_40 = arith.constant dense<0.000000e+00> : vector<64x128xf32>
    %128 = tpu.matmul %124, %127, %cst_40 {dimension_numbers = #tpu.dot_dimension_numbers<[1], [0], [0], [1], [0, 0, 1, 1], [], []>} : vector<64x128xf32>, vector<128x128xf32>, vector<64x128xf32> -> vector<64x128xf32>
    %129 = arith.addf %126, %128 : vector<64x128xf32>
    %c0_41 = arith.constant 0 : index
    %c0_42 = arith.constant 0 : index
    %130 = vector.load %arg7[%c0_41, %c0_42] : memref<64x128xf32, #tpu.memory_space<vmem>>, vector<64x128xf32>
    tpu.vector_store %arg7[%c0_41, %c0_42], %129 {strides = array<i32>} : memref<64x128xf32, #tpu.memory_space<vmem>>, vector<64x128xf32>,
    return
  }
  func.func @transform_0(%arg0: i32) -> (i32, i32) {
    %c0_i32 = arith.constant 0 : i32
    %c0_i32_0 = arith.constant 0 : i32
    return %arg0, %c0_i32 : i32, i32
  }
  func.func @transform_1(%arg0: i32) -> (i32, i32) {
    %c0_i32 = arith.constant 0 : i32
    %c0_i32_0 = arith.constant 0 : i32
    return %arg0, %c0_i32 : i32, i32
  }
  func.func @transform_2(%arg0: i32) -> (i32, i32) {
    %c0_i32 = arith.constant 0 : i32
    %c0_i32_0 = arith.constant 0 : i32
    return %arg0, %c0_i32 : i32, i32
  }
  func.func @transform_3(%arg0: i32) -> (i32, i32) {
    %c0_i32 = arith.constant 0 : i32
    %c0_i32_0 = arith.constant 0 : i32
    %c0_i32_1 = arith.constant 0 : i32
    return %c0_i32, %c0_i32_0 : i32, i32
  }
  func.func @transform_4(%arg0: i32) -> (i32, i32) {
    %c0_i32 = arith.constant 0 : i32
    %c0_i32_0 = arith.constant 0 : i32
    %c0_i32_1 = arith.constant 0 : i32
    return %c0_i32, %c0_i32_0 : i32, i32
  }
  func.func @transform_5(%arg0: i32) -> (i32, i32) {
    %c0_i32 = arith.constant 0 : i32
    %c0_i32_0 = arith.constant 0 : i32
    %c0_i32_1 = arith.constant 0 : i32
    return %c0_i32, %c0_i32_0 : i32, i32
  }
  func.func @transform_6(%arg0: i32) -> (i32, i32) {
    %c0_i32 = arith.constant 0 : i32
    %c0_i32_0 = arith.constant 0 : i32
    return %arg0, %c0_i32 : i32, i32
  }
}

</mosaic_0001>

<bundles_post_ra>
// kernel: tpu_custom_call.1
= control target key start
LH: loop header
LB: loop body
LE: loop exit
PB: predicated region body
PF: predicated region fallthrough
CT: control target
= control target key end

     0   :  { %11 = vsyncpa [#allocation3], 0  ;;  %s3284_s0 = inlined_call_operand.hbm [shape: f32[64,128], index: 0, kind: input, shape index: {}]   ;;  %s3285_s1 = inlined_call_operand.hbm [shape: f32[64,128], index: 1, kind: input, shape index: {}]   ;;  %s3286_s2 = inlined_call_operand.hbm [shape: f32[64,128], index: 2, kind: input, shape index: {}]   ;;  %s3287_s3 = inlined_call_operand.hbm [shape: f32[128,256], index: 3, kind: input, shape index: {}]   ;;  %s3288_s4 = inlined_call_operand.hbm [shape: f32[128,128], index: 4, kind: input, shape index: {}]   ;;  %s3289_s5 = inlined_call_operand.hbm [shape: f32[128,128], index: 5, kind: input, shape index: {}]   ;;  %s3290_s6 = inlined_call_operand.hbm [shape: f32[64,128], index: 6, kind: output, shape index: {}]  }
   0x1   :  { %12 = vsyncpa [#allocation6], 0 }
   0x2   :  { %13 = vsyncpa [#allocation9], 0 }
   0x3   :  { %14 = vsyncpa [#allocation12], 0 }
   0x4   :  { %15 = vsyncpa [#allocation4], 0  ;;  %s33_s23 = sshll.u32 %s3285_s1, 4  ;;  %s2011_s24 = smov [#allocation5]   ;;  %s34_s23 = int_to_ptr.hbm [resolvable:$true] %s33_s23 }
   0x5   :  { %s35_s25 = sshll.u32 %s2011_s24, 4  ;;  %s59_s28 = sshll.u32 %s3287_s3, 4  ;;  %s36_s25 = int_to_ptr.vmem [resolvable:$true] %s35_s25  ;;  %s60_s28 = int_to_ptr.hbm [resolvable:$true] %s59_s28 }
   0x6   :  { %s2012_s29 = smov 128   ;;  %s2013_s30 = smov 8  }
   0x7   :  { %41 = dma.hbm_to_vmem [thread:$0]  %s34_s23, 1024, %s36_s25, [#allocation6], %s2012_s29, %s2012_s29, %s2013_s30  }
   0x8   :  { %s2014_s7 = smov [#allocation8]   ;;  %s2015_s9 = smov 256  }
   0x9   :  { %s61_s8 = sshll.u32 %s2014_s7, 4  ;;  %s2016_s1 = smov 16   ;;  %s62_s8 = int_to_ptr.vmem [resolvable:$true] %s61_s8 }
   0xa   :  { %67 = dma.hbm_to_vmem [thread:$0]  %s60_s28, 4096, %s62_s8, [#allocation9], %s2015_s9, %s2015_s9, %s2016_s1  }
   0xb   :  { %s20_s12 = sshll.u32 %s3284_s0, 4  ;;  %s2017_s13 = smov [#allocation2]   ;;  %s21_s12 = int_to_ptr.hbm [resolvable:$true] %s20_s12 }
   0xc   :  { %s22_s3 = sshll.u32 %s2017_s13, 4  ;;  %s46_s16 = sshll.u32 %s3286_s2, 4  ;;  %s23_s3 = int_to_ptr.vmem [resolvable:$true] %s22_s3  ;;  %s47_s16 = int_to_ptr.hbm [resolvable:$true] %s46_s16 }
   0xd   :  { %28 = dma.hbm_to_vmem [thread:$0]  %s21_s12, 1024, %s23_s3, [#allocation3], %s2012_s29, %s2012_s29, %s2013_s30  }
   0xe   :  { %s2018_s17 = smov [#allocation7]   ;;  %s72_s21 = sshll.u32 %s3288_s4, 4  ;;  %s73_s21 = int_to_ptr.hbm [resolvable:$true] %s72_s21 }
   0xf   :  { %s48_s18 = sshll.u32 %s2018_s17, 4  ;;  %s85_s2 = sshll.u32 %s3289_s5, 4  ;;  %s49_s18 = int_to_ptr.vmem [resolvable:$true] %s48_s18  ;;  %s86_s2 = int_to_ptr.hbm [resolvable:$true] %s85_s2 }
  0x10   :  { %54 = dma.hbm_to_vmem [thread:$0]  %s47_s16, 1024, %s49_s18, [#allocation6], %s2012_s29, %s2012_s29, %s2013_s30  }
  0x11   :  { %s2019_s23 = smov [#allocation10]   ;;  %s2020_s25 = smov [#allocation11]  }
  0x12   :  { %s74_s24 = sshll.u32 %s2019_s23, 4  ;;  %s87_s4 = sshll.u32 %s2020_s25, 4  ;;  %s75_s24 = int_to_ptr.vmem [resolvable:$true] %s74_s24  ;;  %s88_s4 = int_to_ptr.vmem [resolvable:$true] %s87_s4 }
  0x13   :  { %80 = dma.hbm_to_vmem [thread:$0]  %s73_s21, 2048, %s75_s24, [#allocation9], %s2012_s29, %s2012_s29, %s2013_s30  }
  0x14   :  { %93 = dma.hbm_to_vmem [thread:$0]  %s86_s2, 2048, %s88_s4, [#allocation12], %s2012_s29, %s2012_s29, %s2013_s30  }
  0x15   :  { %2001 = dma.done.wait [#allocation3], 1024  }
  0x16   :  { %2002 = vsyncadd [#allocation3], 4294966272 }
  0x17   :  { %2003 = dma.done.wait [#allocation6], 2048  }
  0x18   :  { %2004 = vsyncadd [#allocation6], 4294965248 }
  0x19   :  { %2005 = dma.done.wait [#allocation9], 6144  }
  0x1a   :  { %2006 = vsyncadd [#allocation9], 4294961152 }
  0x1b   :  { %2007 = dma.done.wait [#allocation12], 2048  }
  0x1c   :  { %2008 = vsyncadd [#allocation12], 4294965248  ;;  %v2090_v0 = vld [vmem:[#allocation8 + $0xf0] sm:$0xff]  ;;  %v2092_v1 = vld [vmem:[#allocation8 + $0xf8] sm:$0xff]  ;;  %s2021_s5 = smov [#allocation13]   ;;  %s1726_s7 = sshll.u32 %s3290_s6, 4  ;;  %s1727_s7 = int_to_ptr.hbm [resolvable:$true] %s1726_s7 }
  0x1d   :  { %v2094_v2 = vld [vmem:[#allocation8 + $0xe0] sm:$0xff]  ;;  %174 = vmatpush.msra.mxu0 %v2090_v0  ;;  %263 = vmatpush.msra.mxu1 %v2092_v1  ;;  %v2098_v3 = vld [vmem:[#allocation8 + $0xe8] sm:$0xff]  ;;  %v2100_v4 = vld [vmem:[#allocation8 + $0xd0] sm:$0xff]  ;;  %s1724_s26 = sshll.u32 %s2021_s5, 4  ;;  %s1725_s26 = int_to_ptr.vmem [resolvable:$true] %s1724_s26 }
  0x1e   :  { %v2102_v5 = vld [vmem:[#allocation8 + $0xd8] sm:$0xff]  ;;  %v2106_v6 = vld [vmem:[#allocation8 + $0xc0] sm:$0xff]  ;;  %v2108_v7 = vld [vmem:[#allocation8 + $0xc8] sm:$0xff] }
  0x1f   :  { %175 = vmatpush.msra.mxu0 %v2094_v2  ;;  %264 = vmatpush.msra.mxu1 %v2098_v3  ;;  %v2112_v8 = vld [vmem:[#allocation8 + $0xb0] sm:$0xff]  ;;  %v2114_v9 = vld [vmem:[#allocation8 + $0xb8] sm:$0xff]  ;;  %v2118_v10 = vld [vmem:[#allocation8 + $0xa0] sm:$0xff] }
  0x20   :  { %v2120_v11 = vld [vmem:[#allocation8 + $0xa8] sm:$0xff]  ;;  %v2124_v12 = vld [vmem:[#allocation8 + $0x90] sm:$0xff]  ;;  %v2126_v13 = vld [vmem:[#allocation8 + $0x98] sm:$0xff] }
  0x21   :  { %176 = vmatpush.msra.mxu0 %v2100_v4  ;;  %265 = vmatpush.msra.mxu1 %v2102_v5  ;;  %v2130_v14 = vld [vmem:[#allocation8 + $0x80] sm:$0xff]  ;;  %v2132_v15 = vld [vmem:[#allocation8 + $0x88] sm:$0xff]  ;;  %v2136_v16 = vld [vmem:[#allocation8 + $0x70] sm:$0xff] }
  0x22   :  { %v2138_v17 = vld [vmem:[#allocation8 + $0x78] sm:$0xff]  ;;  %v2142_v18 = vld [vmem:[#allocation8 + $0x60] sm:$0xff]  ;;  %v2144_v19 = vld [vmem:[#allocation8 + $0x68] sm:$0xff] }
  0x23   :  { %177 = vmatpush.msra.mxu0 %v2106_v6  ;;  %266 = vmatpush.msra.mxu1 %v2108_v7  ;;  %v2148_v20 = vld [vmem:[#allocation8 + $0x50] sm:$0xff]  ;;  %v2150_v21 = vld [vmem:[#allocation8 + $0x58] sm:$0xff]  ;;  %v2154_v22 = vld [vmem:[#allocation8 + $0x40] sm:$0xff] }
  0x24   :  { %v2156_v23 = vld [vmem:[#allocation8 + $0x48] sm:$0xff]  ;;  %v2160_v24 = vld [vmem:[#allocation8 + $0x30] sm:$0xff]  ;;  %v2162_v25 = vld [vmem:[#allocation8 + $0x38] sm:$0xff] }
  0x25   :  { %178 = vmatpush.msra.mxu0 %v2112_v8  ;;  %267 = vmatpush.msra.mxu1 %v2114_v9  ;;  %v2166_v26 = vld [vmem:[#allocation8 + $0x20] sm:$0xff]  ;;  %v2168_v27 = vld [vmem:[#allocation8 + $0x28] sm:$0xff]  ;;  %v2172_v28 = vld [vmem:[#allocation8 + $0x10] sm:$0xff] }
  0x26   :  { %v2174_v29 = vld [vmem:[#allocation8 + $0x18] sm:$0xff]  ;;  %v2178_v30 = vld [vmem:[#allocation8] sm:$0xff]  ;;  %v2180_v31 = vld [vmem:[#allocation8 + $0x8] sm:$0xff] }
  0x27   :  { %179 = vmatpush.msra.mxu0 %v2118_v10  ;;  %268 = vmatpush.msra.mxu1 %v2120_v11  ;;  %v118_v32 = vld [vmem:[#allocation2] sm:$0xff]  ;;  %v119_v33 = vld [vmem:[#allocation2 + $0x8] sm:$0xff]  ;;  %v120_v34 = vld [vmem:[#allocation2 + $0x10] sm:$0xff] }
  0x28   :  { %v121_v35 = vld [vmem:[#allocation2 + $0x18] sm:$0xff]  ;;  %v122_v36 = vld [vmem:[#allocation2 + $0x20] sm:$0xff]  ;;  %v123_v37 = vld [vmem:[#allocation2 + $0x28] sm:$0xff] }
  0x29   :  { %180 = vmatpush.msra.mxu0 %v2124_v12  ;;  %269 = vmatpush.msra.mxu1 %v2126_v13  ;;  %v124_v38 = vld [vmem:[#allocation2 + $0x30] sm:$0xff]  ;;  %v125_v39 = vld [vmem:[#allocation2 + $0x38] sm:$0xff]  ;;  %v126_v40 = vld [vmem:[#allocation5] sm:$0xff] }
  0x2a   :  { %v127_v41 = vld [vmem:[#allocation5 + $0x8] sm:$0xff]  ;;  %v128_v42 = vld [vmem:[#allocation5 + $0x10] sm:$0xff]  ;;  %v129_v43 = vld [vmem:[#allocation5 + $0x18] sm:$0xff] }
  0x2b   :  { %181 = vmatpush.msra.mxu0 %v2130_v14  ;;  %270 = vmatpush.msra.mxu1 %v2132_v15  ;;  %v130_v44 = vld [vmem:[#allocation5 + $0x20] sm:$0xff]  ;;  %v131_v45 = vld [vmem:[#allocation5 + $0x28] sm:$0xff]  ;;  %v132_v46 = vld [vmem:[#allocation5 + $0x30] sm:$0xff] }
  0x2c   :  { %v133_v47 = vld [vmem:[#allocation5 + $0x38] sm:$0xff]  ;;  %v2196_v52 = vld [vmem:[#allocation11 + $0x70] sm:$0xff]  ;;  %v2206_v56 = vld [vmem:[#allocation11 + $0x68] sm:$0xff] }
  0x2d   :  { %182 = vmatpush.msra.mxu0 %v2136_v16  ;;  %271 = vmatpush.msra.mxu1 %v2138_v17  ;;  %v2190_v50 = vld [vmem:[#allocation11 + $0x78] sm:$0xff]  ;;  %v2198_v53 = vld [vmem:[#allocation10 + $0x70] sm:$0xff]  ;;  %v2208_v57 = vld [vmem:[#allocation10 + $0x68] sm:$0xff] }
  0x2e   :  { %v2192_v51 = vld [vmem:[#allocation10 + $0x78] sm:$0xff]  ;;  %432 = vmatpush.msra.mxu2 %v2190_v50  ;;  %v2210_v58 = vld [vmem:[#allocation11 + $0x60] sm:$0xff]  ;;  %v2224_v62 = vld [vmem:[#allocation11 + $0x50] sm:$0xff] }
  0x2f   :  { %183 = vmatpush.msra.mxu0 %v2142_v18  ;;  %272 = vmatpush.msra.mxu1 %v2144_v19  ;;  %v2212_v59 = vld [vmem:[#allocation10 + $0x60] sm:$0xff]  ;;  %v2216_v60 = vld [vmem:[#allocation11 + $0x58] sm:$0xff]  ;;  %v2226_v63 = vld [vmem:[#allocation10 + $0x50] sm:$0xff] }
  0x30   :  { %473 = vmatpush.msra.mxu3 %v2192_v51  ;;  %433 = vmatpush.msra.mxu2 %v2196_v52  ;;  %v2218_v61 = vld [vmem:[#allocation10 + $0x58] sm:$0xff] }
  0x31   :  { %184 = vmatpush.msra.mxu0 %v2148_v20  ;;  %273 = vmatpush.msra.mxu1 %v2150_v21 }
  0x32   :  { %474 = vmatpush.msra.mxu3 %v2198_v53  ;;  %434 = vmatpush.msra.mxu2 %v2206_v56 }
  0x33   :  { %185 = vmatpush.msra.mxu0 %v2154_v22  ;;  %274 = vmatpush.msra.mxu1 %v2156_v23 }
  0x34   :  { %475 = vmatpush.msra.mxu3 %v2208_v57  ;;  %435 = vmatpush.msra.mxu2 %v2210_v58 }
  0x35   :  { %186 = vmatpush.msra.mxu0 %v2160_v24  ;;  %275 = vmatpush.msra.mxu1 %v2162_v25 }
  0x36   :  { %476 = vmatpush.msra.mxu3 %v2212_v59  ;;  %436 = vmatpush.msra.mxu2 %v2216_v60 }
  0x37   :  { %187 = vmatpush.msra.mxu0 %v2166_v26  ;;  %276 = vmatpush.msra.mxu1 %v2168_v27 }
  0x38   :  { %477 = vmatpush.msra.mxu3 %v2218_v61  ;;  %437 = vmatpush.msra.mxu2 %v2224_v62 }
  0x39   :  { %188 = vmatpush.msra.mxu0 %v2172_v28  ;;  %277 = vmatpush.msra.mxu1 %v2174_v29 }
  0x3a   :  { %478 = vmatpush.msra.mxu3 %v2226_v63 }
  0x3b   :  { %189 = vmatpush.msra.mxu0 %v2178_v30  ;;  %278 = vmatpush.msra.mxu1 %v2180_v31 }
  0x3c   :  { %190 = vmatmul.f32.vlgmr.msra.gmra.mxu0 %v118_v32  ;;  %279 = vmatmul.f32.vlgmr.msra.gmra.mxu1 %v118_v32 }
  0x44   :  { %193 = vmatmul.f32.gmra.mxu0 %v119_v33  ;;  %282 = vmatmul.f32.gmra.mxu1 %v119_v33 }
  0x4c   :  { %196 = vmatmul.f32.gmra.mxu0 %v120_v34  ;;  %285 = vmatmul.f32.gmra.mxu1 %v120_v34  ;;  %v2234_v34 = vld [vmem:[#allocation11 + $0x48] sm:$0xff] }
  0x4d   :  { %438 = vmatpush.msra.mxu2 %v2234_v34 }
  0x54   :  { %199 = vmatmul.f32.gmra.mxu0 %v121_v35  ;;  %288 = vmatmul.f32.gmra.mxu1 %v121_v35  ;;  %v2236_v35 = vld [vmem:[#allocation10 + $0x48] sm:$0xff] }
  0x55   :  { %479 = vmatpush.msra.mxu3 %v2236_v35 }
  0x5c   :  { %202 = vmatmul.f32.gmra.mxu0 %v122_v36  ;;  %291 = vmatmul.f32.gmra.mxu1 %v122_v36  ;;  %v2238_v36 = vld [vmem:[#allocation11 + $0x40] sm:$0xff] }
  0x5d   :  { %439 = vmatpush.msra.mxu2 %v2238_v36 }
  0x64   :  { %205 = vmatmul.f32.gmra.mxu0 %v123_v37  ;;  %294 = vmatmul.f32.gmra.mxu1 %v123_v37  ;;  %v2240_v37 = vld [vmem:[#allocation10 + $0x40] sm:$0xff] }
  0x65   :  { %480 = vmatpush.msra.mxu3 %v2240_v37 }
  0x6c   :  { %208 = vmatmul.f32.gmra.mxu0 %v124_v38  ;;  %297 = vmatmul.f32.gmra.mxu1 %v124_v38  ;;  %v2244_v38 = vld [vmem:[#allocation11 + $0x38] sm:$0xff] }
  0x6d   :  { %440 = vmatpush.msra.mxu2 %v2244_v38 }
  0x74   :  { %211 = vmatmul.f32.gmra.mxu0 %v125_v39  ;;  %300 = vmatmul.f32.gmra.mxu1 %v125_v39  ;;  %v2246_v39 = vld [vmem:[#allocation10 + $0x38] sm:$0xff] }
  0x75   :  { %3341 = vst [vmem:[#allocation19_spill] sm:$0xff] %v2246_v39  ;;  %481 = vmatpush.msra.mxu3 %v2246_v39  ;;  %v2272_v39 = vld [vmem:[#allocation11 + $0x18] sm:$0xff] }
  0x7c   :  { %214 = vmatmul.f32.gmra.mxu0 %v126_v40  ;;  %303 = vmatmul.f32.gmra.mxu1 %v126_v40  ;;  %v2252_v40 = vld [vmem:[#allocation11 + $0x30] sm:$0xff] }
  0x7d   :  { %3342 = vst [vmem:[#allocation20_spill] sm:$0xff] %v2252_v40  ;;  %441 = vmatpush.msra.mxu2 %v2252_v40 }
  0x84   :  { %217 = vmatmul.f32.gmra.mxu0 %v127_v41  ;;  %306 = vmatmul.f32.gmra.mxu1 %v127_v41  ;;  %v2254_v41 = vld [vmem:[#allocation10 + $0x30] sm:$0xff] }
  0x85   :  { %3343 = vst [vmem:[#allocation21_spill] sm:$0xff] %v2254_v41  ;;  %482 = vmatpush.msra.mxu3 %v2254_v41  ;;  %v2282_v41 = vld [vmem:[#allocation10 + $0x10] sm:$0xff] }
  0x8c   :  { %220 = vmatmul.f32.gmra.mxu0 %v128_v42  ;;  %309 = vmatmul.f32.gmra.mxu1 %v128_v42 }
  0x94   :  { %223 = vmatmul.f32.gmra.mxu0 %v129_v43  ;;  %312 = vmatmul.f32.gmra.mxu1 %v129_v43 }
  0x9c   :  { %226 = vmatmul.f32.gmra.mxu0 %v130_v44  ;;  %315 = vmatmul.f32.gmra.mxu1 %v130_v44  ;;  %v2262_v44 = vld [vmem:[#allocation11 + $0x28] sm:$0xff] }
  0x9d   :  { %3346 = vst [vmem:[#allocation24_spill] sm:$0xff] %v2262_v44  ;;  %442 = vmatpush.msra.mxu2 %v2262_v44 }
  0xa4   :  { %229 = vmatmul.f32.gmra.mxu0 %v131_v45  ;;  %318 = vmatmul.f32.gmra.mxu1 %v131_v45  ;;  %v2264_v45 = vld [vmem:[#allocation10 + $0x28] sm:$0xff] }
  0xa5   :  { %3347 = vst [vmem:[#allocation25_spill] sm:$0xff] %v2264_v45  ;;  %483 = vmatpush.msra.mxu3 %v2264_v45  ;;  %v2290_v45 = vld [vmem:[#allocation11 + $0x8] sm:$0xff] }
  0xac   :  { %232 = vmatmul.f32.gmra.mxu0 %v132_v46  ;;  %321 = vmatmul.f32.gmra.mxu1 %v132_v46  ;;  %v2266_v46 = vld [vmem:[#allocation11 + $0x20] sm:$0xff] }
  0xad   :  { %3348 = vst [vmem:[#allocation26_spill] sm:$0xff] %v2266_v46  ;;  %443 = vmatpush.msra.mxu2 %v2266_v46  ;;  %v2292_v46 = vld [vmem:[#allocation10 + $0x8] sm:$0xff] }
  0xaf   :  { %444 = vmatpush.msra.mxu2 %v2272_v39 }
  0xb4   :  { %235 = vmatmul.f32.gmra.mxu0 %v133_v47  ;;  %324 = vmatmul.f32.gmra.mxu1 %v133_v47  ;;  %v2268_v47 = vld [vmem:[#allocation10 + $0x20] sm:$0xff] }
  0xb5   :  { %3349 = vst [vmem:[#allocation27_spill] sm:$0xff] %v2268_v47  ;;  %484 = vmatpush.msra.mxu3 %v2268_v47  ;;  %v2294_v47 = vld [vmem:[#allocation11] sm:$0xff] }
  0xb9   :  { %v2186_v48 = vpop.f32.mrf.mxu0  ;;  %v2188_v49 = vpop.f32.mrf.mxu1 }
  0xc1   :  { %v2200_v54 = vpop.f32.mrf.mxu0  ;;  %v2202_v55 = vpop.f32.mrf.mxu1 }
  0xc9   :  { %v2228_v32 = vpop.f32.mrf.mxu0  ;;  %v2230_v33 = vpop.f32.mrf.mxu1 }
  0xd1   :  { %v2256_v42 = vpop.f32.mrf.mxu0  ;;  %v2258_v43 = vpop.f32.mrf.mxu1 }
  0xd2   :  { %3344 = vst [vmem:[#allocation22_spill] sm:$0xff] %v2256_v42  ;;  %v2274_v42 = vld [vmem:[#allocation10 + $0x18] sm:$0xff] }
  0xd3   :  { %3345 = vst [vmem:[#allocation23_spill] sm:$0xff] %v2258_v43  ;;  %485 = vmatpush.msra.mxu3 %v2274_v42  ;;  %v2280_v43 = vld [vmem:[#allocation11 + $0x10] sm:$0xff] }
  0xd4   :  { %3350 = vst [vmem:[#allocation28_spill] sm:$0xff] %v2274_v42  ;;  %445 = vmatpush.msra.mxu2 %v2280_v43  ;;  %v2298_v42 = vld [vmem:[#allocation10] sm:$0xff] }
  0xd5   :  { %486 = vmatpush.msra.mxu3 %v2282_v41 }
  0xd6   :  { %446 = vmatpush.msra.mxu2 %v2290_v45 }
  0xd7   :  { %487 = vmatpush.msra.mxu3 %v2292_v46 }
  0xd8   :  { %447 = vmatpush.msra.mxu2 %v2294_v47 }
  0xd9   :  { %v2284_v40 = vpop.f32.mrf.mxu0  ;;  %v2286_v44 = vpop.f32.mrf.mxu1  ;;  %488 = vmatpush.msra.mxu3 %v2298_v42 }
  0xda   :  { %3351 = vst [vmem:[#allocation29_spill] sm:$0xff] %v2284_v40  ;;  %1500 = vmatpush.msrb.mxu2 %v2090_v0 }
  0xdb   :  { %3352 = vst [vmem:[#allocation30_spill] sm:$0xff] %v2286_v44  ;;  %1541 = vmatpush.msrb.mxu3 %v2092_v1 }
  0xdc   :  { %1501 = vmatpush.msrb.mxu2 %v2094_v2 }
  0xdd   :  { %1542 = vmatpush.msrb.mxu3 %v2098_v3 }
  0xde   :  { %1502 = vmatpush.msrb.mxu2 %v2100_v4 }
  0xdf   :  { %1543 = vmatpush.msrb.mxu3 %v2102_v5 }
  0xe0   :  { %1503 = vmatpush.msrb.mxu2 %v2106_v6 }
  0xe1   :  { %v2306_v44 = vpop.f32.mrf.mxu0  ;;  %v2308_v40 = vpop.f32.mrf.mxu1  ;;  %1544 = vmatpush.msrb.mxu3 %v2108_v7 }
  0xe2   :  { %1504 = vmatpush.msrb.mxu2 %v2112_v8 }
  0xe3   :  { %1545 = vmatpush.msrb.mxu3 %v2114_v9 }
  0xe4   :  { %1505 = vmatpush.msrb.mxu2 %v2118_v10 }
  0xe5   :  { %1546 = vmatpush.msrb.mxu3 %v2120_v11 }
  0xe6   :  { %1506 = vmatpush.msrb.mxu2 %v2124_v12 }
  0xe7   :  { %1547 = vmatpush.msrb.mxu3 %v2126_v13 }
  0xe8   :  { %1507 = vmatpush.msrb.mxu2 %v2130_v14 }
  0xe9   :  { %v2318_v0 = vpop.f32.mrf.mxu0  ;;  %v2320_v1 = vpop.f32.mrf.mxu1  ;;  %1548 = vmatpush.msrb.mxu3 %v2132_v15 }
  0xea   :  { %1508 = vmatpush.msrb.mxu2 %v2136_v16 }
  0xeb   :  { %1549 = vmatpush.msrb.mxu3 %v2138_v17 }
  0xec   :  { %1509 = vmatpush.msrb.mxu2 %v2142_v18 }
  0xed   :  { %1550 = vmatpush.msrb.mxu3 %v2144_v19 }
  0xee   :  { %1510 = vmatpush.msrb.mxu2 %v2148_v20 }
  0xef   :  { %1551 = vmatpush.msrb.mxu3 %v2150_v21 }
  0xf0   :  { %1511 = vmatpush.msrb.mxu2 %v2154_v22 }
  0xf1   :  { %v2330_v2 = vpop.f32.mrf.mxu0  ;;  %v2332_v3 = vpop.f32.mrf.mxu1  ;;  %1552 = vmatpush.msrb.mxu3 %v2156_v23 }
  0xf2   :  { %1512 = vmatpush.msrb.mxu2 %v2160_v24 }
  0xf3   :  { %1553 = vmatpush.msrb.mxu3 %v2162_v25 }
  0xf4   :  { %1513 = vmatpush.msrb.mxu2 %v2166_v26 }
  0xf5   :  { %1554 = vmatpush.msrb.mxu3 %v2168_v27 }
  0xf6   :  { %1514 = vmatpush.msrb.mxu2 %v2172_v28  ;;  %v3353_v28 = vld [vmem:[#allocation19_spill] sm:$0xff] }
  0xf7   :  { %1555 = vmatpush.msrb.mxu3 %v2174_v29 }
  0xf8   :  { %1515 = vmatpush.msrb.mxu2 %v2178_v30 }
  0xf9   :  { %v215_v4 = vpop.f32.mrf.mxu0  ;;  %v304_v5 = vpop.f32.mrf.mxu1  ;;  %1556 = vmatpush.msrb.mxu3 %v2180_v31  ;;  %v3354_v31 = vld [vmem:[#allocation20_spill] sm:$0xff] }
  0xfa   :  { %v352_v6 = vmul.f32 %v215_v4, %v2186_v48  ;;  %v376_v7 = vmul.f32 %v2188_v49, %v215_v4  ;;  %v360_v8 = vmul.f32 %v304_v5, %v2188_v49  ;;  %v384_v9 = vmul.f32 %v304_v5, %v2186_v48  ;;  %v3355_v48 = vld [vmem:[#allocation21_spill] sm:$0xff]  ;;  %v3356_v49 = vld [vmem:[#allocation22_spill] sm:$0xff] }
  0xfc   :  { %v392_v10 = vsub.f32 %v376_v7, %v384_v9  ;;  %v368_v11 = vadd.f32 %v360_v8, %v352_v6 }
  0xfe   :  { %448 = vmatmul.f32.vlgmr.msra.gmra.mxu2 %v392_v10  ;;  %489 = vmatmul.f32.vlgmr.msra.gmra.mxu3 %v368_v11 }
  0xff   :  { %1630 = vmatpush.msra.mxu2 %v2190_v50  ;;  %1671 = vmatpush.msra.mxu3 %v2192_v51  ;;  %v3357_v51 = vld [vmem:[#allocation23_spill] sm:$0xff] }
 0x101   :  { %v218_v12 = vpop.f32.mrf.mxu0  ;;  %v307_v13 = vpop.f32.mrf.mxu1  ;;  %1631 = vmatpush.msra.mxu2 %v2196_v52  ;;  %1672 = vmatpush.msra.mxu3 %v2198_v53 }
 0x102   :  { %v353_v14 = vmul.f32 %v218_v12, %v2200_v54  ;;  %v377_v15 = vmul.f32 %v2202_v55, %v218_v12  ;;  %v361_v16 = vmul.f32 %v307_v13, %v2202_v55  ;;  %v385_v17 = vmul.f32 %v307_v13, %v2200_v54  ;;  %v3358_v55 = vld [vmem:[#allocation24_spill] sm:$0xff] }
 0x103   :  { %1632 = vmatpush.msra.mxu2 %v2206_v56  ;;  %1673 = vmatpush.msra.mxu3 %v2208_v57  ;;  %v3359_v56 = vld [vmem:[#allocation25_spill] sm:$0xff] }
 0x104   :  { %v393_v18 = vsub.f32 %v377_v15, %v385_v17  ;;  %v369_v19 = vadd.f32 %v361_v16, %v353_v14 }
 0x105   :  { %1633 = vmatpush.msra.mxu2 %v2210_v58  ;;  %1674 = vmatpush.msra.mxu3 %v2212_v59  ;;  %v3360_v59 = vld [vmem:[#allocation26_spill] sm:$0xff] }
 0x106   :  { %451 = vmatmul.f32.gmra.mxu2 %v393_v18  ;;  %492 = vmatmul.f32.gmra.mxu3 %v369_v19 }
 0x107   :  { %1634 = vmatpush.msra.mxu2 %v2216_v60  ;;  %1675 = vmatpush.msra.mxu3 %v2218_v61  ;;  %v3361_v60 = vld [vmem:[#allocation27_spill] sm:$0xff]  ;;  %v3362_v61 = vld [vmem:[#allocation28_spill] sm:$0xff] }
 0x109   :  { %v221_v20 = vpop.f32.mrf.mxu0  ;;  %v310_v21 = vpop.f32.mrf.mxu1  ;;  %1635 = vmatpush.msra.mxu2 %v2224_v62  ;;  %1676 = vmatpush.msra.mxu3 %v2226_v63 }
 0x10a   :  { %v354_v22 = vmul.f32 %v221_v20, %v2228_v32  ;;  %v378_v23 = vmul.f32 %v2230_v33, %v221_v20  ;;  %v362_v24 = vmul.f32 %v310_v21, %v2230_v33  ;;  %v386_v25 = vmul.f32 %v310_v21, %v2228_v32  ;;  %v3363_v32 = vld [vmem:[#allocation29_spill] sm:$0xff] }
 0x10b   :  { %1636 = vmatpush.msra.mxu2 %v2234_v34  ;;  %1677 = vmatpush.msra.mxu3 %v2236_v35  ;;  %v3364_v34 = vld [vmem:[#allocation30_spill] sm:$0xff] }
 0x10c   :  { %v394_v26 = vsub.f32 %v378_v23, %v386_v25  ;;  %v370_v27 = vadd.f32 %v362_v24, %v354_v22 }
 0x10d   :  { %1637 = vmatpush.msra.mxu2 %v2238_v36  ;;  %1678 = vmatpush.msra.mxu3 %v2240_v37 }
 0x10e   :  { %454 = vmatmul.f32.gmra.mxu2 %v394_v26  ;;  %495 = vmatmul.f32.gmra.mxu3 %v370_v27 }
 0x10f   :  { %1638 = vmatpush.msra.mxu2 %v2244_v38  ;;  %1679 = vmatpush.msra.mxu3 %v3353_v28 }
 0x111   :  { %v224_v29 = vpop.f32.mrf.mxu0  ;;  %v313_v30 = vpop.f32.mrf.mxu1  ;;  %1639 = vmatpush.msra.mxu2 %v3354_v31  ;;  %1680 = vmatpush.msra.mxu3 %v3355_v48 }
 0x112   :  { %v355_v50 = vmul.f32 %v224_v29, %v3356_v49  ;;  %v379_v52 = vmul.f32 %v3357_v51, %v224_v29  ;;  %v363_v53 = vmul.f32 %v313_v30, %v3357_v51  ;;  %v387_v54 = vmul.f32 %v313_v30, %v3356_v49 }
 0x113   :  { %1640 = vmatpush.msra.mxu2 %v3358_v55  ;;  %1681 = vmatpush.msra.mxu3 %v3359_v56 }
 0x114   :  { %v395_v57 = vsub.f32 %v379_v52, %v387_v54  ;;  %v371_v58 = vadd.f32 %v363_v53, %v355_v50  ;;  %v514_v53 = vlaneseq }
 0x115   :  { %1641 = vmatpush.msra.mxu2 %v3360_v59  ;;  %1682 = vmatpush.msra.mxu3 %v3361_v60 }
 0x116   :  { %457 = vmatmul.f32.gmra.mxu2 %v395_v57  ;;  %498 = vmatmul.f32.gmra.mxu3 %v371_v58  ;;  %v2431_v54 = vand.u32 127, %v514_v53 }
 0x117   :  { %1642 = vmatpush.msra.mxu2 %v2272_v39  ;;  %1683 = vmatpush.msra.mxu3 %v3362_v61 }
 0x119   :  { %v227_v62 = vpop.f32.mrf.mxu0  ;;  %v316_v63 = vpop.f32.mrf.mxu1  ;;  %1643 = vmatpush.msra.mxu2 %v2280_v43  ;;  %1684 = vmatpush.msra.mxu3 %v2282_v41 }
 0x11a   :  { %v356_v33 = vmul.f32 %v227_v62, %v3363_v32  ;;  %v380_v35 = vmul.f32 %v3364_v34, %v227_v62  ;;  %v364_v36 = vmul.f32 %v316_v63, %v3364_v34  ;;  %v388_v37 = vmul.f32 %v316_v63, %v3363_v32 }
 0x11b   :  { %1644 = vmatpush.msra.mxu2 %v2290_v45  ;;  %1685 = vmatpush.msra.mxu3 %v2292_v46 }
 0x11c   :  { %v396_v38 = vsub.f32 %v380_v35, %v388_v37  ;;  %v372_v39 = vadd.f32 %v364_v36, %v356_v33 }
 0x11d   :  { %1645 = vmatpush.msra.mxu2 %v2294_v47  ;;  %1686 = vmatpush.msra.mxu3 %v2298_v42 }
 0x11e   :  { %460 = vmatmul.f32.gmra.mxu2 %v396_v38  ;;  %501 = vmatmul.f32.gmra.mxu3 %v372_v39 }
 0x121   :  { %v230_v41 = vpop.f32.mrf.mxu0  ;;  %v319_v43 = vpop.f32.mrf.mxu1 }
 0x122   :  { %v357_v4 = vmul.f32 %v230_v41, %v2306_v44  ;;  %v381_v5 = vmul.f32 %v2308_v40, %v230_v41  ;;  %v365_v6 = vmul.f32 %v319_v43, %v2308_v40  ;;  %v389_v45 = vmul.f32 %v319_v43, %v2306_v44 }
 0x124   :  { %v397_v7 = vsub.f32 %v381_v5, %v389_v45  ;;  %v373_v46 = vadd.f32 %v365_v6, %v357_v4 }
 0x126   :  { %463 = vmatmul.f32.gmra.mxu2 %v397_v7  ;;  %504 = vmatmul.f32.gmra.mxu3 %v373_v46 }
 0x129   :  { %v233_v8 = vpop.f32.mrf.mxu0  ;;  %v322_v47 = vpop.f32.mrf.mxu1 }
 0x12a   :  { %v358_v42 = vmul.f32 %v233_v8, %v2318_v0  ;;  %v382_v9 = vmul.f32 %v2320_v1, %v233_v8  ;;  %v366_v10 = vmul.f32 %v322_v47, %v2320_v1  ;;  %v390_v11 = vmul.f32 %v322_v47, %v2318_v0 }
 0x12c   :  { %v398_v12 = vsub.f32 %v382_v9, %v390_v11  ;;  %v374_v13 = vadd.f32 %v366_v10, %v358_v42 }
 0x12e   :  { %466 = vmatmul.f32.gmra.mxu2 %v398_v12  ;;  %507 = vmatmul.f32.gmra.mxu3 %v374_v13 }
 0x131   :  { %v236_v40 = vpop.f32.mrf.mxu0  ;;  %v325_v44 = vpop.f32.mrf.mxu1 }
 0x132   :  { %v359_v14 = vmul.f32 %v236_v40, %v2330_v2  ;;  %v383_v15 = vmul.f32 %v2332_v3, %v236_v40  ;;  %v367_v16 = vmul.f32 %v325_v44, %v2332_v3  ;;  %v391_v17 = vmul.f32 %v325_v44, %v2330_v2 }
 0x134   :  { %v399_v18 = vsub.f32 %v383_v15, %v391_v17  ;;  %v375_v19 = vadd.f32 %v367_v16, %v359_v14 }
 0x136   :  { %469 = vmatmul.f32.gmra.mxu2 %v399_v18  ;;  %510 = vmatmul.f32.gmra.mxu3 %v375_v19 }
 0x181   :  { %v449_v1 = vpop.f32.mrf.mxu2  ;;  %v490_v0 = vpop.f32.mrf.mxu3 }
 0x182   :  { %v2410_v20 = vadd.f32 %v490_v0, %v449_v1 }
 0x184   :  { %516 = vmax.xlane.f32.xlu0 %v2410_v20 }
 0x189   :  { %v452_v21 = vpop.f32.mrf.mxu2  ;;  %v493_v22 = vpop.f32.mrf.mxu3 }
 0x18a   :  { %v2413_v23 = vadd.f32 %v493_v22, %v452_v21 }
 0x18c   :  { %518 = vmax.xlane.f32.xlu0 %v2413_v23 }
 0x191   :  { %v455_v24 = vpop.f32.mrf.mxu2  ;;  %v496_v3 = vpop.f32.mrf.mxu3 }
 0x192   :  { %v2416_v25 = vadd.f32 %v496_v3, %v455_v24 }
 0x194   :  { %520 = vmax.xlane.f32.xlu1 %v2416_v25 }
 0x199   :  { %v458_v2 = vpop.f32.mrf.mxu2  ;;  %v499_v26 = vpop.f32.mrf.mxu3 }
 0x19a   :  { %v2419_v27 = vadd.f32 %v499_v26, %v458_v2 }
 0x19c   :  { %522 = vmax.xlane.f32.xlu1 %v2419_v27 }
 0x1a1   :  { %v461_v28 = vpop.f32.mrf.mxu2  ;;  %v502_v29 = vpop.f32.mrf.mxu3 }
 0x1a2   :  { %v2422_v30 = vadd.f32 %v502_v29, %v461_v28 }
 0x1a4   :  { %524 = vmax.xlane.f32.xlu2 %v2422_v30 }
 0x1a9   :  { %v464_v31 = vpop.f32.mrf.mxu2  ;;  %v505_v48 = vpop.f32.mrf.mxu3 }
 0x1aa   :  { %v2425_v49 = vadd.f32 %v505_v48, %v464_v31 }
 0x1ac   :  { %526 = vmax.xlane.f32.xlu2 %v2425_v49 }
 0x1b1   :  { %v467_v50 = vpop.f32.mrf.mxu2  ;;  %v508_v51 = vpop.f32.mrf.mxu3 }
 0x1b2   :  { %v2428_v52 = vadd.f32 %v508_v51, %v467_v50 }
 0x1b4   :  { %528 = vmax.xlane.f32.xlu1 %v2428_v52 }
 0x1b9   :  { %v470_v60 = vpop.f32.mrf.mxu2  ;;  %v511_v61 = vpop.f32.mrf.mxu3 }
 0x1ba   :  { %v2443_v32 = vadd.f32 %v511_v61, %v470_v60 }
 0x1f7   :  { %v2433_v55 = vpop.xlane.xlu0 %516 }
 0x1f8   :  { %vm532_vm0 = vcmp.eq.f32.partialorder %v2410_v20, %v2433_v55 }
 0x1f9   :  { %v540_v56 = vsel %vm532_vm0, %v2431_v54, 128 }
 0x1fa   :  { %v549_v57 = vshra.s32 %v540_v56, 16  ;;  %v548_v12 = vand.u32 65535, %v540_v56 }
 0x1fc   :  { %v551_v58 = vcvt.s32.f32 %v549_v57  ;;  %v550_v40 = vcvt.s32.f32 %v548_v12 }
 0x1fe   :  { %552 = vmin.xlane.f32.xlu0 %v551_v58 }
 0x1ff   :  { %v2438_v59 = vpop.xlane.xlu0 %518 }
 0x200   :  { %vm533_vm1 = vcmp.eq.f32.partialorder %v2413_v23, %v2438_v59 }
 0x201   :  { %v541_v62 = vsel %vm533_vm1, %v2431_v54, 128 }
 0x202   :  { %v563_v63 = vshra.s32 %v541_v62, 16  ;;  %v562_v14 = vand.u32 65535, %v541_v62 }
 0x204   :  { %v565_v33 = vcvt.s32.f32 %v563_v63  ;;  %v564_v17 = vcvt.s32.f32 %v562_v14 }
 0x206   :  { %566 = vmin.xlane.f32.xlu2 %v565_v33  ;;  %530 = vmax.xlane.f32.xlu0 %v2443_v32 }
 0x207   :  { %v2446_v34 = vpop.xlane.xlu1 %520 }
 0x208   :  { %vm534_vm2 = vcmp.eq.f32.partialorder %v2416_v25, %v2446_v34 }
 0x209   :  { %v542_v35 = vsel %vm534_vm2, %v2431_v54, 128 }
 0x20a   :  { %v577_v36 = vshra.s32 %v542_v35, 16  ;;  %v576_v0 = vand.u32 65535, %v542_v35 }
 0x20c   :  { %v579_v37 = vcvt.s32.f32 %v577_v36  ;;  %v578_v24 = vcvt.s32.f32 %v576_v0 }
 0x20e   :  { %580 = vmin.xlane.f32.xlu1 %v579_v37 }
 0x20f   :  { %v2451_v38 = vpop.xlane.xlu1 %522 }
 0x210   :  { %vm535_vm3 = vcmp.eq.f32.partialorder %v2419_v27, %v2451_v38 }
 0x211   :  { %v543_v39 = vsel %vm535_vm3, %v2431_v54, 128 }
 0x212   :  { %v591_v41 = vshra.s32 %v543_v39, 16  ;;  %v590_v2 = vand.u32 65535, %v543_v39 }
 0x214   :  { %v593_v43 = vcvt.s32.f32 %v591_v41  ;;  %v592_v28 = vcvt.s32.f32 %v590_v2 }
 0x216   :  { %594 = vmin.xlane.f32.xlu2 %v593_v43 }
 0x217   :  { %v2456_v4 = vpop.xlane.xlu2 %524 }
 0x218   :  { %vm536_vm4 = vcmp.eq.f32.partialorder %v2422_v30, %v2456_v4 }
 0x219   :  { %v544_v5 = vsel %vm536_vm4, %v2431_v54, 128 }
 0x21a   :  { %v605_v6 = vshra.s32 %v544_v5, 16  ;;  %v604_v31 = vand.u32 65535, %v544_v5 }
 0x21c   :  { %v607_v45 = vcvt.s32.f32 %v605_v6  ;;  %v606_v50 = vcvt.s32.f32 %v604_v31 }
 0x21e   :  { %608 = vmin.xlane.f32.xlu0 %v607_v45 }
 0x21f   :  { %v2461_v7 = vpop.xlane.xlu2 %526 }
 0x220   :  { %vm537_vm5 = vcmp.eq.f32.partialorder %v2425_v49, %v2461_v7 }
 0x221   :  { %v545_v46 = vsel %vm537_vm5, %v2431_v54, 128 }
 0x222   :  { %v619_v8 = vshra.s32 %v545_v46, 16  ;;  %v618_v53 = vand.u32 65535, %v545_v46 }
 0x224   :  { %v621_v47 = vcvt.s32.f32 %v619_v8  ;;  %v620_v57 = vcvt.s32.f32 %v618_v53 }
 0x226   :  { %622 = vmin.xlane.f32.xlu1 %v621_v47 }
 0x227   :  { %v2466_v42 = vpop.xlane.xlu1 %528 }
 0x228   :  { %vm538_vm6 = vcmp.eq.f32.partialorder %v2428_v52, %v2466_v42 }
 0x229   :  { %v546_v9 = vsel %vm538_vm6, %v2431_v54, 128 }
 0x22a   :  { %v633_v10 = vshra.s32 %v546_v9, 16  ;;  %v632_v60 = vand.u32 65535, %v546_v9 }
 0x22c   :  { %v635_v11 = vcvt.s32.f32 %v633_v10  ;;  %v634_v62 = vcvt.s32.f32 %v632_v60 }
 0x22e   :  { %636 = vmin.xlane.f32.xlu0 %v635_v11 }
 0x271   :  { %v553_v13 = vpop.xlane.xlu0 %552 }
 0x272   :  { %vm554_vm7 = vcmp.eq.f32.partialorder %v551_v58, %v553_v13 }
 0x273   :  { %v555_v44 = vsel %vm554_vm7, %v550_v40, inf }
 0x274   :  { %556 = vmin.xlane.f32.xlu2 %v555_v44 }
 0x279   :  { %v567_v15 = vpop.xlane.xlu2 %566  ;;  %v2471_v16 = vpop.xlane.xlu0 %530 }
 0x27a   :  { %3365 = vst [vmem:[#allocation19_spill] sm:$0xff] %v2471_v16  ;;  %vm539_vm8 = vcmp.eq.f32.partialorder %v2443_v32, %v2471_v16  ;;  %vm568_vm9 = vcmp.eq.f32.partialorder %v565_v33, %v567_v15  ;;  %v559_v33 = vcvt.f32.s32 %v553_v13  ;;  %v573_v41 = vcvt.f32.s32 %v567_v15 }
 0x27b   :  { %v569_v18 = vsel %vm568_vm9, %v564_v17, inf  ;;  %v547_v19 = vsel %vm539_vm8, %v2431_v54, 128 }
 0x27c   :  { %570 = vmin.xlane.f32.xlu1 %v569_v18  ;;  %v647_v1 = vshra.s32 %v547_v19, 16  ;;  %v560_v36 = vshll.u32 %v559_v33, 16  ;;  %v646_v6 = vand.u32 65535, %v547_v19 }
 0x27e   :  { %v649_v21 = vcvt.s32.f32 %v647_v1  ;;  %v648_v9 = vcvt.s32.f32 %v646_v6 }
 0x280   :  { %650 = vmin.xlane.f32.xlu2 %v649_v21 }
 0x281   :  { %v581_v22 = vpop.xlane.xlu1 %580 }
 0x282   :  { %vm582_vm10 = vcmp.eq.f32.partialorder %v579_v37, %v581_v22  ;;  %v587_v10 = vcvt.f32.s32 %v581_v22 }
 0x283   :  { %v583_v3 = vsel %vm582_vm10, %v578_v24, inf }
 0x284   :  { %584 = vmin.xlane.f32.xlu0 %v583_v3  ;;  %v588_v13 = vshll.u32 %v587_v10, 16 }
 0x289   :  { %v595_v26 = vpop.xlane.xlu2 %594 }
 0x28a   :  { %vm596_vm11 = vcmp.eq.f32.partialorder %v593_v43, %v595_v26  ;;  %v601_v14 = vcvt.f32.s32 %v595_v26 }
 0x28b   :  { %v597_v29 = vsel %vm596_vm11, %v592_v28, inf }
 0x28c   :  { %598 = vmin.xlane.f32.xlu1 %v597_v29  ;;  %v602_v17 = vshll.u32 %v601_v14, 16 }
 0x291   :  { %v609_v48 = vpop.xlane.xlu0 %608 }
 0x292   :  { %vm610_vm12 = vcmp.eq.f32.partialorder %v607_v45, %v609_v48  ;;  %v574_v45 = vshll.u32 %v573_v41, 16  ;;  %v615_v1 = vcvt.f32.s32 %v609_v48 }
 0x293   :  { %v611_v51 = vsel %vm610_vm12, %v606_v50, inf }
 0x294   :  { %612 = vmin.xlane.f32.xlu2 %v611_v51 }
 0x299   :  { %v623_v56 = vpop.xlane.xlu1 %622 }
 0x29a   :  { %vm624_vm13 = vcmp.eq.f32.partialorder %v621_v47, %v623_v56  ;;  %v629_v3 = vcvt.f32.s32 %v623_v56 }
 0x29b   :  { %v625_v58 = vsel %vm624_vm13, %v620_v57, inf }
 0x29c   :  { %626 = vmin.xlane.f32.xlu0 %v625_v58  ;;  %v630_v26 = vshll.u32 %v629_v3, 16 }
 0x2a1   :  { %v637_v61 = vpop.xlane.xlu0 %636 }
 0x2a2   :  { %vm638_vm14 = vcmp.eq.f32.partialorder %v635_v11, %v637_v61  ;;  %v643_v31 = vcvt.f32.s32 %v637_v61 }
 0x2a3   :  { %v639_v63 = vsel %vm638_vm14, %v634_v62, inf }
 0x2a4   :  { %640 = vmin.xlane.f32.xlu2 %v639_v63  ;;  %v644_v50 = vshll.u32 %v643_v31, 16 }
 0x2e7   :  { %v557_v35 = vpop.xlane.xlu2 %556 }
 0x2e8   :  { %v558_v37 = vcvt.f32.s32 %v557_v35 }
 0x2ea   :  { %v2476_v39 = vadd.s32 %v560_v36, %v558_v37 }
 0x2ec   :  { %vm660_vm15 = vcmp.eq.s32.totalorder %v2431_v54, %v2476_v39 }
 0x2ed   :  { %v2484_v43 = vsel %vm660_vm15, -inf, %v2410_v20 }
 0x2ee   :  { %676 = vmax.xlane.f32.xlu1 %v2484_v43 }
 0x2ef   :  { %v571_v5 = vpop.xlane.xlu1 %570 }
 0x2f0   :  { %v572_v46 = vcvt.f32.s32 %v571_v5 }
 0x2f2   :  { %v2487_v8 = vadd.s32 %v574_v45, %v572_v46 }
 0x2f3   :  { %v651_v47 = vpop.xlane.xlu2 %650 }
 0x2f4   :  { %vm661_vm0 = vcmp.eq.s32.totalorder %v2431_v54, %v2487_v8  ;;  %vm652_vm1 = vcmp.eq.f32.partialorder %v649_v21, %v651_v47  ;;  %v616_v21 = vshll.u32 %v615_v1, 16  ;;  %v657_v60 = vcvt.f32.s32 %v651_v47 }
 0x2f5   :  { %v2495_v20 = vsel %vm661_vm0, -inf, %v2413_v23  ;;  %v653_v11 = vsel %vm652_vm1, %v648_v9, inf }
 0x2f6   :  { %678 = vmax.xlane.f32.xlu0 %v2495_v20  ;;  %654 = vmin.xlane.f32.xlu1 %v653_v11  ;;  %v658_v33 = vshll.u32 %v657_v60, 16 }
 0x2f7   :  { %v585_v12 = vpop.xlane.xlu0 %584 }
 0x2f8   :  { %v586_v40 = vcvt.f32.s32 %v585_v12 }
 0x2fa   :  { %v2498_v44 = vadd.s32 %v588_v13, %v586_v40 }
 0x2fc   :  { %vm662_vm2 = vcmp.eq.s32.totalorder %v2431_v54, %v2498_v44 }
 0x2fd   :  { %v2506_v15 = vsel %vm662_vm2, -inf, %v2416_v25 }
 0x2fe   :  { %680 = vmax.xlane.f32.xlu2 %v2506_v15 }
 0x2ff   :  { %v599_v23 = vpop.xlane.xlu1 %598 }
 0x300   :  { %v600_v18 = vcvt.f32.s32 %v599_v23 }
 0x302   :  { %v2509_v19 = vadd.s32 %v602_v17, %v600_v18 }
 0x304   :  { %3366 = vst [vmem:[#allocation20_spill] sm:$0xff] %v2509_v19  ;;  %vm663_vm3 = vcmp.eq.s32.totalorder %v2431_v54, %v2509_v19 }
 0x305   :  { %v2517_v0 = vsel %vm663_vm3, -inf, %v2419_v27 }
 0x306   :  { %682 = vmax.xlane.f32.xlu0 %v2517_v0 }
 0x307   :  { %v613_v25 = vpop.xlane.xlu2 %612 }
 0x308   :  { %v614_v22 = vcvt.f32.s32 %v613_v25 }
 0x30a   :  { %v2520_v24 = vadd.s32 %v616_v21, %v614_v22 }
 0x30c   :  { %3367 = vst [vmem:[#allocation21_spill] sm:$0xff] %v2520_v24  ;;  %vm3338_vm4 = vcmp.eq.s32.totalorder %v2431_v54, %v2520_v24 }
 0x30d   :  { %v2528_v2 = vsel %vm3338_vm4, -inf, %v2422_v30 }
 0x30e   :  { %684 = vmax.xlane.f32.xlu1 %v2528_v2 }
 0x30f   :  { %v627_v27 = vpop.xlane.xlu0 %626 }
 0x310   :  { %v628_v28 = vcvt.f32.s32 %v627_v27 }
 0x312   :  { %v2531_v29 = vadd.s32 %v630_v26, %v628_v28 }
 0x314   :  { %3368 = vst [vmem:[#allocation22_spill] sm:$0xff] %v2531_v29  ;;  %vm3324_vm5 = vcmp.eq.s32.totalorder %v2431_v54, %v2531_v29 }
 0x315   :  { %v2539_v48 = vsel %vm3324_vm5, -inf, %v2425_v49 }
 0x316   :  { %686 = vmax.xlane.f32.xlu2 %v2539_v48 }
 0x317   :  { %v641_v30 = vpop.xlane.xlu2 %640 }
 0x318   :  { %v642_v51 = vcvt.f32.s32 %v641_v30 }
 0x31a   :  { %v2542_v53 = vadd.s32 %v644_v50, %v642_v51 }
 0x31c   :  { %3369 = vst [vmem:[#allocation23_spill] sm:$0xff] %v2542_v53  ;;  %vm3315_vm6 = vcmp.eq.s32.totalorder %v2431_v54, %v2542_v53 }
 0x31d   :  { %v2550_v56 = vsel %vm3315_vm6, -inf, %v2428_v52 }
 0x31e   :  { %688 = vmax.xlane.f32.xlu1 %v2550_v56 }
 0x361   :  { %v2553_v49 = vpop.xlane.xlu1 %676 }
 0x362   :  { %vm692_vm7 = vcmp.eq.f32.partialorder %v2484_v43, %v2553_v49 }
 0x363   :  { %v700_v57 = vsel %vm692_vm7, %v2431_v54, 128 }
 0x364   :  { %v709_v58 = vshra.s32 %v700_v57, 16  ;;  %v708_v27 = vand.u32 65535, %v700_v57 }
 0x366   :  { %v711_v61 = vcvt.s32.f32 %v709_v58  ;;  %v710_v28 = vcvt.s32.f32 %v708_v27 }
 0x368   :  { %712 = vmin.xlane.f32.xlu0 %v711_v61 }
 0x369   :  { %v655_v62 = vpop.xlane.xlu1 %654  ;;  %v2558_v63 = vpop.xlane.xlu0 %678 }
 0x36a   :  { %v656_v35 = vcvt.f32.s32 %v655_v62  ;;  %vm693_vm8 = vcmp.eq.f32.partialorder %v2495_v20, %v2558_v63 }
 0x36b   :  { %v701_v52 = vsel %vm693_vm8, %v2431_v54, 128 }
 0x36c   :  { %v2563_v36 = vadd.s32 %v658_v33, %v656_v35  ;;  %v723_v37 = vshra.s32 %v701_v52, 16  ;;  %v722_v30 = vand.u32 65535, %v701_v52 }
 0x36e   :  { %3370 = vst [vmem:[#allocation24_spill] sm:$0xff] %v2563_v36  ;;  %vm3303_vm9 = vcmp.eq.s32.totalorder %v2431_v54, %v2563_v36  ;;  %v725_v41 = vcvt.s32.f32 %v723_v37  ;;  %v724_v58 = vcvt.s32.f32 %v722_v30 }
 0x36f   :  { %v2571_v5 = vsel %vm3303_vm9, -inf, %v2443_v32 }
 0x370   :  { %690 = vmax.xlane.f32.xlu0 %v2571_v5  ;;  %726 = vmin.xlane.f32.xlu2 %v725_v41 }
 0x371   :  { %v2574_v6 = vpop.xlane.xlu2 %680 }
 0x372   :  { %vm694_vm10 = vcmp.eq.f32.partialorder %v2506_v15, %v2574_v6 }
 0x373   :  { %v702_v45 = vsel %vm694_vm10, %v2431_v54, 128 }
 0x374   :  { %v737_v46 = vshra.s32 %v702_v45, 16  ;;  %v736_v57 = vand.u32 65535, %v702_v45 }
 0x376   :  { %v739_v47 = vcvt.s32.f32 %v737_v46  ;;  %v738_v37 = vcvt.s32.f32 %v736_v57 }
 0x378   :  { %740 = vmin.xlane.f32.xlu1 %v739_v47 }
 0x379   :  { %v2579_v9 = vpop.xlane.xlu0 %682 }
 0x37a   :  { %vm695_vm11 = vcmp.eq.f32.partialorder %v2517_v0, %v2579_v9 }
 0x37b   :  { %v703_v32 = vsel %vm695_vm11, %v2431_v54, 128 }
 0x37c   :  { %v751_v10 = vshra.s32 %v703_v32, 16  ;;  %v750_v46 = vand.u32 65535, %v703_v32 }
 0x37e   :  { %v753_v11 = vcvt.s32.f32 %v751_v10 }
 0x380   :  { %754 = vmin.xlane.f32.xlu2 %v753_v11 }
 0x381   :  { %v2584_v12 = vpop.xlane.xlu1 %684 }
 0x382   :  { %vm696_vm12 = vcmp.eq.f32.partialorder %v2528_v2, %v2584_v12 }
 0x383   :  { %v704_v13 = vsel %vm696_vm12, %v2431_v54, 128 }
 0x384   :  { %v765_v40 = vshra.s32 %v704_v13, 16 }
 0x386   :  { %v767_v14 = vcvt.s32.f32 %v765_v40  ;;  %v752_v40 = vcvt.s32.f32 %v750_v46 }
 0x388   :  { %768 = vmin.xlane.f32.xlu0 %v767_v14 }
 0x389   :  { %v2589_v23 = vpop.xlane.xlu2 %686 }
 0x38a   :  { %vm697_vm13 = vcmp.eq.f32.partialorder %v2539_v48, %v2589_v23 }
 0x38b   :  { %v705_v17 = vsel %vm697_vm13, %v2431_v54, 128 }
 0x38c   :  { %v779_v18 = vshra.s32 %v705_v17, 16  ;;  %v778_v45 = vand.u32 65535, %v705_v17 }
 0x38e   :  { %v781_v1 = vcvt.s32.f32 %v779_v18  ;;  %v780_v30 = vcvt.s32.f32 %v778_v45 }
 0x390   :  { %782 = vmin.xlane.f32.xlu1 %v781_v1 }
 0x391   :  { %v2594_v25 = vpop.xlane.xlu1 %688 }
 0x392   :  { %vm698_vm14 = vcmp.eq.f32.partialorder %v2550_v56, %v2594_v25 }
 0x393   :  { %v706_v21 = vsel %vm698_vm14, %v2431_v54, 128 }
 0x394   :  { %v793_v22 = vshra.s32 %v706_v21, 16 }
 0x396   :  { %v795_v3 = vcvt.s32.f32 %v793_v22 }
 0x398   :  { %796 = vmin.xlane.f32.xlu0 %v795_v3 }
 0x3db   :  { %v713_v26 = vpop.xlane.xlu0 %712 }
 0x3dc   :  { %vm714_vm1 = vcmp.eq.f32.partialorder %v711_v61, %v713_v26 }
 0x3dd   :  { %v715_v31 = vsel %vm714_vm1, %v710_v28, inf }
 0x3de   :  { %716 = vmin.xlane.f32.xlu2 %v715_v31 }
 0x3e3   :  { %v727_v50 = vpop.xlane.xlu2 %726  ;;  %v2599_v51 = vpop.xlane.xlu0 %690 }
 0x3e4   :  { %3371 = vst [vmem:[#allocation25_spill] sm:$0xff] %v2599_v51  ;;  %vm699_vm7 = vcmp.eq.f32.partialorder %v2571_v5, %v2599_v51  ;;  %vm728_vm8 = vcmp.eq.f32.partialorder %v725_v41, %v727_v50  ;;  %v764_v41 = vand.u32 65535, %v704_v13 }
 0x3e5   :  { %v729_v60 = vsel %vm728_vm8, %v724_v58, inf  ;;  %v707_v62 = vsel %vm699_vm7, %v2431_v54, 128 }
 0x3e6   :  { %730 = vmin.xlane.f32.xlu1 %v729_v60  ;;  %v807_v33 = vshra.s32 %v707_v62, 16  ;;  %v766_v27 = vcvt.s32.f32 %v764_v41 }
 0x3e8   :  { %v809_v35 = vcvt.s32.f32 %v807_v33 }
 0x3ea   :  { %810 = vmin.xlane.f32.xlu2 %v809_v35 }
 0x3eb   :  { %v741_v61 = vpop.xlane.xlu1 %740 }
 0x3ec   :  { %vm742_vm10 = vcmp.eq.f32.partialorder %v739_v47, %v741_v61  ;;  %v792_v47 = vand.u32 65535, %v706_v21  ;;  %v806_v21 = vand.u32 65535, %v707_v62 }
 0x3ed   :  { %v743_v52 = vsel %vm742_vm10, %v738_v37, inf }
 0x3ee   :  { %744 = vmin.xlane.f32.xlu0 %v743_v52  ;;  %v794_v32 = vcvt.s32.f32 %v792_v47 }
 0x3f3   :  { %v755_v10 = vpop.xlane.xlu2 %754 }
 0x3f4   :  { %vm756_vm11 = vcmp.eq.f32.partialorder %v753_v11, %v755_v10  ;;  %v719_v11 = vcvt.f32.s32 %v713_v26 }
 0x3f5   :  { %v757_v18 = vsel %vm756_vm11, %v752_v40, inf }
 0x3f6   :  { %758 = vmin.xlane.f32.xlu1 %v757_v18  ;;  %v720_v13 = vshll.u32 %v719_v11, 16  ;;  %v808_v18 = vcvt.s32.f32 %v806_v21 }
 0x3fb   :  { %v769_v22 = vpop.xlane.xlu0 %768 }
 0x3fc   :  { %vm770_vm12 = vcmp.eq.f32.partialorder %v767_v14, %v769_v22  ;;  %v733_v14 = vcvt.f32.s32 %v727_v50  ;;  %v747_v50 = vcvt.f32.s32 %v741_v61  ;;  %v761_v61 = vcvt.f32.s32 %v755_v10 }
 0x3fd   :  { %v771_v28 = vsel %vm770_vm12, %v766_v27, inf }
 0x3fe   :  { %772 = vmin.xlane.f32.xlu2 %v771_v28  ;;  %v748_v27 = vshll.u32 %v747_v50, 16 }
 0x403   :  { %v783_v31 = vpop.xlane.xlu1 %782 }
 0x404   :  { %vm784_vm13 = vcmp.eq.f32.partialorder %v781_v1, %v783_v31 }
 0x405   :  { %v785_v58 = vsel %vm784_vm13, %v780_v30, inf  ;;  %v762_v30 = vshll.u32 %v761_v61, 16 }
 0x406   :  { %786 = vmin.xlane.f32.xlu0 %v785_v58 }
 0x40b   :  { %v797_v60 = vpop.xlane.xlu0 %796 }
 0x40c   :  { %vm798_vm14 = vcmp.eq.f32.partialorder %v795_v3, %v797_v60  ;;  %v734_v3 = vshll.u32 %v733_v14, 16  ;;  %v803_v21 = vcvt.f32.s32 %v797_v60 }
 0x40d   :  { %v799_v33 = vsel %vm798_vm14, %v794_v32, inf  ;;  %v775_v32 = vcvt.f32.s32 %v769_v22 }
 0x40e   :  { %800 = vmin.xlane.f32.xlu2 %v799_v33 }
 0x40f   :  { %v776_v33 = vshll.u32 %v775_v32, 16 }
 0x451   :  { %v717_v57 = vpop.xlane.xlu2 %716 }
 0x452   :  { %v718_v37 = vcvt.f32.s32 %v717_v57 }
 0x454   :  { %v2604_v52 = vadd.s32 %v720_v13, %v718_v37  ;;  %v789_v13 = vcvt.f32.s32 %v783_v31 }
 0x456   :  { %vm820_vm1 = vcmp.eq.s32.totalorder %v2431_v54, %v2604_v52  ;;  %v790_v37 = vshll.u32 %v789_v13, 16 }
 0x457   :  { %v2612_v17 = vsel %vm820_vm1, -inf, %v2484_v43 }
 0x458   :  { %836 = vmax.xlane.f32.xlu1 %v2612_v17 }
 0x459   :  { %v731_v1 = vpop.xlane.xlu1 %730 }
 0x45a   :  { %v732_v26 = vcvt.f32.s32 %v731_v1 }
 0x45c   :  { %v2615_v46 = vadd.s32 %v734_v3, %v732_v26  ;;  %v804_v3 = vshll.u32 %v803_v21, 16 }
 0x45d   :  { %v811_v40 = vpop.xlane.xlu2 %810 }
 0x45e   :  { %vm821_vm7 = vcmp.eq.s32.totalorder %v2431_v54, %v2615_v46  ;;  %vm812_vm8 = vcmp.eq.f32.partialorder %v809_v35, %v811_v40 }
 0x45f   :  { %v2623_v43 = vsel %vm821_vm7, -inf, %v2495_v20  ;;  %v813_v41 = vsel %vm812_vm8, %v808_v18, inf }
 0x460   :  { %838 = vmax.xlane.f32.xlu0 %v2623_v43  ;;  %814 = vmin.xlane.f32.xlu1 %v813_v41 }
 0x461   :  { %v745_v62 = vpop.xlane.xlu0 %744 }
 0x462   :  { %v746_v28 = vcvt.f32.s32 %v745_v62  ;;  %v817_v62 = vcvt.f32.s32 %v811_v40 }
 0x464   :  { %v2626_v45 = vadd.s32 %v748_v27, %v746_v28 }
 0x466   :  { %vm822_vm10 = vcmp.eq.s32.totalorder %v2431_v54, %v2626_v45 }
 0x467   :  { %v2634_v35 = vsel %vm822_vm10, -inf, %v2506_v15 }
 0x468   :  { %840 = vmax.xlane.f32.xlu2 %v2634_v35 }
 0x469   :  { %v759_v20 = vpop.xlane.xlu1 %758 }
 0x46a   :  { %v760_v58 = vcvt.f32.s32 %v759_v20  ;;  %v818_v20 = vshll.u32 %v817_v62, 16 }
 0x46c   :  { %v2637_v47 = vadd.s32 %v762_v30, %v760_v58 }
 0x46e   :  { %3372 = vst [vmem:[#allocation26_spill] sm:$0xff] %v2637_v47  ;;  %vm823_vm11 = vcmp.eq.s32.totalorder %v2431_v54, %v2637_v47 }
 0x46f   :  { %v2645_v10 = vsel %vm823_vm11, -inf, %v2517_v0 }
 0x470   :  { %842 = vmax.xlane.f32.xlu0 %v2645_v10 }
 0x471   :  { %v773_v15 = vpop.xlane.xlu2 %772 }
 0x472   :  { %v774_v11 = vcvt.f32.s32 %v773_v15 }
 0x474   :  { %v2648_v57 = vadd.s32 %v776_v33, %v774_v11 }
 0x476   :  { %3373 = vst [vmem:[#allocation27_spill] sm:$0xff] %v2648_v57  ;;  %vm3326_vm12 = vcmp.eq.s32.totalorder %v2431_v54, %v2648_v57 }
 0x477   :  { %v2656_v22 = vsel %vm3326_vm12, -inf, %v2528_v2 }
 0x478   :  { %844 = vmax.xlane.f32.xlu1 %v2656_v22 }
 0x479   :  { %v787_v0 = vpop.xlane.xlu0 %786 }
 0x47a   :  { %v788_v14 = vcvt.f32.s32 %v787_v0 }
 0x47c   :  { %v2659_v1 = vadd.s32 %v790_v37, %v788_v14 }
 0x47e   :  { %3374 = vst [vmem:[#allocation28_spill] sm:$0xff] %v2659_v1  ;;  %vm3323_vm13 = vcmp.eq.s32.totalorder %v2431_v54, %v2659_v1 }
 0x47f   :  { %v2667_v31 = vsel %vm3323_vm13, -inf, %v2539_v48 }
 0x480   :  { %846 = vmax.xlane.f32.xlu2 %v2667_v31 }
 0x481   :  { %v801_v2 = vpop.xlane.xlu2 %800 }
 0x482   :  { %v802_v26 = vcvt.f32.s32 %v801_v2 }
 0x484   :  { %v2670_v18 = vadd.s32 %v804_v3, %v802_v26 }
 0x486   :  { %3375 = vst [vmem:[#allocation29_spill] sm:$0xff] %v2670_v18  ;;  %vm3304_vm14 = vcmp.eq.s32.totalorder %v2431_v54, %v2670_v18 }
 0x487   :  { %v2678_v60 = vsel %vm3304_vm14, -inf, %v2550_v56 }
 0x488   :  { %848 = vmax.xlane.f32.xlu1 %v2678_v60 }
 0x4cb   :  { %v2681_v48 = vpop.xlane.xlu1 %836 }
 0x4cc   :  { %vm852_vm8 = vcmp.eq.f32.partialorder %v2612_v17, %v2681_v48 }
 0x4cd   :  { %v860_v50 = vsel %vm852_vm8, %v2431_v54, 128 }
 0x4ce   :  { %v869_v41 = vshra.s32 %v860_v50, 16 }
 0x4d0   :  { %v871_v27 = vcvt.s32.f32 %v869_v41 }
 0x4d2   :  { %872 = vmin.xlane.f32.xlu0 %v871_v27 }
 0x4d3   :  { %v815_v28 = vpop.xlane.xlu1 %814  ;;  %v2686_v61 = vpop.xlane.xlu0 %838 }
 0x4d4   :  { %v816_v30 = vcvt.f32.s32 %v815_v28  ;;  %vm853_vm9 = vcmp.eq.f32.partialorder %v2623_v43, %v2686_v61 }
 0x4d5   :  { %v861_v56 = vsel %vm853_vm9, %v2431_v54, 128 }
 0x4d6   :  { %v2691_v58 = vadd.s32 %v818_v20, %v816_v30  ;;  %v883_v32 = vshra.s32 %v861_v56, 16  ;;  %v882_v18 = vand.u32 65535, %v861_v56 }
 0x4d8   :  { %3376 = vst [vmem:[#allocation30_spill] sm:$0xff] %v2691_v58  ;;  %vm3305_vm8 = vcmp.eq.s32.totalorder %v2431_v54, %v2691_v58  ;;  %v885_v15 = vcvt.s32.f32 %v883_v32  ;;  %v868_v58 = vand.u32 65535, %v860_v50  ;;  %v884_v1 = vcvt.s32.f32 %v882_v18 }
 0x4d9   :  { %v2699_v40 = vsel %vm3305_vm8, -inf, %v2571_v5 }
 0x4da   :  { %850 = vmax.xlane.f32.xlu0 %v2699_v40  ;;  %886 = vmin.xlane.f32.xlu2 %v885_v15  ;;  %v870_v16 = vcvt.s32.f32 %v868_v58 }
 0x4db   :  { %v2702_v33 = vpop.xlane.xlu2 %840 }
 0x4dc   :  { %vm854_vm9 = vcmp.eq.f32.partialorder %v2634_v35, %v2702_v33 }
 0x4dd   :  { %v862_v11 = vsel %vm854_vm9, %v2431_v54, 128 }
 0x4de   :  { %v897_v13 = vshra.s32 %v862_v11, 16  ;;  %v896_v50 = vand.u32 65535, %v862_v11 }
 0x4e0   :  { %v899_v0 = vcvt.s32.f32 %v897_v13 }
 0x4e2   :  { %900 = vmin.xlane.f32.xlu1 %v899_v0 }
 0x4e3   :  { %v2707_v37 = vpop.xlane.xlu0 %842 }
 0x4e4   :  { %vm855_vm14 = vcmp.eq.f32.partialorder %v2645_v10, %v2707_v37 }
 0x4e5   :  { %v863_v5 = vsel %vm855_vm14, %v2431_v54, 128 }
 0x4e6   :  { %v911_v14 = vshra.s32 %v863_v5, 16  ;;  %v910_v56 = vand.u32 65535, %v863_v5 }
 0x4e8   :  { %v913_v21 = vcvt.s32.f32 %v911_v14  ;;  %v912_v18 = vcvt.s32.f32 %v910_v56 }
 0x4ea   :  { %914 = vmin.xlane.f32.xlu2 %v913_v21 }
 0x4eb   :  { %v2712_v2 = vpop.xlane.xlu1 %844 }
 0x4ec   :  { %vm856_vm8 = vcmp.eq.f32.partialorder %v2656_v22, %v2712_v2 }
 0x4ed   :  { %v864_v3 = vsel %vm856_vm8, %v2431_v54, 128 }
 0x4ee   :  { %v925_v26 = vshra.s32 %v864_v3, 16 }
 0x4f0   :  { %v927_v41 = vcvt.s32.f32 %v925_v26 }
 0x4f2   :  { %928 = vmin.xlane.f32.xlu0 %v927_v41 }
 0x4f3   :  { %v2717_v62 = vpop.xlane.xlu2 %846 }
 0x4f4   :  { %vm857_vm9 = vcmp.eq.f32.partialorder %v2667_v31, %v2717_v62 }
 0x4f5   :  { %v865_v28 = vsel %vm857_vm9, %v2431_v54, 128 }
 0x4f6   :  { %v939_v20 = vshra.s32 %v865_v28, 16  ;;  %v938_v11 = vand.u32 65535, %v865_v28 }
 0x4f8   :  { %v941_v30 = vcvt.s32.f32 %v939_v20  ;;  %v940_v19 = vcvt.s32.f32 %v938_v11 }
 0x4fa   :  { %942 = vmin.xlane.f32.xlu1 %v941_v30 }
 0x4fb   :  { %v2722_v32 = vpop.xlane.xlu1 %848 }
 0x4fc   :  { %vm858_vm14 = vcmp.eq.f32.partialorder %v2678_v60, %v2722_v32 }
 0x4fd   :  { %v866_v13 = vsel %vm858_vm14, %v2431_v54, 128 }
 0x4fe   :  { %v953_v14 = vshra.s32 %v866_v13, 16 }
 0x500   :  { %v955_v26 = vcvt.s32.f32 %v953_v14 }
 0x502   :  { %956 = vmin.xlane.f32.xlu0 %v955_v26 }
 0x545   :  { %v873_v36 = vpop.xlane.xlu0 %872 }
 0x546   :  { %vm874_vm8 = vcmp.eq.f32.partialorder %v871_v27, %v873_v36 }
 0x547   :  { %v875_v51 = vsel %vm874_vm8, %v870_v16, inf  ;;  %v898_v16 = vcvt.s32.f32 %v896_v50 }
 0x548   :  { %876 = vmin.xlane.f32.xlu2 %v875_v51 }
 0x54d   :  { %v887_v53 = vpop.xlane.xlu2 %886  ;;  %v2727_v20 = vpop.xlane.xlu0 %850 }
 0x54e   :  { %3377 = vst [vmem:[#allocation31_spill] sm:$0xff] %v2727_v20  ;;  %vm859_vm9 = vcmp.eq.f32.partialorder %v2699_v40, %v2727_v20  ;;  %vm888_vm6 = vcmp.eq.f32.partialorder %v885_v15, %v887_v53  ;;  %v924_v15 = vand.u32 65535, %v864_v3 }
 0x54f   :  { %v889_v29 = vsel %vm888_vm6, %v884_v1, inf  ;;  %v867_v57 = vsel %vm859_vm9, %v2431_v54, 128 }
 0x550   :  { %890 = vmin.xlane.f32.xlu1 %v889_v29  ;;  %v967_v14 = vshra.s32 %v867_v57, 16  ;;  %v926_v20 = vcvt.s32.f32 %v924_v15 }
 0x552   :  { %v969_v24 = vcvt.s32.f32 %v967_v14 }
 0x554   :  { %970 = vmin.xlane.f32.xlu2 %v969_v24 }
 0x555   :  { %v901_v27 = vpop.xlane.xlu1 %900 }
 0x556   :  { %vm902_vm14 = vcmp.eq.f32.partialorder %v899_v0, %v901_v27  ;;  %v952_v0 = vand.u32 65535, %v866_v13 }
 0x557   :  { %v903_v51 = vsel %vm902_vm14, %v898_v16, inf }
 0x558   :  { %904 = vmin.xlane.f32.xlu0 %v903_v51  ;;  %v954_v5 = vcvt.s32.f32 %v952_v0 }
 0x55d   :  { %v915_v58 = vpop.xlane.xlu2 %914 }
 0x55e   :  { %vm916_vm8 = vcmp.eq.f32.partialorder %v913_v21, %v915_v58  ;;  %v879_v21 = vcvt.f32.s32 %v873_v36 }
 0x55f   :  { %v917_v47 = vsel %vm916_vm8, %v912_v18, inf }
 0x560   :  { %918 = vmin.xlane.f32.xlu1 %v917_v47  ;;  %v880_v3 = vshll.u32 %v879_v21, 16 }
 0x565   :  { %v929_v1 = vpop.xlane.xlu0 %928 }
 0x566   :  { %vm930_vm6 = vcmp.eq.f32.partialorder %v927_v41, %v929_v1  ;;  %v893_v41 = vcvt.f32.s32 %v887_v53 }
 0x567   :  { %v931_v29 = vsel %vm930_vm6, %v926_v20, inf }
 0x568   :  { %932 = vmin.xlane.f32.xlu2 %v931_v29  ;;  %v894_v13 = vshll.u32 %v893_v41, 16  ;;  %v907_v29 = vcvt.f32.s32 %v901_v27 }
 0x56a   :  { %v908_v11 = vshll.u32 %v907_v29, 16 }
 0x56d   :  { %v943_v14 = vpop.xlane.xlu1 %942 }
 0x56e   :  { %vm944_vm9 = vcmp.eq.f32.partialorder %v941_v30, %v943_v14  ;;  %v966_v30 = vand.u32 65535, %v867_v57 }
 0x56f   :  { %v945_v50 = vsel %vm944_vm9, %v940_v19, inf }
 0x570   :  { %946 = vmin.xlane.f32.xlu0 %v945_v50  ;;  %v968_v15 = vcvt.s32.f32 %v966_v30 }
 0x575   :  { %v957_v16 = vpop.xlane.xlu0 %956 }
 0x576   :  { %vm958_vm14 = vcmp.eq.f32.partialorder %v955_v26, %v957_v16 }
 0x577   :  { %v959_v51 = vsel %vm958_vm14, %v954_v5, inf  ;;  %v921_v5 = vcvt.f32.s32 %v915_v58 }
 0x578   :  { %960 = vmin.xlane.f32.xlu2 %v959_v51 }
 0x5bb   :  { %v877_v47 = vpop.xlane.xlu2 %876 }
 0x5bc   :  { %v878_v56 = vcvt.f32.s32 %v877_v47  ;;  %v935_v47 = vcvt.f32.s32 %v929_v1 }
 0x5be   :  { %v2732_v18 = vadd.s32 %v880_v3, %v878_v56  ;;  %v936_v56 = vshll.u32 %v935_v47, 16 }
 0x5c0   :  { %vm980_vm8 = vcmp.eq.s32.totalorder %v2431_v54, %v2732_v18 }
 0x5c1   :  { %v988_v19 = vsel %vm980_vm8, -inf, %v2612_v17 }
 0x5c2   :  { %996 = vmax.xlane.f32.xlu1 %v988_v19 }
 0x5c3   :  { %v891_v28 = vpop.xlane.xlu1 %890 }
 0x5c4   :  { %v892_v26 = vcvt.f32.s32 %v891_v28  ;;  %v949_v28 = vcvt.f32.s32 %v943_v14 }
 0x5c6   :  { %v2740_v36 = vadd.s32 %v894_v13, %v892_v26  ;;  %v950_v13 = vshll.u32 %v949_v28, 16 }
 0x5c7   :  { %v971_v20 = vpop.xlane.xlu2 %970 }
 0x5c8   :  { %vm981_vm6 = vcmp.eq.s32.totalorder %v2431_v54, %v2740_v36  ;;  %vm972_vm9 = vcmp.eq.f32.partialorder %v969_v24, %v971_v20 }
 0x5c9   :  { %v989_v53 = vsel %vm981_vm6, -inf, %v2623_v43  ;;  %v973_v17 = vsel %vm972_vm9, %v968_v15, inf  ;;  %v922_v43 = vshll.u32 %v921_v5, 16  ;;  %v963_v15 = vcvt.f32.s32 %v957_v16 }
 0x5ca   :  { %998 = vmax.xlane.f32.xlu0 %v989_v53  ;;  %974 = vmin.xlane.f32.xlu1 %v973_v17  ;;  %v977_v5 = vcvt.f32.s32 %v971_v20 }
 0x5cb   :  { %v905_v57 = vpop.xlane.xlu0 %904  ;;  %v964_v17 = vshll.u32 %v963_v15, 16 }
 0x5cc   :  { %v906_v50 = vcvt.f32.s32 %v905_v57  ;;  %v978_v47 = vshll.u32 %v977_v5, 16 }
 0x5ce   :  { %v2748_v0 = vadd.s32 %v908_v11, %v906_v50 }
 0x5d0   :  { %vm982_vm14 = vcmp.eq.s32.totalorder %v2431_v54, %v2748_v0 }
 0x5d1   :  { %v990_v24 = vsel %vm982_vm14, -inf, %v2634_v35 }
 0x5d2   :  { %1000 = vmax.xlane.f32.xlu2 %v990_v24 }
 0x5d3   :  { %v919_v27 = vpop.xlane.xlu1 %918 }
 0x5d4   :  { %v920_v51 = vcvt.f32.s32 %v919_v27 }
 0x5d6   :  { %v2756_v21 = vadd.s32 %v922_v43, %v920_v51 }
 0x5d8   :  { %vm983_vm9 = vcmp.eq.s32.totalorder %v2431_v54, %v2756_v21 }
 0x5d9   :  { %v991_v58 = vsel %vm983_vm9, -inf, %v2645_v10 }
 0x5da   :  { %1002 = vmax.xlane.f32.xlu0 %v991_v58 }
 0x5db   :  { %v933_v3 = vpop.xlane.xlu2 %932 }
 0x5dc   :  { %v934_v41 = vcvt.f32.s32 %v933_v3 }
 0x5de   :  { %v2764_v35 = vadd.s32 %v936_v56, %v934_v41 }
 0x5e0   :  { %3378 = vst [vmem:[#allocation32_spill] sm:$0xff] %v2764_v35  ;;  %vm3325_vm13 = vcmp.eq.s32.totalorder %v2431_v54, %v2764_v35 }
 0x5e1   :  { %v992_v1 = vsel %vm3325_vm13, -inf, %v2656_v22 }
 0x5e2   :  { %1004 = vmax.xlane.f32.xlu1 %v992_v1 }
 0x5e3   :  { %v947_v30 = vpop.xlane.xlu0 %946 }
 0x5e4   :  { %v948_v26 = vcvt.f32.s32 %v947_v30 }
 0x5e6   :  { %v2772_v10 = vadd.s32 %v950_v13, %v948_v26 }
 0x5e8   :  { %3379 = vst [vmem:[#allocation33_spill] sm:$0xff] %v2772_v10  ;;  %vm3327_vm5 = vcmp.eq.s32.totalorder %v2431_v54, %v2772_v10 }
 0x5e9   :  { %v993_v14 = vsel %vm3327_vm5, -inf, %v2667_v31 }
 0x5ea   :  { %1006 = vmax.xlane.f32.xlu2 %v993_v14 }
 0x5eb   :  { %v961_v29 = vpop.xlane.xlu2 %960 }
 0x5ec   :  { %v962_v57 = vcvt.f32.s32 %v961_v29 }
 0x5ee   :  { %v2780_v22 = vadd.s32 %v964_v17, %v962_v57 }
 0x5f0   :  { %3380 = vst [vmem:[#allocation34_spill] sm:$0xff] %v2780_v22  ;;  %vm3328_vm13 = vcmp.eq.s32.totalorder %v2431_v54, %v2780_v22 }
 0x5f1   :  { %v994_v16 = vsel %vm3328_vm13, -inf, %v2678_v60 }
 0x5f2   :  { %1008 = vmax.xlane.f32.xlu1 %v994_v16 }
 0x635   :  { %v2788_v11 = vpop.xlane.xlu1 %996 }
 0x636   :  { %vm1012_vm12 = vcmp.eq.f32.partialorder %v988_v19, %v2788_v11 }
 0x637   :  { %v1020_v31 = vsel %vm1012_vm12, %v2431_v54, 128 }
 0x638   :  { %v1029_v50 = vshra.s32 %v1020_v31, 16 }
 0x63a   :  { %v1031_v27 = vcvt.s32.f32 %v1029_v50 }
 0x63c   :  { %1032 = vmin.xlane.f32.xlu0 %v1031_v27 }
 0x63d   :  { %v975_v43 = vpop.xlane.xlu1 %974  ;;  %v2792_v51 = vpop.xlane.xlu0 %998 }
 0x63e   :  { %v976_v3 = vcvt.f32.s32 %v975_v43  ;;  %vm1013_vm5 = vcmp.eq.f32.partialorder %v989_v53, %v2792_v51 }
 0x63f   :  { %v1021_v60 = vsel %vm1013_vm5, %v2431_v54, 128 }
 0x640   :  { %v2796_v56 = vadd.s32 %v978_v47, %v976_v3  ;;  %v1043_v41 = vshra.s32 %v1021_v60, 16  ;;  %v1042_v22 = vand.u32 65535, %v1021_v60 }
 0x642   :  { %3381 = vst [vmem:[#allocation35_spill] sm:$0xff] %v2796_v56  ;;  %vm3329_vm13 = vcmp.eq.s32.totalorder %v2431_v54, %v2796_v56  ;;  %v1045_v20 = vcvt.s32.f32 %v1043_v41  ;;  %v1044_v35 = vcvt.s32.f32 %v1042_v22 }
 0x643   :  { %v995_v19 = vsel %vm3329_vm13, -inf, %v2699_v40 }
 0x644   :  { %1010 = vmax.xlane.f32.xlu0 %v995_v19  ;;  %1046 = vmin.xlane.f32.xlu2 %v1045_v20 }
 0x645   :  { %v2804_v28 = vpop.xlane.xlu2 %1000 }
 0x646   :  { %vm1014_vm12 = vcmp.eq.f32.partialorder %v990_v24, %v2804_v28 }
 0x647   :  { %v1022_v53 = vsel %vm1014_vm12, %v2431_v54, 128 }
 0x648   :  { %v1057_v30 = vshra.s32 %v1022_v53, 16 }
 0x64a   :  { %v1059_v13 = vcvt.s32.f32 %v1057_v30 }
 0x64c   :  { %1060 = vmin.xlane.f32.xlu1 %v1059_v13 }
 0x64d   :  { %v2808_v26 = vpop.xlane.xlu0 %1002 }
 0x64e   :  { %vm1015_vm5 = vcmp.eq.f32.partialorder %v991_v58, %v2808_v26 }
 0x64f   :  { %v1023_v15 = vsel %vm1015_vm5, %v2431_v54, 128 }
 0x650   :  { %v1071_v29 = vshra.s32 %v1023_v15, 16 }
 0x652   :  { %v1073_v40 = vcvt.s32.f32 %v1071_v29  ;;  %v1028_v29 = vand.u32 65535, %v1020_v31 }
 0x654   :  { %1074 = vmin.xlane.f32.xlu2 %v1073_v40  ;;  %v1030_v56 = vcvt.s32.f32 %v1028_v29 }
 0x655   :  { %v2812_v17 = vpop.xlane.xlu1 %1004 }
 0x656   :  { %vm1016_vm13 = vcmp.eq.f32.partialorder %v992_v1, %v2812_v17 }
 0x657   :  { %v1024_v24 = vsel %vm1016_vm13, %v2431_v54, 128 }
 0x658   :  { %v1085_v57 = vshra.s32 %v1024_v24, 16 }
 0x65a   :  { %v1087_v50 = vcvt.s32.f32 %v1085_v57 }
 0x65c   :  { %1088 = vmin.xlane.f32.xlu0 %v1087_v50 }
 0x65d   :  { %v2816_v5 = vpop.xlane.xlu2 %1006 }
 0x65e   :  { %vm1017_vm12 = vcmp.eq.f32.partialorder %v993_v14, %v2816_v5 }
 0x65f   :  { %v1025_v58 = vsel %vm1017_vm12, %v2431_v54, 128 }
 0x660   :  { %v1099_v43 = vshra.s32 %v1025_v58, 16 }
 0x662   :  { %v1101_v47 = vcvt.s32.f32 %v1099_v43 }
 0x664   :  { %1102 = vmin.xlane.f32.xlu1 %v1101_v47 }
 0x665   :  { %v2820_v3 = vpop.xlane.xlu1 %1008 }
 0x666   :  { %vm1018_vm5 = vcmp.eq.f32.partialorder %v994_v16, %v2820_v3 }
 0x667   :  { %v1026_v1 = vsel %vm1018_vm5, %v2431_v54, 128 }
 0x668   :  { %v1113_v41 = vshra.s32 %v1026_v1, 16 }
 0x66a   :  { %v1115_v30 = vcvt.s32.f32 %v1113_v41 }
 0x66c   :  { %1116 = vmin.xlane.f32.xlu0 %v1115_v30 }
 0x6af   :  { %v2824_v57 = vpop.xlane.xlu0 %1032 }
 0x6b0   :  { %vm1034_vm13 = vcmp.eq.f32.partialorder %v1031_v27, %v2824_v57  ;;  %v1056_v27 = vand.u32 65535, %v1022_v53  ;;  %v1084_v53 = vand.u32 65535, %v1024_v24 }
 0x6b1   :  { %v1035_v14 = vsel %vm1034_vm13, %v1030_v56, inf }
 0x6b2   :  { %1036 = vmin.xlane.f32.xlu2 %v1035_v14  ;;  %v1058_v29 = vcvt.s32.f32 %v1056_v27  ;;  %v1098_v27 = vand.u32 65535, %v1025_v58 }
 0x6b7   :  { %v2827_v43 = vpop.xlane.xlu2 %1046  ;;  %v2829_v10 = vpop.xlane.xlu0 %1010 }
 0x6b8   :  { %3382 = vst [vmem:[#allocation36_spill] sm:$0xff] %v2829_v10  ;;  %vm1019_vm12 = vcmp.eq.f32.partialorder %v995_v19, %v2829_v10  ;;  %vm1048_vm5 = vcmp.eq.f32.partialorder %v1045_v20, %v2827_v43  ;;  %v1070_v19 = vand.u32 65535, %v1023_v15  ;;  %v1140_v15 = vmax.f32 %v2433_v55, %v2553_v49 }
 0x6b9   :  { %v1049_v16 = vsel %vm1048_vm5, %v1044_v35, inf  ;;  %v2834_v31 = vsel %vm1019_vm12, %v2431_v54, 128 }
 0x6ba   :  { %1050 = vmin.xlane.f32.xlu1 %v1049_v16  ;;  %v1127_v41 = vshra.s32 %v2834_v31, 16  ;;  %v1072_v20 = vcvt.s32.f32 %v1070_v19  ;;  %v1148_v24 = vmax.f32 %v1140_v15, %v2681_v48 }
 0x6bc   :  { %v2837_v56 = vcvt.s32.f32 %v1127_v41  ;;  %v1086_v41 = vcvt.s32.f32 %v1084_v53  ;;  %v1156_v19 = vmax.f32 %v1148_v24, %v2788_v11 }
 0x6be   :  { %1130 = vmin.xlane.f32.xlu2 %v2837_v56  ;;  %v1188_v53 = vsub.f32 %v2553_v49, %v1156_v19 }
 0x6bf   :  { %v2840_v60 = vpop.xlane.xlu1 %1060 }
 0x6c0   :  { %vm1062_vm13 = vcmp.eq.f32.partialorder %v1059_v13, %v2840_v60 }
 0x6c1   :  { %v1063_v22 = vsel %vm1062_vm13, %v1058_v29, inf  ;;  %v1100_v29 = vcvt.s32.f32 %v1098_v27  ;;  %v1196_v27 = vmul.f32 1.442695, %v1188_v53 }
 0x6c2   :  { %1064 = vmin.xlane.f32.xlu0 %v1063_v22  ;;  %v1112_v22 = vand.u32 65535, %v1026_v1 }
 0x6c4   :  { %v1114_v58 = vcvt.s32.f32 %v1112_v22  ;;  %v1236_v22 = vsub.f32 %v2788_v11, %v1156_v19 }
 0x6c7   :  { %v2843_v35 = vpop.xlane.xlu2 %1074 }
 0x6c8   :  { %vm1076_vm12 = vcmp.eq.f32.partialorder %v1073_v40, %v2843_v35 }
 0x6c9   :  { %v1077_v14 = vsel %vm1076_vm12, %v1072_v20, inf  ;;  %v1164_v20 = vsub.f32 %v2433_v55, %v1156_v19 }
 0x6ca   :  { %1078 = vmin.xlane.f32.xlu1 %v1077_v14 }
 0x6cf   :  { %v2846_v16 = vpop.xlane.xlu0 %1088 }
 0x6d0   :  { %vm1090_vm5 = vcmp.eq.f32.partialorder %v1087_v50, %v2846_v16  ;;  %v1141_v50 = vmax.f32 %v2438_v59, %v2558_v63 }
 0x6d1   :  { %v1091_v10 = vsel %vm1090_vm5, %v1086_v41, inf  ;;  %v1172_v41 = vmul.f32 1.442695, %v1164_v20 }
 0x6d2   :  { %1092 = vmin.xlane.f32.xlu2 %v1091_v10 }
 0x6d3   :  { %1753 = vpow2.f32 %v1172_v41 }
 0x6d4   :  { %1755 = vpow2.f32 %v1196_v27 }
 0x6d7   :  { %v2849_v13 = vpop.xlane.xlu1 %1102 }
 0x6d8   :  { %3383 = vst [vmem:[#allocation37_spill] sm:$0xff] %v2849_v13  ;;  %vm1104_vm13 = vcmp.eq.f32.partialorder %v1101_v47, %v2849_v13  ;;  %v1149_v47 = vmax.f32 %v1141_v50, %v2686_v61 }
 0x6d9   :  { %v1105_v40 = vsel %vm1104_vm13, %v1100_v29, inf  ;;  %v1212_v29 = vsub.f32 %v2681_v48, %v1156_v19 }
 0x6da   :  { %1106 = vmin.xlane.f32.xlu0 %v1105_v40  ;;  %v1157_v1 = vmax.f32 %v1149_v47, %v2792_v51  ;;  %v1244_v47 = vmul.f32 1.442695, %v1236_v22 }
 0x6db   :  { %v1220_v55 = vmul.f32 1.442695, %v1212_v29 }
 0x6dc   :  { %v1165_v15 = vsub.f32 %v2438_v59, %v1157_v1  ;;  %v1189_v40 = vsub.f32 %v2558_v63, %v1157_v1  ;;  %v2874_v59 = vpop.eup %1753  ;;  %v1237_v20 = vsub.f32 %v2792_v51, %v1157_v1 }
 0x6dd   :  { %1757 = vpow2.f32 %v1220_v55  ;;  %v2876_v63 = vpop.eup %1755 }
 0x6de   :  { %v1174_v24 = vmul.f32 1.442695, %v1165_v15  ;;  %v1198_v50 = vmul.f32 1.442695, %v1189_v40  ;;  %v1246_v15 = vmul.f32 1.442695, %v1237_v20 }
 0x6df   :  { %v2858_v10 = vpop.xlane.xlu0 %1116 }
 0x6e0   :  { %3384 = vst [vmem:[#allocation38_spill] sm:$0xff] %v2858_v10  ;;  %vm1118_vm12 = vcmp.eq.f32.partialorder %v1115_v30, %v2858_v10  ;;  %v1142_v30 = vmax.f32 %v2446_v34, %v2574_v6  ;;  %1759 = vpow2.f32 %v1174_v24 }
 0x6e1   :  { %v1119_v14 = vsel %vm1118_vm12, %v1114_v58, inf  ;;  %v1213_v58 = vsub.f32 %v2686_v61, %v1157_v1  ;;  %1761 = vpow2.f32 %v1198_v50  ;;  %v1260_v61 = vadd.f32 %v2876_v63, %v2874_v59 }
 0x6e2   :  { %1120 = vmin.xlane.f32.xlu1 %v1119_v14  ;;  %v1150_v49 = vmax.f32 %v1142_v30, %v2702_v33  ;;  %v1143_v14 = vmax.f32 %v2451_v38, %v2579_v9  ;;  %1763 = vpow2.f32 %v1244_v47 }
 0x6e3   :  { %v1222_v53 = vmul.f32 1.442695, %v1213_v58  ;;  %v2885_v41 = vpop.eup %1757 }
 0x6e4   :  { %v1158_v48 = vmax.f32 %v1150_v49, %v2804_v28  ;;  %v1151_v27 = vmax.f32 %v1143_v14, %v2707_v37  ;;  %v1144_v49 = vmax.f32 %v2456_v4, %v2584_v12 }
 0x6e5   :  { %1765 = vpow2.f32 %v1222_v53 }
 0x6e6   :  { %v1166_v11 = vsub.f32 %v2446_v34, %v1158_v48  ;;  %v1190_v19 = vsub.f32 %v2574_v6, %v1158_v48  ;;  %v2888_v29 = vpop.eup %1759  ;;  %v1159_v40 = vmax.f32 %v1151_v27, %v2808_v26  ;;  %v1268_v34 = vadd.f32 %v2885_v41, %v1260_v61 }
 0x6e7   :  { %v2890_v51 = vpop.eup %1761  ;;  %1767 = vpow2.f32 %v1246_v15  ;;  %v1214_v55 = vsub.f32 %v2702_v33, %v1158_v48  ;;  %v1152_v20 = vmax.f32 %v1144_v49, %v2712_v2  ;;  %v1238_v33 = vsub.f32 %v2804_v28, %v1158_v48 }
 0x6e8   :  { %v1176_v1 = vmul.f32 1.442695, %v1166_v11  ;;  %v1200_v30 = vmul.f32 1.442695, %v1190_v19  ;;  %v1261_v6 = vadd.f32 %v2890_v51, %v2888_v29  ;;  %v2897_v24 = vpop.eup %1763  ;;  %v1167_v22 = vsub.f32 %v2451_v38, %v1159_v40 }
 0x6e9   :  { %v2903_v50 = vadd.f32 %v2897_v24, %v1268_v34  ;;  %v1191_v58 = vsub.f32 %v2579_v9, %v1159_v40  ;;  %v1224_v53 = vmul.f32 1.442695, %v1214_v55  ;;  %v1160_v61 = vmax.f32 %v1152_v20, %v2812_v17 }
 0x6ea   :  { %1769 = vpow2.f32 %v1176_v1  ;;  %v1178_v11 = vmul.f32 1.442695, %v1167_v22  ;;  %v1248_v9 = vmul.f32 1.442695, %v1238_v33  ;;  %v1215_v28 = vsub.f32 %v2707_v37, %v1159_v40 }
 0x6eb   :  { %1771 = vpow2.f32 %v1200_v30  ;;  %v2906_v47 = vpop.eup %1765  ;;  %v1202_v38 = vmul.f32 1.442695, %v1191_v58  ;;  %v1145_v48 = vmax.f32 %v2461_v7, %v2589_v23  ;;  %v1168_v34 = vsub.f32 %v2456_v4, %v1160_v61 }
 0x6ec   :  { %v1269_v14 = vadd.f32 %v2906_v47, %v1261_v6  ;;  %1773 = vrcp.f32 %v2903_v50  ;;  %v1192_v30 = vsub.f32 %v2584_v12, %v1160_v61  ;;  %v1226_v37 = vmul.f32 1.442695, %v1215_v28 }
 0x6ed   :  { %v2912_v19 = vpop.eup %1767  ;;  %1775 = vpow2.f32 %v1224_v53  ;;  %v1153_v6 = vmax.f32 %v1145_v48, %v2717_v62  ;;  %v1239_v22 = vsub.f32 %v2808_v26, %v1159_v40  ;;  %v1180_v58 = vmul.f32 1.442695, %v1168_v34 }
 0x6ee   :  { %v2920_v1 = vadd.f32 %v2912_v19, %v1269_v14  ;;  %1777 = vpow2.f32 %v1178_v11  ;;  %v1204_v12 = vmul.f32 1.442695, %v1192_v30  ;;  %v1216_v26 = vsub.f32 %v2712_v2, %v1160_v61 }
 0x6ef   :  { %1779 = vpow2.f32 %v1202_v38  ;;  %v2935_v20 = vmax.f32 %v1153_v6, %v2816_v5  ;;  %v1250_v38 = vmul.f32 1.442695, %v1239_v22  ;;  %v1240_v22 = vsub.f32 %v2812_v17, %v1160_v61 }
 0x6f0   :  { %v2915_v27 = vpop.eup %1769  ;;  %1781 = vpow2.f32 %v1248_v9  ;;  %v1146_v9 = vmax.f32 %v2466_v42, %v2594_v25  ;;  %vm1289_vm13 = vweird.f32 %v2903_v50 }
 0x6f1   :  { %v2917_v15 = vpop.eup %1771  ;;  %1783 = vrcp.f32 %v2920_v1  ;;  %v1169_v28 = vsub.f32 %v2461_v7, %v2935_v20  ;;  %v1193_v34 = vsub.f32 %v2589_v23, %v2935_v20  ;;  %v1252_v17 = vmul.f32 1.442695, %v1240_v22 }
 0x6f2   :  { %v1262_v55 = vadd.f32 %v2917_v15, %v2915_v27  ;;  %v2930_v49 = vpop.eup %1773  ;;  %1785 = vpow2.f32 %v1226_v37  ;;  %v1154_v30 = vmax.f32 %v1146_v9, %v2722_v32  ;;  %v1228_v37 = vmul.f32 1.442695, %v1216_v26 }
 0x6f3   :  { %v2937_v4 = vpop.eup %1775  ;;  %v1285_v53 = vmul.f32 %v2930_v49, %v2903_v50  ;;  %1787 = vpow2.f32 %v1180_v58  ;;  %v1182_v7 = vmul.f32 1.442695, %v1169_v28  ;;  %v1206_v9 = vmul.f32 1.442695, %v1193_v34 }
 0x6f4   :  { %v2939_v33 = vpop.eup %1777  ;;  %v1270_v14 = vadd.f32 %v2937_v4, %v1262_v55  ;;  %1789 = vpow2.f32 %v1204_v12  ;;  %v2965_v58 = vmax.f32 %v1154_v30, %v2820_v3  ;;  %v1217_v61 = vsub.f32 %v2717_v62, %v2935_v20 }
 0x6f5   :  { %v2944_v11 = vpop.eup %1779  ;;  %v1286_v55 = vsub.f32 1.0, %v1285_v53  ;;  %1791 = vpow2.f32 %v1250_v38  ;;  %vm1290_vm5 = vweird.f32 %v2930_v49  ;;  %v1241_v22 = vsub.f32 %v2816_v5, %v2935_v20 }
 0x6f6   :  { %v2947_v40 = vpop.eup %1781  ;;  %v1263_v2 = vadd.f32 %v2944_v11, %v2939_v33  ;;  %v1170_v28 = vsub.f32 %v2466_v42, %v2965_v58  ;;  %v1230_v42 = vmul.f32 1.442695, %v1217_v61  ;;  %vm3003_vm12 = vmor %vm1289_vm13, %vm1290_vm5  ;;  %vm1304_vm13 = vweird.f32 %v2920_v1 }
 0x6f7   :  { %v2953_v48 = vpop.eup %1783  ;;  %v2959_v6 = vadd.f32 %v2947_v40, %v1270_v14  ;;  %v1287_v38 = vmul.f32 %v2930_v49, %v1286_v55  ;;  %v1293_v55 = vand.u32 2147483647, %v2903_v50 }
 0x6f8   :  { %v1300_v23 = vmul.f32 %v2953_v48, %v2920_v1  ;;  %v2969_v12 = vpop.eup %1785  ;;  %vm1305_vm5 = vweird.f32 %v2953_v48 }
 0x6f9   :  { %v2971_v14 = vpop.eup %1787  ;;  %1793 = vrcp.f32 %v2959_v6  ;;  %v1271_v53 = vadd.f32 %v2969_v12, %v1263_v2  ;;  %v1194_v2 = vsub.f32 %v2594_v25, %v2965_v58  ;;  %v1288_v62 = vadd.f32 %v2930_v49, %v1287_v38 }
 0x6fa   :  { %v2976_v26 = vpop.eup %1789  ;;  %1795 = vpow2.f32 %v1228_v37  ;;  %v1301_v34 = vsub.f32 1.0, %v1300_v23  ;;  %v1184_v25 = vmul.f32 1.442695, %v1170_v28  ;;  %vm3014_vm4 = vcmp.eq.f32.partialorder %v1293_v55, 8.507059e+37 }
 0x6fb   :  { %1797 = vpow2.f32 %v1182_v7  ;;  %v2982_v30 = vpop.eup %1791  ;;  %v1264_v37 = vadd.f32 %v2976_v26, %v2971_v14  ;;  %v134_v7 = vld [vmem:[#allocation7] sm:$0xff]  ;;  %v1208_v13 = vmul.f32 1.442695, %v1194_v2  ;;  %v1218_v2 = vsub.f32 %v2722_v32, %v2965_v58 }
 0x6fc   :  { %1799 = vpow2.f32 %v1206_v9  ;;  %v2988_v10 = vadd.f32 %v2982_v30, %v1271_v53  ;;  %v1295_v9 = vand.u32 2147483648, %v2903_v50  ;;  %238 = vmatmul.f32.gmra.mxu0 %v134_v7  ;;  %327 = vmatmul.f32.gmra.mxu1 %v134_v7  ;;  %v1302_v53 = vmul.f32 %v2953_v48, %v1301_v34 }
 0x6fd   :  { %1801 = vpow2.f32 %v1252_v17  ;;  %v1292_v50 = vsel %vm3003_vm12, %v2930_v49, %v1288_v62  ;;  %v1254_v34 = vmul.f32 1.442695, %v1241_v22  ;;  %v1308_v55 = vand.u32 2147483647, %v2920_v1  ;;  %vm3040_vm12 = vmor %vm1304_vm13, %vm1305_vm5 }
 0x6fe   :  { %1803 = vrcp.f32 %v2988_v10  ;;  %v1310_v62 = vand.u32 2147483648, %v2920_v1  ;;  %vm1334_vm13 = vweird.f32 %v2988_v10 }
 0x6ff   :  { %v2996_v23 = vpop.eup %1793  ;;  %1805 = vpow2.f32 %v1230_v42  ;;  %v135_v42 = vld [vmem:[#allocation7 + $0x8] sm:$0xff] }
 0x700   :  { %v3001_v38 = vpop.eup %1795  ;;  %v1315_v7 = vmul.f32 %v2996_v23, %v2959_v6  ;;  %1807 = vpow2.f32 %v1184_v25  ;;  %v1242_v25 = vsub.f32 %v2820_v3, %v2965_v58 }
 0x701   :  { %3385 = vst [vmem:[#allocation39_spill] sm:$0xff] %v3001_v38  ;;  %v3007_v5 = vpop.eup %1797  ;;  %v1272_v20 = vadd.f32 %v3001_v38, %v1264_v37  ;;  %v1296_v37 = vor.u32 1.1754944e-38, %v1295_v9  ;;  %v1303_v38 = vadd.f32 %v2953_v48, %v1302_v53  ;;  %1809 = vpow2.f32 %v1208_v13 }
 0x702   :  { %v3018_v28 = vpop.eup %1799  ;;  %1811 = vpow2.f32 %v1254_v34  ;;  %v1232_v13 = vmul.f32 1.442695, %v1218_v2  ;;  %v1316_v1 = vsub.f32 1.0, %v1315_v7  ;;  %v1256_v2 = vmul.f32 1.442695, %v1242_v25 }
 0x703   :  { %v3026_v49 = vpop.eup %1801  ;;  %v1265_v22 = vadd.f32 %v3018_v28, %v3007_v5  ;;  %v1297_v9 = vsel %vm3014_vm4, %v1296_v37, %v1292_v50  ;;  %v1311_v50 = vor.u32 1.1754944e-38, %v1310_v62  ;;  %vm1309_vm4 = vcmp.eq.f32.partialorder %v1308_v55, 8.507059e+37 }
 0x704   :  { %3390 = vst [vmem:[#allocation40_spill] sm:$0xff] %v3026_v49  ;;  %v3032_v32 = vadd.f32 %v3026_v49, %v1272_v20  ;;  %v3044_v17 = vpop.eup %1803  ;;  %v1307_v20 = vsel %vm3040_vm12, %v2953_v48, %v1303_v38  ;;  %241 = vmatmul.f32.gmra.mxu0 %v135_v42  ;;  %330 = vmatmul.f32.gmra.mxu1 %v135_v42 }
 0x705   :  { %v3049_v49 = vpop.eup %1805  ;;  %v1298_v3 = vmul.f32 %v2874_v59, %v1297_v9  ;;  %v1404_v58 = vmul.f32 %v2876_v63, %v1297_v9  ;;  %v3059_v48 = vsel %vm1309_vm4, %v1311_v50, %v1307_v20  ;;  %v1317_v38 = vmul.f32 %v2996_v23, %v1316_v1 }
 0x706   :  { %v3053_v61 = vpop.eup %1807  ;;  %1813 = vrcp.f32 %v3032_v32  ;;  %v1273_v34 = vadd.f32 %v3049_v49, %v1265_v22  ;;  %v1330_v59 = vmul.f32 %v3044_v17, %v2988_v10  ;;  %v1039_v63 = vcvt.f32.s32 %v2824_v57  ;;  %v136_v22 = vld [vmem:[#allocation7 + $0x10] sm:$0xff] }
 0x707   :  { %v3057_v7 = vpop.eup %1809  ;;  %1815 = vpow2.f32 %v1232_v13  ;;  %v1412_v62 = vmul.f32 %v2885_v41, %v1297_v9  ;;  %v1428_v55 = vsel %vm660_vm15, %v1298_v3, 0.0  ;;  %v1444_v42 = vsel %vm820_vm1, %v1404_v58, 0.0 }
 0x708   :  { %v3065_v37 = vpop.eup %1811  ;;  %v1266_v13 = vadd.f32 %v3057_v7, %v3053_v61  ;;  %v1313_v57 = vmul.f32 %v2888_v29, %v3059_v48  ;;  %v1405_v41 = vmul.f32 %v2890_v51, %v3059_v48  ;;  %1817 = vpow2.f32 %v1256_v2 }
 0x709   :  { %v3075_v25 = vadd.f32 %v3065_v37, %v1273_v34  ;;  %v1318_v53 = vadd.f32 %v2996_v23, %v1317_v38  ;;  %vm1320_vm15 = vweird.f32 %v2996_v23  ;;  %v1331_v52 = vsub.f32 1.0, %v1330_v59 }
 0x70a   :  { %v1040_v20 = vshll.u32 %v1039_v63, 16  ;;  %v1452_v58 = vadd.f32 %v1444_v42, %v1428_v55  ;;  %v1325_v50 = vand.u32 2147483648, %v2959_v6  ;;  %v1420_v51 = vmul.f32 %v2897_v24, %v1297_v9 }
 0x70b   :  { %v1460_v34 = vsel %vm980_vm8, %v1412_v62, 0.0  ;;  %vm1319_vm1 = vweird.f32 %v2959_v6  ;;  %v1323_v2 = vand.u32 2147483647, %v2959_v6  ;;  %1819 = vrcp.f32 %v3075_v25 }
 0x70c   :  { %v3085_v1 = vpop.eup %1813  ;;  %244 = vmatmul.f32.gmra.mxu0 %v136_v22  ;;  %333 = vmatmul.f32.gmra.mxu1 %v136_v22  ;;  %v1429_v63 = vsel %vm661_vm0, %v1313_v57, 0.0  ;;  %vm3103_vm5 = vmor %vm1319_vm1, %vm1320_vm15  ;;  %v1445_v18 = vsel %vm821_vm7, %v1405_v41, 0.0  ;;  %v1332_v9 = vmul.f32 %v3044_v17, %v1331_v52  ;;  %v1053_v62 = vcvt.f32.s32 %v2827_v43 }
 0x70d   :  { %v3088_v29 = vpop.eup %1815  ;;  %v1322_v6 = vsel %vm3103_vm5, %v2996_v23, %v1318_v53  ;;  %v1345_v8 = vmul.f32 %v3085_v1, %v3032_v32  ;;  %v1468_v55 = vadd.f32 %v1460_v34, %v1452_v58  ;;  %v1326_v42 = vor.u32 1.1754944e-38, %v1325_v50  ;;  %v137_v53 = vld [vmem:[#allocation7 + $0x18] sm:$0xff] }
 0x70e   :  { %v1274_v38 = vadd.f32 %v3088_v29, %v1266_v13  ;;  %v3118_v22 = vpop.eup %1817  ;;  %v1413_v46 = vmul.f32 %v2906_v47, %v3059_v48  ;;  %vm1324_vm7 = vcmp.eq.f32.partialorder %v1323_v2, 8.507059e+37  ;;  %v1453_v41 = vadd.f32 %v1445_v18, %v1429_v63 }
 0x70f   :  { %v1333_v43 = vadd.f32 %v3044_v17, %v1332_v9  ;;  %vm1335_vm8 = vweird.f32 %v3044_v17  ;;  %v1054_v50 = vshll.u32 %v1053_v62, 16  ;;  %v1340_v34 = vand.u32 2147483648, %v2988_v10 }
 0x710   :  { %v3123_v23 = vadd.f32 %v3118_v22, %v1274_v38  ;;  %v1461_v2 = vsel %vm981_vm6, %v1413_v46, 0.0  ;;  %vm3143_vm12 = vmor %vm1334_vm13, %vm1335_vm8  ;;  %v1067_v18 = vcvt.f32.s32 %v2840_v60  ;;  %vm1350_vm1 = vweird.f32 %v3085_v1 }
 0x711   :  { %v3128_v58 = vpop.eup %1819  ;;  %v1469_v24 = vadd.f32 %v1461_v2, %v1453_v41 }
 0x712   :  { %1821 = vrcp.f32 %v3123_v23  ;;  %v1068_v44 = vshll.u32 %v1067_v18, 16 }
 0x714   :  { %247 = vmatmul.f32.gmra.mxu0 %v137_v53  ;;  %336 = vmatmul.f32.gmra.mxu1 %v137_v53 }
 0x718   :  { %v3168_v41 = vpop.eup %1821 }
 0x725   :  { %v1037_v39 = vpop.xlane.xlu2 %1036 }
 0x726   :  { %v1038_v3 = vcvt.f32.s32 %v1037_v39  ;;  %v1327_v39 = vsel %vm1324_vm7, %v1326_v42, %v1322_v6  ;;  %v1341_v6 = vor.u32 1.1754944e-38, %v1340_v34  ;;  %v138_v42 = vld [vmem:[#allocation7 + $0x20] sm:$0xff] }
 0x727   :  { %v1328_v38 = vmul.f32 %v2915_v27, %v1327_v39  ;;  %v1337_v27 = vsel %vm3143_vm12, %v3044_v17, %v1333_v43  ;;  %v1414_v46 = vmul.f32 %v2937_v4, %v1327_v39  ;;  %v1353_v4 = vand.u32 2147483647, %v3032_v32  ;;  %250 = vmatmul.f32.gmra.mxu0 %v138_v42  ;;  %339 = vmatmul.f32.gmra.mxu1 %v138_v42 }
 0x728   :  { %v1041_v59 = vadd.s32 %v1040_v20, %v1038_v3  ;;  %v1338_v20 = vand.u32 2147483647, %v2988_v10  ;;  %v1346_v3 = vsub.f32 1.0, %v1345_v8  ;;  %vm1380_vm12 = vweird.f32 %v3168_v41 }
 0x729   :  { %v1430_v17 = vsel %vm662_vm2, %v1328_v38, 0.0  ;;  %vm1349_vm2 = vweird.f32 %v3032_v32 }
 0x72a   :  { %vm1476_vm0 = vcmp.eq.s32.totalorder %v2431_v54, %v1041_v59  ;;  %v1406_v59 = vmul.f32 %v2917_v15, %v1327_v39  ;;  %vm1339_vm6 = vcmp.eq.f32.partialorder %v1338_v20, 8.507059e+37  ;;  %v1347_v10 = vmul.f32 %v3085_v1, %v1346_v3 }
 0x72b   :  { %v1484_v13 = vsel %vm1476_vm0, %v1420_v51, 0.0  ;;  %v1126_v51 = vand.u32 65535, %v2834_v31  ;;  %v1421_v31 = vmul.f32 %v2912_v19, %v3059_v48  ;;  %v1360_v15 = vmul.f32 %v3128_v58, %v3075_v25 }
 0x72c   :  { %v1492_v57 = vadd.f32 %v1484_v13, %v1468_v55  ;;  %v1446_v8 = vsel %vm822_vm10, %v1406_v59, 0.0  ;;  %v1342_v55 = vsel %vm1339_vm6, %v1341_v6, %v1337_v27  ;;  %vm1351_vm10 = vmor %vm1349_vm2, %vm1350_vm1  ;;  %vm1365_vm0 = vweird.f32 %v3128_v58 }
 0x72d   :  { %v1051_v52 = vpop.xlane.xlu1 %1050  ;;  %v1128_v48 = vcvt.s32.f32 %v1126_v51  ;;  %v1454_v45 = vadd.f32 %v1446_v8, %v1430_v17  ;;  %v1343_v43 = vmul.f32 %v2939_v33, %v1342_v55  ;;  %v1407_v20 = vmul.f32 %v2944_v11, %v1342_v55 }
 0x72e   :  { %v1052_v47 = vcvt.f32.s32 %v1051_v52  ;;  %1516 = vmatmul.f32.vlgmr.msrb.gmra.mxu2 %v1492_v57  ;;  %1557 = vmatmul.f32.vlgmr.msrb.gmra.mxu3 %v1492_v57  ;;  %v1348_v57 = vadd.f32 %v3085_v1, %v1347_v10  ;;  %v1355_v52 = vand.u32 2147483648, %v3032_v32  ;;  %v1375_v51 = vmul.f32 %v3168_v41, %v3123_v23 }
 0x72f   :  { %v1081_v32 = vcvt.f32.s32 %v2843_v35  ;;  %v1431_v38 = vsel %vm663_vm3, %v1343_v43, 0.0  ;;  %v1415_v35 = vmul.f32 %v2969_v12, %v1342_v55  ;;  %vm1364_vm3 = vweird.f32 %v3075_v25 }
 0x730   :  { %v1055_v63 = vadd.s32 %v1054_v50, %v1052_v47  ;;  %v1422_v50 = vmul.f32 %v2947_v40, %v1327_v39  ;;  %v1462_v47 = vsel %vm982_vm14, %v1414_v46, 0.0  ;;  %v1352_v33 = vsel %vm1351_vm10, %v3085_v1, %v1348_v57  ;;  %v3399_v46 = vld [vmem:[#allocation21_spill] sm:$0xff] }
 0x731   :  { %v3154_v19 = vpop.xlane.xlu2 %1130  ;;  %v1470_v34 = vadd.f32 %v1462_v47, %v1454_v45  ;;  %v1356_v40 = vor.u32 1.1754944e-38, %v1355_v52  ;;  %v1447_v1 = vsel %vm823_vm11, %v1407_v20, 0.0  ;;  %vm1354_vm14 = vcmp.eq.f32.partialorder %v1353_v4, 8.507059e+37  ;;  %vm1366_vm11 = vmor %vm1364_vm3, %vm1365_vm0 }
 0x732   :  { %vm1477_vm4 = vcmp.eq.s32.totalorder %v2431_v54, %v1055_v63  ;;  %vm1132_vm15 = vcmp.eq.f32.partialorder %v2837_v56, %v3154_v19  ;;  %v1361_v56 = vsub.f32 1.0, %v1360_v15  ;;  %v1376_v27 = vsub.f32 1.0, %v1375_v51 }
 0x733   :  { %v1485_v9 = vsel %vm1477_vm4, %v1421_v31, 0.0  ;;  %v1133_v62 = vsel %vm1132_vm15, %v1128_v48, inf  ;;  %v1357_v63 = vsel %vm1354_vm14, %v1356_v40, %v1352_v33  ;;  %v139_v31 = vld [vmem:[#allocation7 + $0x28] sm:$0xff]  ;;  %v1082_v10 = vshll.u32 %v1081_v32, 16 }
 0x734   :  { %v1493_v60 = vadd.f32 %v1485_v9, %v1469_v24  ;;  %1134 = vmin.xlane.f32.xlu2 %v1133_v62  ;;  %v1362_v11 = vmul.f32 %v3128_v58, %v1361_v56  ;;  %v1455_v18 = vadd.f32 %v1447_v1, %v1431_v38  ;;  %v1370_v48 = vand.u32 2147483648, %v3075_v25  ;;  %253 = vmatmul.f32.gmra.mxu0 %v139_v31  ;;  %v140_v56 = vld [vmem:[#allocation7 + $0x30] sm:$0xff]  ;;  %v3405_v32 = vld [vmem:[#allocation32_spill] sm:$0xff] }
 0x735   :  { %v1065_v13 = vpop.xlane.xlu0 %1064  ;;  %v1358_v6 = vmul.f32 %v2971_v14, %v1357_v63  ;;  %v1408_v9 = vmul.f32 %v2976_v26, %v1357_v63  ;;  %v1368_v12 = vand.u32 2147483647, %v3075_v25  ;;  %342 = vmatmul.f32.gmra.mxu1 %v139_v31  ;;  %v1423_v8 = vmul.f32 %v2982_v30, %v1342_v55  ;;  %v3401_v30 = vld [vmem:[#allocation27_spill] sm:$0xff]  ;;  %v3410_v1 = vld [vmem:[#allocation28_spill] sm:$0xff] }
 0x736   :  { %v1066_v53 = vcvt.f32.s32 %v1065_v13  ;;  %1519 = vmatmul.f32.gmra.mxu2 %v1493_v60  ;;  %1560 = vmatmul.f32.gmra.mxu3 %v1493_v60  ;;  %v1363_v36 = vadd.f32 %v3128_v58, %v1362_v11  ;;  %v1463_v62 = vsel %vm983_vm9, %v1415_v35, 0.0  ;;  %v1377_v26 = vmul.f32 %v3168_v41, %v1376_v27  ;;  %v3404_v11 = vld [vmem:[#allocation40_spill] sm:$0xff] }
 0x737   :  { %v1095_v60 = vcvt.f32.s32 %v2846_v16  ;;  %v1471_v42 = vadd.f32 %v1463_v62, %v1455_v18  ;;  %v1371_v25 = vor.u32 1.1754944e-38, %v1370_v48  ;;  %vm3400_vm8 = vcmp.eq.s32.totalorder %v2431_v54, %v3399_v46  ;;  %v3415_v62 = vld [vmem:[#allocation23_spill] sm:$0xff] }
 0x738   :  { %v1069_v3 = vadd.s32 %v1068_v44, %v1066_v53  ;;  %v1367_v14 = vsel %vm1366_vm11, %v3128_v58, %v1363_v36  ;;  %v1432_v57 = vsel %vm3400_vm8, %v1358_v6, 0.0  ;;  %vm3402_vm13 = vcmp.eq.s32.totalorder %v2431_v54, %v3401_v30  ;;  %v3403_v53 = vld [vmem:[#allocation39_spill] sm:$0xff]  ;;  %v3412_v6 = vld [vmem:[#allocation33_spill] sm:$0xff]  ;;  %v3419_v30 = vld [vmem:[#allocation34_spill] sm:$0xff] }
 0x739   :  { %v1448_v21 = vsel %vm3402_vm13, %v1408_v9, 0.0  ;;  %vm1369_vm9 = vcmp.eq.f32.partialorder %v1368_v12, 8.507059e+37  ;;  %v1416_v16 = vmul.f32 %v3403_v53, %v1357_v63  ;;  %v1378_v45 = vadd.f32 %v3168_v41, %v1377_v26  ;;  %v3414_v12 = vld [vmem:[#allocation38_spill] sm:$0xff]  ;;  %v3422_v53 = vld [vmem:[#allocation19_spill] sm:$0xff] }
 0x73a   :  { %vm1478_vm5 = vcmp.eq.s32.totalorder %v2431_v54, %v1069_v3  ;;  %v1372_v58 = vsel %vm1369_vm9, %v1371_v25, %v1367_v14  ;;  %v1096_v52 = vshll.u32 %v1095_v60, 16  ;;  %v1456_v20 = vadd.f32 %v1448_v21, %v1432_v57 }
 0x73b   :  { %v1486_v39 = vsel %vm1478_vm5, %v1422_v50, 0.0  ;;  %v1385_v4 = vand.u32 2147483648, %v3123_v23  ;;  %v1373_v3 = vmul.f32 %v3007_v5, %v1372_v58  ;;  %v1409_v50 = vmul.f32 %v3018_v28, %v1372_v58 }
 0x73c   :  { %v1494_v59 = vadd.f32 %v1486_v39, %v1470_v34  ;;  %vm1379_vm6 = vweird.f32 %v3123_v23  ;;  %v1383_v47 = vand.u32 2147483647, %v3123_v23  ;;  %256 = vmatmul.f32.gmra.mxu0 %v140_v56  ;;  %v1424_v51 = vmul.f32 %v3404_v11, %v1357_v63  ;;  %v3407_v39 = vld [vmem:[#allocation37_spill] sm:$0xff]  ;;  %v3408_v23 = vld [vmem:[#allocation22_spill] sm:$0xff] }
 0x73d   :  { %v1079_v24 = vpop.xlane.xlu1 %1078  ;;  %345 = vmatmul.f32.gmra.mxu1 %v140_v56  ;;  %vm1381_vm4 = vmor %vm1379_vm6, %vm1380_vm12  ;;  %vm3406_vm15 = vcmp.eq.s32.totalorder %v2431_v54, %v3405_v32  ;;  %v1109_v5 = vcvt.f32.s32 %v3407_v39  ;;  %v1386_v28 = vor.u32 1.1754944e-38, %v1385_v4  ;;  %vm3409_vm2 = vcmp.eq.s32.totalorder %v2431_v54, %v3408_v23 }
 0x73e   :  { %v1080_v15 = vcvt.f32.s32 %v1079_v24  ;;  %1522 = vmatmul.f32.gmra.mxu2 %v1494_v59  ;;  %1563 = vmatmul.f32.gmra.mxu3 %v1494_v59  ;;  %v1464_v34 = vsel %vm3406_vm15, %v1416_v16, 0.0  ;;  %v1382_v40 = vsel %vm1381_vm4, %v3168_v41, %v1378_v45  ;;  %v1433_v0 = vsel %vm3409_vm2, %v1373_v3, 0.0  ;;  %v3423_v16 = vld [vmem:[#allocation31_spill] sm:$0xff] }
 0x73f   :  { %v1472_v2 = vadd.f32 %v1464_v34, %v1456_v20  ;;  %vm3411_vm10 = vcmp.eq.s32.totalorder %v2431_v54, %v3410_v1  ;;  %vm1384_vm5 = vcmp.eq.f32.partialorder %v1383_v47, 8.507059e+37  ;;  %v1417_v41 = vmul.f32 %v3049_v49, %v1372_v58  ;;  %v141_v1 = vld [vmem:[#allocation7 + $0x38] sm:$0xff] }
 0x740   :  { %v1083_v17 = vadd.s32 %v1082_v10, %v1080_v15  ;;  %v1449_v59 = vsel %vm3411_vm10, %v1409_v50, 0.0  ;;  %v1387_v31 = vsel %vm1384_vm5, %v1386_v28, %v1382_v40  ;;  %v1110_v35 = vshll.u32 %v1109_v5, 16 }
 0x741   :  { %v1457_v27 = vadd.f32 %v1449_v59, %v1433_v0  ;;  %v1388_v10 = vmul.f32 %v3053_v61, %v1387_v31  ;;  %v1410_v15 = vmul.f32 %v3057_v7, %v1387_v31  ;;  %v1425_v48 = vmul.f32 %v3065_v37, %v1372_v58  ;;  %v3417_v61 = vld [vmem:[#allocation29_spill] sm:$0xff] }
 0x742   :  { %vm1479_vm7 = vcmp.eq.s32.totalorder %v2431_v54, %v1083_v17  ;;  %vm3413_vm14 = vcmp.eq.s32.totalorder %v2431_v54, %v3412_v6  ;;  %v1123_v17 = vcvt.f32.s32 %v3414_v12  ;;  %vm3416_vm3 = vcmp.eq.s32.totalorder %v2431_v54, %v3415_v62 }
 0x743   :  { %v1487_v13 = vsel %vm1479_vm7, %v1423_v8, 0.0  ;;  %v1465_v9 = vsel %vm3413_vm14, %v1417_v41, 0.0  ;;  %v1434_v14 = vsel %vm3416_vm3, %v1388_v10, 0.0  ;;  %vm3418_vm11 = vcmp.eq.s32.totalorder %v2431_v54, %v3417_v61 }
 0x744   :  { %v1495_v55 = vadd.f32 %v1487_v13, %v1471_v42  ;;  %v1473_v8 = vadd.f32 %v1465_v9, %v1457_v27  ;;  %v1450_v7 = vsel %vm3418_vm11, %v1410_v15, 0.0  ;;  %v1418_v60 = vmul.f32 %v3088_v29, %v1387_v31  ;;  %259 = vmatmul.f32.gmra.mxu0 %v141_v1  ;;  %v3427_v9 = vld [vmem:[#allocation30_spill] sm:$0xff] }
 0x745   :  { %v1093_v44 = vpop.xlane.xlu2 %1092  ;;  %v1124_v42 = vshll.u32 %v1123_v17, 16  ;;  %v1458_v13 = vadd.f32 %v1450_v7, %v1434_v14  ;;  %v1426_v57 = vmul.f32 %v3118_v22, %v1387_v31  ;;  %vm3420_vm7 = vcmp.eq.s32.totalorder %v2431_v54, %v3419_v30  ;;  %348 = vmatmul.f32.gmra.mxu1 %v141_v1 }
 0x746   :  { %v1094_v43 = vcvt.f32.s32 %v1093_v44  ;;  %1525 = vmatmul.f32.gmra.mxu2 %v1495_v55  ;;  %1566 = vmatmul.f32.gmra.mxu3 %v1495_v55  ;;  %v1466_v21 = vsel %vm3420_vm7, %v1418_v60, 0.0  ;;  %v3421_v44 = vld [vmem:[#allocation25_spill] sm:$0xff]  ;;  %vm3428_vm15 = vcmp.eq.s32.totalorder %v2431_v54, %v3427_v9 }
 0x747   :  { %v1474_v55 = vadd.f32 %v1466_v21, %v1458_v13  ;;  %v1147_v29 = vmax.f32 %v3422_v53, %v3421_v44 }
 0x748   :  { %v1097_v33 = vadd.s32 %v1096_v52, %v1094_v43  ;;  %v3424_v52 = vld [vmem:[#allocation36_spill] sm:$0xff] }
 0x749   :  { %v1155_v45 = vmax.f32 %v1147_v29, %v3423_v16 }
 0x74a   :  { %vm1480_vm1 = vcmp.eq.s32.totalorder %v2431_v54, %v1097_v33 }
 0x74b   :  { %v1488_v38 = vsel %vm1480_vm1, %v1424_v51, 0.0  ;;  %v1163_v43 = vmax.f32 %v1155_v45, %v3424_v52 }
 0x74c   :  { %v1496_v63 = vadd.f32 %v1488_v38, %v1472_v2 }
 0x74d   :  { %v1107_v24 = vpop.xlane.xlu0 %1106  ;;  %v1171_v22 = vsub.f32 %v3422_v53, %v1163_v43  ;;  %v1195_v20 = vsub.f32 %v3421_v44, %v1163_v43  ;;  %v1219_v50 = vsub.f32 %v3423_v16, %v1163_v43  ;;  %v1243_v33 = vsub.f32 %v3424_v52, %v1163_v43 }
 0x74e   :  { %v1108_v36 = vcvt.f32.s32 %v1107_v24  ;;  %1528 = vmatmul.f32.gmra.mxu2 %v1496_v63  ;;  %1569 = vmatmul.f32.gmra.mxu3 %v1496_v63 }
 0x74f   :  { %v1186_v4 = vmul.f32 1.442695, %v1171_v22  ;;  %v1210_v3 = vmul.f32 1.442695, %v1195_v20  ;;  %v1234_v47 = vmul.f32 1.442695, %v1219_v50 }
 0x750   :  { %v1111_v18 = vadd.s32 %v1110_v35, %v1108_v36  ;;  %v1258_v32 = vmul.f32 1.442695, %v1243_v33 }
 0x751   :  { %1823 = vpow2.f32 %v1186_v4 }
 0x752   :  { %vm1481_vm0 = vcmp.eq.s32.totalorder %v2431_v54, %v1111_v18  ;;  %1825 = vpow2.f32 %v1210_v3  ;;  %v1137_v18 = vcvt.f32.s32 %v3154_v19 }
 0x753   :  { %v1489_v49 = vsel %vm1481_vm0, %v1425_v48, 0.0  ;;  %1827 = vpow2.f32 %v1234_v47  ;;  %v3425_v48 = vld [vmem:[#allocation24_spill] sm:$0xff] }
 0x754   :  { %v1497_v26 = vadd.f32 %v1489_v49, %v1473_v8  ;;  %1829 = vpow2.f32 %v1258_v32  ;;  %vm3426_vm4 = vcmp.eq.s32.totalorder %v2431_v54, %v3425_v48  ;;  %v1138_v49 = vshll.u32 %v1137_v18, 16 }
 0x755   :  { %v1121_v37 = vpop.xlane.xlu1 %1120 }
 0x756   :  { %v1122_v25 = vcvt.f32.s32 %v1121_v37  ;;  %1531 = vmatmul.f32.gmra.mxu2 %v1497_v26  ;;  %1572 = vmatmul.f32.gmra.mxu3 %v1497_v26  ;;  %v3429_v26 = vld [vmem:[#allocation35_spill] sm:$0xff] }
 0x757   :  { %v1824_v11 = vpop.eup %1823  ;;  %vm3430_vm1 = vcmp.eq.s32.totalorder %v2431_v54, %v3429_v26 }
 0x758   :  { %v1125_v46 = vadd.s32 %v1124_v42, %v1122_v25  ;;  %v1826_v51 = vpop.eup %1825 }
 0x759   :  { %v1267_v34 = vadd.f32 %v1826_v51, %v1824_v11  ;;  %v1828_v40 = vpop.eup %1827 }
 0x75a   :  { %vm1482_vm8 = vcmp.eq.s32.totalorder %v2431_v54, %v1125_v46  ;;  %v1830_v5 = vpop.eup %1829 }
 0x75b   :  { %v1490_v58 = vsel %vm1482_vm8, %v1426_v57, 0.0  ;;  %v1275_v39 = vadd.f32 %v1828_v40, %v1267_v34 }
 0x75c   :  { %v1498_v56 = vadd.f32 %v1490_v58, %v1474_v55 }
 0x75d   :  { %v1283_v2 = vadd.f32 %v1830_v5, %v1275_v39 }
 0x75e   :  { %1534 = vmatmul.f32.gmra.mxu2 %v1498_v56  ;;  %1575 = vmatmul.f32.gmra.mxu3 %v1498_v56 }
 0x75f   :  { %1831 = vrcp.f32 %v1283_v2  ;;  %v1400_v63 = vand.u32 2147483648, %v1283_v2  ;;  %vm1394_vm9 = vweird.f32 %v1283_v2  ;;  %v1398_v31 = vand.u32 2147483647, %v1283_v2 }
 0x761   :  { %v1401_v41 = vor.u32 1.1754944e-38, %v1400_v63  ;;  %vm1399_vm6 = vcmp.eq.f32.partialorder %v1398_v31, 8.507059e+37 }
 0x765   :  { %v1832_v28 = vpop.eup %1831 }
 0x766   :  { %v1390_v38 = vmul.f32 %v1832_v28, %v1283_v2  ;;  %vm1395_vm13 = vweird.f32 %v1832_v28 }
 0x767   :  { %vm1396_vm12 = vmor %vm1394_vm9, %vm1395_vm13 }
 0x768   :  { %v1391_v23 = vsub.f32 1.0, %v1390_v38 }
 0x76a   :  { %v1392_v0 = vmul.f32 %v1832_v28, %v1391_v23 }
 0x76c   :  { %v1393_v59 = vadd.f32 %v1832_v28, %v1392_v0 }
 0x76e   :  { %v1397_v24 = vsel %vm1396_vm12, %v1832_v28, %v1393_v59 }
 0x76f   :  { %v1402_v35 = vsel %vm1399_vm6, %v1401_v41, %v1397_v24 }
 0x770   :  { %v1403_v36 = vmul.f32 %v1824_v11, %v1402_v35  ;;  %v1411_v27 = vmul.f32 %v1826_v51, %v1402_v35  ;;  %v1419_v8 = vmul.f32 %v1828_v40, %v1402_v35  ;;  %v1427_v7 = vmul.f32 %v1830_v5, %v1402_v35 }
 0x772   :  { %v1435_v6 = vsel %vm3426_vm4, %v1403_v36, 0.0  ;;  %v1451_v12 = vsel %vm3428_vm15, %v1411_v27, 0.0  ;;  %v1467_v37 = vsel %vm3430_vm1, %v1419_v8, 0.0 }
 0x773   :  { %v1459_v14 = vadd.f32 %v1451_v12, %v1435_v6 }
 0x775   :  { %v1475_v19 = vadd.f32 %v1467_v37, %v1459_v14 }
 0x779   :  { %v239_v10 = vpop.f32.mrf.mxu0  ;;  %v328_v15 = vpop.f32.mrf.mxu1 }
 0x781   :  { %v242_v42 = vpop.f32.mrf.mxu0  ;;  %v331_v25 = vpop.f32.mrf.mxu1 }
 0x789   :  { %v245_v53 = vpop.f32.mrf.mxu0  ;;  %v334_v29 = vpop.f32.mrf.mxu1 }
 0x791   :  { %v248_v47 = vpop.f32.mrf.mxu0  ;;  %v337_v33 = vpop.f32.mrf.mxu1 }
 0x7a4   :  { %v251_v1 = vpop.f32.mrf.mxu0  ;;  %v340_v59 = vpop.f32.mrf.mxu1 }
 0x7a7   :  { %v1135_v17 = vpop.xlane.xlu2 %1134 }
 0x7a8   :  { %v1136_v62 = vcvt.f32.s32 %v1135_v17 }
 0x7aa   :  { %v1139_v61 = vadd.s32 %v1138_v49, %v1136_v62 }
 0x7ac   :  { %vm1483_vm2 = vcmp.eq.s32.totalorder %v2431_v54, %v1139_v61 }
 0x7ad   :  { %v1491_v60 = vsel %vm1483_vm2, %v1427_v7, 0.0 }
 0x7ae   :  { %v1499_v13 = vadd.f32 %v1491_v60, %v1475_v19 }
 0x7b0   :  { %1537 = vmatmul.f32.gmra.mxu2 %v1499_v13  ;;  %1578 = vmatmul.f32.gmra.mxu3 %v1499_v13 }
 0x7b1   :  { %v1517_v46 = vpop.f32.mrf.mxu2  ;;  %v1558_v57 = vpop.f32.mrf.mxu3 }
 0x7b2   :  { %v1582_v30 = vmul.f32 %v1517_v46, %v239_v10  ;;  %v1606_v21 = vmul.f32 %v1517_v46, %v328_v15  ;;  %v1590_v55 = vmul.f32 %v1558_v57, %v328_v15  ;;  %v1614_v58 = vmul.f32 %v1558_v57, %v239_v10  ;;  %v254_v15 = vpop.f32.mrf.mxu0  ;;  %v343_v18 = vpop.f32.mrf.mxu1 }
 0x7b4   :  { %v1598_v56 = vadd.f32 %v1590_v55, %v1582_v30  ;;  %v1622_v44 = vsub.f32 %v1606_v21, %v1614_v58 }
 0x7b8   :  { %1646 = vmatmul.f32.vlgmr.msra.gmra.mxu2 %v1622_v44  ;;  %1687 = vmatmul.f32.vlgmr.msra.gmra.mxu3 %v1598_v56 }
 0x7b9   :  { %v1520_v16 = vpop.f32.mrf.mxu2  ;;  %v1561_v54 = vpop.f32.mrf.mxu3 }
 0x7ba   :  { %v1583_v45 = vmul.f32 %v1520_v16, %v242_v42  ;;  %v1607_v52 = vmul.f32 %v1520_v16, %v331_v25  ;;  %v1591_v43 = vmul.f32 %v1561_v54, %v331_v25  ;;  %v1615_v22 = vmul.f32 %v1561_v54, %v242_v42  ;;  %v257_v7 = vpop.f32.mrf.mxu0  ;;  %v346_v26 = vpop.f32.mrf.mxu1 }
 0x7bc   :  { %v1623_v20 = vsub.f32 %v1607_v52, %v1615_v22  ;;  %v1599_v4 = vadd.f32 %v1591_v43, %v1583_v45 }
 0x7c0   :  { %1649 = vmatmul.f32.gmra.mxu2 %v1623_v20  ;;  %1690 = vmatmul.f32.gmra.mxu3 %v1599_v4 }
 0x7c1   :  { %v1523_v3 = vpop.f32.mrf.mxu2  ;;  %v1564_v50 = vpop.f32.mrf.mxu3 }
 0x7c2   :  { %v1584_v11 = vmul.f32 %v1523_v3, %v245_v53  ;;  %v1608_v51 = vmul.f32 %v1523_v3, %v334_v29  ;;  %v1592_v32 = vmul.f32 %v1564_v50, %v334_v29  ;;  %v1616_v34 = vmul.f32 %v1564_v50, %v245_v53  ;;  %v260_v30 = vpop.f32.mrf.mxu0  ;;  %v349_v21 = vpop.f32.mrf.mxu1 }
 0x7c4   :  { %v1624_v40 = vsub.f32 %v1608_v51, %v1616_v34  ;;  %v1600_v39 = vadd.f32 %v1592_v32, %v1584_v11 }
 0x7c8   :  { %1652 = vmatmul.f32.gmra.mxu2 %v1624_v40  ;;  %1693 = vmatmul.f32.gmra.mxu3 %v1600_v39 }
 0x7c9   :  { %v1526_v5 = vpop.f32.mrf.mxu2  ;;  %v1567_v2 = vpop.f32.mrf.mxu3 }
 0x7ca   :  { %v1585_v28 = vmul.f32 %v1526_v5, %v248_v47  ;;  %v1609_v38 = vmul.f32 %v1526_v5, %v337_v33  ;;  %v1593_v23 = vmul.f32 %v1567_v2, %v337_v33  ;;  %v1617_v0 = vmul.f32 %v1567_v2, %v248_v47 }
 0x7cc   :  { %v1625_v63 = vsub.f32 %v1609_v38, %v1617_v0  ;;  %v1601_v31 = vadd.f32 %v1593_v23, %v1585_v28 }
 0x7d0   :  { %1655 = vmatmul.f32.gmra.mxu2 %v1625_v63  ;;  %1696 = vmatmul.f32.gmra.mxu3 %v1601_v31 }
 0x7d1   :  { %v1529_v24 = vpop.f32.mrf.mxu2  ;;  %v1570_v41 = vpop.f32.mrf.mxu3 }
 0x7d2   :  { %v1586_v35 = vmul.f32 %v1529_v24, %v251_v1  ;;  %v1610_v36 = vmul.f32 %v1529_v24, %v340_v59  ;;  %v1594_v27 = vmul.f32 %v1570_v41, %v340_v59  ;;  %v1618_v10 = vmul.f32 %v1570_v41, %v251_v1 }
 0x7d4   :  { %v1626_v48 = vsub.f32 %v1610_v36, %v1618_v10  ;;  %v1602_v6 = vadd.f32 %v1594_v27, %v1586_v35 }
 0x7d8   :  { %1658 = vmatmul.f32.gmra.mxu2 %v1626_v48  ;;  %1699 = vmatmul.f32.gmra.mxu3 %v1602_v6 }
 0x7d9   :  { %v1532_v9 = vpop.f32.mrf.mxu2  ;;  %v1573_v12 = vpop.f32.mrf.mxu3 }
 0x7da   :  { %v1587_v17 = vmul.f32 %v1532_v9, %v254_v15  ;;  %v1611_v8 = vmul.f32 %v1532_v9, %v343_v18  ;;  %v1595_v49 = vmul.f32 %v1573_v12, %v343_v18  ;;  %v1619_v62 = vmul.f32 %v1573_v12, %v254_v15 }
 0x7dc   :  { %v1627_v14 = vsub.f32 %v1611_v8, %v1619_v62  ;;  %v1603_v61 = vadd.f32 %v1595_v49, %v1587_v17 }
 0x7e0   :  { %1661 = vmatmul.f32.gmra.mxu2 %v1627_v14  ;;  %1702 = vmatmul.f32.gmra.mxu3 %v1603_v61 }
 0x7e1   :  { %v1535_v37 = vpop.f32.mrf.mxu2  ;;  %v1576_v19 = vpop.f32.mrf.mxu3 }
 0x7e2   :  { %v1588_v60 = vmul.f32 %v1535_v37, %v257_v7  ;;  %v1612_v42 = vmul.f32 %v1535_v37, %v346_v26  ;;  %v1596_v25 = vmul.f32 %v1576_v19, %v346_v26  ;;  %v1620_v13 = vmul.f32 %v1576_v19, %v257_v7 }
 0x7e4   :  { %v1628_v46 = vsub.f32 %v1612_v42, %v1620_v13  ;;  %v1604_v57 = vadd.f32 %v1596_v25, %v1588_v60 }
 0x7e8   :  { %1664 = vmatmul.f32.gmra.mxu2 %v1628_v46  ;;  %1705 = vmatmul.f32.gmra.mxu3 %v1604_v57 }
 0x833   :  { %v1538_v55 = vpop.f32.mrf.mxu2  ;;  %v1579_v58 = vpop.f32.mrf.mxu3 }
 0x834   :  { %v1589_v56 = vmul.f32 %v1538_v55, %v260_v30  ;;  %v1613_v44 = vmul.f32 %v1538_v55, %v349_v21  ;;  %v1597_v53 = vmul.f32 %v1579_v58, %v349_v21  ;;  %v1621_v29 = vmul.f32 %v1579_v58, %v260_v30 }
 0x836   :  { %v1629_v16 = vsub.f32 %v1613_v44, %v1621_v29  ;;  %v1605_v54 = vadd.f32 %v1597_v53, %v1589_v56 }
 0x838   :  { %1667 = vmatmul.f32.gmra.mxu2 %v1629_v16  ;;  %1708 = vmatmul.f32.gmra.mxu3 %v1605_v54 }
 0x83b   :  { %v1647_v45 = vpop.f32.mrf.mxu2  ;;  %v1688_v52 = vpop.f32.mrf.mxu3 }
 0x83c   :  { %v1689_v43 = vadd.f32 %v1688_v52, %v1647_v45 }
 0x83e   :  { %1712 = vst [vmem:[#allocation13] sm:$0xff] %v1689_v43 }
 0x843   :  { %v1650_v22 = vpop.f32.mrf.mxu2  ;;  %v1691_v20 = vpop.f32.mrf.mxu3 }
 0x844   :  { %v1692_v4 = vadd.f32 %v1691_v20, %v1650_v22 }
 0x846   :  { %1713 = vst [vmem:[#allocation13 + $0x8] sm:$0xff] %v1692_v4 }
 0x84b   :  { %v1653_v3 = vpop.f32.mrf.mxu2  ;;  %v1694_v50 = vpop.f32.mrf.mxu3 }
 0x84c   :  { %v1695_v47 = vadd.f32 %v1694_v50, %v1653_v3 }
 0x84e   :  { %1714 = vst [vmem:[#allocation13 + $0x10] sm:$0xff] %v1695_v47 }
 0x853   :  { %v1656_v33 = vpop.f32.mrf.mxu2  ;;  %v1697_v11 = vpop.f32.mrf.mxu3 }
 0x854   :  { %v1698_v51 = vadd.f32 %v1697_v11, %v1656_v33 }
 0x856   :  { %1715 = vst [vmem:[#allocation13 + $0x18] sm:$0xff] %v1698_v51 }
 0x85b   :  { %v1659_v32 = vpop.f32.mrf.mxu2  ;;  %v1700_v34 = vpop.f32.mrf.mxu3 }
 0x85c   :  { %v1701_v40 = vadd.f32 %v1700_v34, %v1659_v32 }
 0x85e   :  { %1716 = vst [vmem:[#allocation13 + $0x20] sm:$0xff] %v1701_v40 }
 0x863   :  { %v1662_v39 = vpop.f32.mrf.mxu2  ;;  %v1703_v5 = vpop.f32.mrf.mxu3 }
 0x864   :  { %v1704_v2 = vadd.f32 %v1703_v5, %v1662_v39 }
 0x866   :  { %1717 = vst [vmem:[#allocation13 + $0x28] sm:$0xff] %v1704_v2 }
 0x86b   :  { %v1665_v28 = vpop.f32.mrf.mxu2  ;;  %v1706_v38 = vpop.f32.mrf.mxu3 }
 0x86c   :  { %v1707_v23 = vadd.f32 %v1706_v38, %v1665_v28 }
 0x86e   :  { %1718 = vst [vmem:[#allocation13 + $0x30] sm:$0xff] %v1707_v23 }
 0x8bb   :  { %v1668_v0 = vpop.f32.mrf.mxu2  ;;  %v1709_v1 = vpop.f32.mrf.mxu3 }
 0x8bc   :  { %v1710_v59 = vadd.f32 %v1709_v1, %v1668_v0 }
 0x8be   :  { %1719 = vst [vmem:[#allocation13 + $0x38] sm:$0xff] %v1710_v59 }
 0x8bf   :  { %1732 = dma.vmem_to_hbm [thread:$0]  %s1725_s26, 1024, %s1727_s7, [#allocation4], %s2012_s29, %s2012_s29, %s2013_s30  }
 0x8c0   :  { %2009 = dma.done.wait [#allocation4], 1024  }
 0x8c1   :  { %2010 = vsyncadd [#allocation4], 4294966272 }
 0x8c2   :  { %1737 = vsyncpa [#allocation3], 1 }
 0x8c3   :  { %1738 = vsyncpa [#allocation6], 1 }
 0x8c4   :  { %1739 = vsyncpa [#allocation9], 1 }
 0x8c5   :  { %1740 = vsyncpa [#allocation12], 1 }
 0x8c6   :  { %1741 = vsyncpa [#allocation4], 1 }

// kernel: tpu_custom_call.1
= control target key start
LH: loop header
LB: loop body
LE: loop exit
PB: predicated region body
PF: predicated region fallthrough
CT: control target
= control target key end

     0   :  { %11 = vsyncpa [#allocation3], 0  ;;  %s3284_s0 = inlined_call_operand.hbm [shape: f32[64,128], index: 0, kind: input, shape index: {}]   ;;  %s3285_s1 = inlined_call_operand.hbm [shape: f32[64,128], index: 1, kind: input, shape index: {}]   ;;  %s3286_s2 = inlined_call_operand.hbm [shape: f32[64,128], index: 2, kind: input, shape index: {}]   ;;  %s3287_s3 = inlined_call_operand.hbm [shape: f32[128,256], index: 3, kind: input, shape index: {}]   ;;  %s3288_s4 = inlined_call_operand.hbm [shape: f32[128,128], index: 4, kind: input, shape index: {}]   ;;  %s3289_s5 = inlined_call_operand.hbm [shape: f32[128,128], index: 5, kind: input, shape index: {}]   ;;  %s3290_s6 = inlined_call_operand.hbm [shape: f32[64,128], index: 6, kind: output, shape index: {}]  }
   0x1   :  { %12 = vsyncpa [#allocation6], 0 }
   0x2   :  { %13 = vsyncpa [#allocation9], 0 }
   0x3   :  { %14 = vsyncpa [#allocation12], 0 }
   0x4   :  { %15 = vsyncpa [#allocation4], 0  ;;  %s33_s23 = sshll.u32 %s3285_s1, 4  ;;  %s2011_s24 = smov [#allocation5]   ;;  %s34_s23 = int_to_ptr.hbm [resolvable:$true] %s33_s23 }
   0x5   :  { %s35_s25 = sshll.u32 %s2011_s24, 4  ;;  %s59_s28 = sshll.u32 %s3287_s3, 4  ;;  %s36_s25 = int_to_ptr.vmem [resolvable:$true] %s35_s25  ;;  %s60_s28 = int_to_ptr.hbm [resolvable:$true] %s59_s28 }
   0x6   :  { %s2012_s29 = smov 128   ;;  %s2013_s30 = smov 8  }
   0x7   :  { %41 = dma.hbm_to_vmem [thread:$0]  %s34_s23, 1024, %s36_s25, [#allocation6], %s2012_s29, %s2012_s29, %s2013_s30  }
   0x8   :  { %s2014_s7 = smov [#allocation8]   ;;  %s2015_s9 = smov 256  }
   0x9   :  { %s61_s8 = sshll.u32 %s2014_s7, 4  ;;  %s2016_s1 = smov 16   ;;  %s62_s8 = int_to_ptr.vmem [resolvable:$true] %s61_s8 }
   0xa   :  { %67 = dma.hbm_to_vmem [thread:$0]  %s60_s28, 4096, %s62_s8, [#allocation9], %s2015_s9, %s2015_s9, %s2016_s1  }
   0xb   :  { %s20_s12 = sshll.u32 %s3284_s0, 4  ;;  %s2017_s13 = smov [#allocation2]   ;;  %s21_s12 = int_to_ptr.hbm [resolvable:$true] %s20_s12 }
   0xc   :  { %s22_s3 = sshll.u32 %s2017_s13, 4  ;;  %s46_s16 = sshll.u32 %s3286_s2, 4  ;;  %s23_s3 = int_to_ptr.vmem [resolvable:$true] %s22_s3  ;;  %s47_s16 = int_to_ptr.hbm [resolvable:$true] %s46_s16 }
   0xd   :  { %28 = dma.hbm_to_vmem [thread:$0]  %s21_s12, 1024, %s23_s3, [#allocation3], %s2012_s29, %s2012_s29, %s2013_s30  }
   0xe   :  { %s2018_s17 = smov [#allocation7]   ;;  %s72_s21 = sshll.u32 %s3288_s4, 4  ;;  %s73_s21 = int_to_ptr.hbm [resolvable:$true] %s72_s21 }
   0xf   :  { %s48_s18 = sshll.u32 %s2018_s17, 4  ;;  %s85_s2 = sshll.u32 %s3289_s5, 4  ;;  %s49_s18 = int_to_ptr.vmem [resolvable:$true] %s48_s18  ;;  %s86_s2 = int_to_ptr.hbm [resolvable:$true] %s85_s2 }
  0x10   :  { %54 = dma.hbm_to_vmem [thread:$0]  %s47_s16, 1024, %s49_s18, [#allocation6], %s2012_s29, %s2012_s29, %s2013_s30  }
  0x11   :  { %s2019_s23 = smov [#allocation10]   ;;  %s2020_s25 = smov [#allocation11]  }
  0x12   :  { %s74_s24 = sshll.u32 %s2019_s23, 4  ;;  %s87_s4 = sshll.u32 %s2020_s25, 4  ;;  %s75_s24 = int_to_ptr.vmem [resolvable:$true] %s74_s24  ;;  %s88_s4 = int_to_ptr.vmem [resolvable:$true] %s87_s4 }
  0x13   :  { %80 = dma.hbm_to_vmem [thread:$0]  %s73_s21, 2048, %s75_s24, [#allocation9], %s2012_s29, %s2012_s29, %s2013_s30  }
  0x14   :  { %93 = dma.hbm_to_vmem [thread:$0]  %s86_s2, 2048, %s88_s4, [#allocation12], %s2012_s29, %s2012_s29, %s2013_s30  }
  0x15   :  { %2001 = dma.done.wait [#allocation3], 1024  }
  0x16   :  { %2002 = vsyncadd [#allocation3], 4294966272 }
  0x17   :  { %2003 = dma.done.wait [#allocation6], 2048  }
  0x18   :  { %2004 = vsyncadd [#allocation6], 4294965248 }
  0x19   :  { %2005 = dma.done.wait [#allocation9], 6144  }
  0x1a   :  { %2006 = vsyncadd [#allocation9], 4294961152 }
  0x1b   :  { %2007 = dma.done.wait [#allocation12], 2048  }
  0x1c   :  { %2008 = vsyncadd [#allocation12], 4294965248  ;;  %v2090_v0 = vld [vmem:[#allocation8 + $0xf0] sm:$0xff]  ;;  %v2092_v1 = vld [vmem:[#allocation8 + $0xf8] sm:$0xff]  ;;  %s2021_s5 = smov [#allocation13]   ;;  %s1726_s7 = sshll.u32 %s3290_s6, 4  ;;  %s1727_s7 = int_to_ptr.hbm [resolvable:$true] %s1726_s7 }
  0x1d   :  { %v2094_v2 = vld [vmem:[#allocation8 + $0xe0] sm:$0xff]  ;;  %174 = vmatpush.msra.mxu0 %v2090_v0  ;;  %263 = vmatpush.msra.mxu1 %v2092_v1  ;;  %v2098_v3 = vld [vmem:[#allocation8 + $0xe8] sm:$0xff]  ;;  %v2100_v4 = vld [vmem:[#allocation8 + $0xd0] sm:$0xff]  ;;  %s1724_s26 = sshll.u32 %s2021_s5, 4  ;;  %s1725_s26 = int_to_ptr.vmem [resolvable:$true] %s1724_s26 }
  0x1e   :  { %v2102_v5 = vld [vmem:[#allocation8 + $0xd8] sm:$0xff]  ;;  %v2106_v6 = vld [vmem:[#allocation8 + $0xc0] sm:$0xff]  ;;  %v2108_v7 = vld [vmem:[#allocation8 + $0xc8] sm:$0xff] }
  0x1f   :  { %175 = vmatpush.msra.mxu0 %v2094_v2  ;;  %264 = vmatpush.msra.mxu1 %v2098_v3  ;;  %v2112_v8 = vld [vmem:[#allocation8 + $0xb0] sm:$0xff]  ;;  %v2114_v9 = vld [vmem:[#allocation8 + $0xb8] sm:$0xff]  ;;  %v2118_v10 = vld [vmem:[#allocation8 + $0xa0] sm:$0xff] }
  0x20   :  { %v2120_v11 = vld [vmem:[#allocation8 + $0xa8] sm:$0xff]  ;;  %v2124_v12 = vld [vmem:[#allocation8 + $0x90] sm:$0xff]  ;;  %v2126_v13 = vld [vmem:[#allocation8 + $0x98] sm:$0xff] }
  0x21   :  { %176 = vmatpush.msra.mxu0 %v2100_v4  ;;  %265 = vmatpush.msra.mxu1 %v2102_v5  ;;  %v2130_v14 = vld [vmem:[#allocation8 + $0x80] sm:$0xff]  ;;  %v2132_v15 = vld [vmem:[#allocation8 + $0x88] sm:$0xff]  ;;  %v2136_v16 = vld [vmem:[#allocation8 + $0x70] sm:$0xff] }
  0x22   :  { %v2138_v17 = vld [vmem:[#allocation8 + $0x78] sm:$0xff]  ;;  %v2142_v18 = vld [vmem:[#allocation8 + $0x60] sm:$0xff]  ;;  %v2144_v19 = vld [vmem:[#allocation8 + $0x68] sm:$0xff] }
  0x23   :  { %177 = vmatpush.msra.mxu0 %v2106_v6  ;;  %266 = vmatpush.msra.mxu1 %v2108_v7  ;;  %v2148_v20 = vld [vmem:[#allocation8 + $0x50] sm:$0xff]  ;;  %v2150_v21 = vld [vmem:[#allocation8 + $0x58] sm:$0xff]  ;;  %v2154_v22 = vld [vmem:[#allocation8 + $0x40] sm:$0xff] }
  0x24   :  { %v2156_v23 = vld [vmem:[#allocation8 + $0x48] sm:$0xff]  ;;  %v2160_v24 = vld [vmem:[#allocation8 + $0x30] sm:$0xff]  ;;  %v2162_v25 = vld [vmem:[#allocation8 + $0x38] sm:$0xff] }
  0x25   :  { %178 = vmatpush.msra.mxu0 %v2112_v8  ;;  %267 = vmatpush.msra.mxu1 %v2114_v9  ;;  %v2166_v26 = vld [vmem:[#allocation8 + $0x20] sm:$0xff]  ;;  %v2168_v27 = vld [vmem:[#allocation8 + $0x28] sm:$0xff]  ;;  %v2172_v28 = vld [vmem:[#allocation8 + $0x10] sm:$0xff] }
  0x26   :  { %v2174_v29 = vld [vmem:[#allocation8 + $0x18] sm:$0xff]  ;;  %v2178_v30 = vld [vmem:[#allocation8] sm:$0xff]  ;;  %v2180_v31 = vld [vmem:[#allocation8 + $0x8] sm:$0xff] }
  0x27   :  { %179 = vmatpush.msra.mxu0 %v2118_v10  ;;  %268 = vmatpush.msra.mxu1 %v2120_v11  ;;  %v118_v32 = vld [vmem:[#allocation2] sm:$0xff]  ;;  %v119_v33 = vld [vmem:[#allocation2 + $0x8] sm:$0xff]  ;;  %v120_v34 = vld [vmem:[#allocation2 + $0x10] sm:$0xff] }
  0x28   :  { %v121_v35 = vld [vmem:[#allocation2 + $0x18] sm:$0xff]  ;;  %v122_v36 = vld [vmem:[#allocation2 + $0x20] sm:$0xff]  ;;  %v123_v37 = vld [vmem:[#allocation2 + $0x28] sm:$0xff] }
  0x29   :  { %180 = vmatpush.msra.mxu0 %v2124_v12  ;;  %269 = vmatpush.msra.mxu1 %v2126_v13  ;;  %v124_v38 = vld [vmem:[#allocation2 + $0x30] sm:$0xff]  ;;  %v125_v39 = vld [vmem:[#allocation2 + $0x38] sm:$0xff]  ;;  %v126_v40 = vld [vmem:[#allocation5] sm:$0xff] }
  0x2a   :  { %v127_v41 = vld [vmem:[#allocation5 + $0x8] sm:$0xff]  ;;  %v128_v42 = vld [vmem:[#allocation5 + $0x10] sm:$0xff]  ;;  %v129_v43 = vld [vmem:[#allocation5 + $0x18] sm:$0xff] }
  0x2b   :  { %181 = vmatpush.msra.mxu0 %v2130_v14  ;;  %270 = vmatpush.msra.mxu1 %v2132_v15  ;;  %v130_v44 = vld [vmem:[#allocation5 + $0x20] sm:$0xff]  ;;  %v131_v45 = vld [vmem:[#allocation5 + $0x28] sm:$0xff]  ;;  %v132_v46 = vld [vmem:[#allocation5 + $0x30] sm:$0xff] }
  0x2c   :  { %v133_v47 = vld [vmem:[#allocation5 + $0x38] sm:$0xff]  ;;  %v2196_v52 = vld [vmem:[#allocation11 + $0x70] sm:$0xff]  ;;  %v2206_v56 = vld [vmem:[#allocation11 + $0x68] sm:$0xff] }
  0x2d   :  { %182 = vmatpush.msra.mxu0 %v2136_v16  ;;  %271 = vmatpush.msra.mxu1 %v2138_v17  ;;  %v2190_v50 = vld [vmem:[#allocation11 + $0x78] sm:$0xff]  ;;  %v2198_v53 = vld [vmem:[#allocation10 + $0x70] sm:$0xff]  ;;  %v2208_v57 = vld [vmem:[#allocation10 + $0x68] sm:$0xff] }
  0x2e   :  { %v2192_v51 = vld [vmem:[#allocation10 + $0x78] sm:$0xff]  ;;  %432 = vmatpush.msra.mxu2 %v2190_v50  ;;  %v2210_v58 = vld [vmem:[#allocation11 + $0x60] sm:$0xff]  ;;  %v2224_v62 = vld [vmem:[#allocation11 + $0x50] sm:$0xff] }
  0x2f   :  { %183 = vmatpush.msra.mxu0 %v2142_v18  ;;  %272 = vmatpush.msra.mxu1 %v2144_v19  ;;  %v2212_v59 = vld [vmem:[#allocation10 + $0x60] sm:$0xff]  ;;  %v2216_v60 = vld [vmem:[#allocation11 + $0x58] sm:$0xff]  ;;  %v2226_v63 = vld [vmem:[#allocation10 + $0x50] sm:$0xff] }
  0x30   :  { %473 = vmatpush.msra.mxu3 %v2192_v51  ;;  %433 = vmatpush.msra.mxu2 %v2196_v52  ;;  %v2218_v61 = vld [vmem:[#allocation10 + $0x58] sm:$0xff] }
  0x31   :  { %184 = vmatpush.msra.mxu0 %v2148_v20  ;;  %273 = vmatpush.msra.mxu1 %v2150_v21 }
  0x32   :  { %474 = vmatpush.msra.mxu3 %v2198_v53  ;;  %434 = vmatpush.msra.mxu2 %v2206_v56 }
  0x33   :  { %185 = vmatpush.msra.mxu0 %v2154_v22  ;;  %274 = vmatpush.msra.mxu1 %v2156_v23 }
  0x34   :  { %475 = vmatpush.msra.mxu3 %v2208_v57  ;;  %435 = vmatpush.msra.mxu2 %v2210_v58 }
  0x35   :  { %186 = vmatpush.msra.mxu0 %v2160_v24  ;;  %275 = vmatpush.msra.mxu1 %v2162_v25 }
  0x36   :  { %476 = vmatpush.msra.mxu3 %v2212_v59  ;;  %436 = vmatpush.msra.mxu2 %v2216_v60 }
  0x37   :  { %187 = vmatpush.msra.mxu0 %v2166_v26  ;;  %276 = vmatpush.msra.mxu1 %v2168_v27 }
  0x38   :  { %477 = vmatpush.msra.mxu3 %v2218_v61  ;;  %437 = vmatpush.msra.mxu2 %v2224_v62 }
  0x39   :  { %188 = vmatpush.msra.mxu0 %v2172_v28  ;;  %277 = vmatpush.msra.mxu1 %v2174_v29 }
  0x3a   :  { %478 = vmatpush.msra.mxu3 %v2226_v63 }
  0x3b   :  { %189 = vmatpush.msra.mxu0 %v2178_v30  ;;  %278 = vmatpush.msra.mxu1 %v2180_v31 }
  0x3c   :  { %190 = vmatmul.f32.vlgmr.msra.gmra.mxu0 %v118_v32  ;;  %279 = vmatmul.f32.vlgmr.msra.gmra.mxu1 %v118_v32 }
  0x44   :  { %193 = vmatmul.f32.gmra.mxu0 %v119_v33  ;;  %282 = vmatmul.f32.gmra.mxu1 %v119_v33 }
  0x4c   :  { %196 = vmatmul.f32.gmra.mxu0 %v120_v34  ;;  %285 = vmatmul.f32.gmra.mxu1 %v120_v34  ;;  %v2234_v34 = vld [vmem:[#allocation11 + $0x48] sm:$0xff] }
  0x4d   :  { %438 = vmatpush.msra.mxu2 %v2234_v34 }
  0x54   :  { %199 = vmatmul.f32.gmra.mxu0 %v121_v35  ;;  %288 = vmatmul.f32.gmra.mxu1 %v121_v35  ;;  %v2236_v35 = vld [vmem:[#allocation10 + $0x48] sm:$0xff] }
  0x55   :  { %479 = vmatpush.msra.mxu3 %v2236_v35 }
  0x5c   :  { %202 = vmatmul.f32.gmra.mxu0 %v122_v36  ;;  %291 = vmatmul.f32.gmra.mxu1 %v122_v36  ;;  %v2238_v36 = vld [vmem:[#allocation11 + $0x40] sm:$0xff] }
  0x5d   :  { %439 = vmatpush.msra.mxu2 %v2238_v36 }
  0x64   :  { %205 = vmatmul.f32.gmra.mxu0 %v123_v37  ;;  %294 = vmatmul.f32.gmra.mxu1 %v123_v37  ;;  %v2240_v37 = vld [vmem:[#allocation10 + $0x40] sm:$0xff] }
  0x65   :  { %480 = vmatpush.msra.mxu3 %v2240_v37 }
  0x6c   :  { %208 = vmatmul.f32.gmra.mxu0 %v124_v38  ;;  %297 = vmatmul.f32.gmra.mxu1 %v124_v38  ;;  %v2244_v38 = vld [vmem:[#allocation11 + $0x38] sm:$0xff] }
  0x6d   :  { %440 = vmatpush.msra.mxu2 %v2244_v38 }
  0x74   :  { %211 = vmatmul.f32.gmra.mxu0 %v125_v39  ;;  %300 = vmatmul.f32.gmra.mxu1 %v125_v39  ;;  %v2246_v39 = vld [vmem:[#allocation10 + $0x38] sm:$0xff] }
  0x75   :  { %3341 = vst [vmem:[#allocation19_spill] sm:$0xff] %v2246_v39  ;;  %481 = vmatpush.msra.mxu3 %v2246_v39  ;;  %v2272_v39 = vld [vmem:[#allocation11 + $0x18] sm:$0xff] }
  0x7c   :  { %214 = vmatmul.f32.gmra.mxu0 %v126_v40  ;;  %303 = vmatmul.f32.gmra.mxu1 %v126_v40  ;;  %v2252_v40 = vld [vmem:[#allocation11 + $0x30] sm:$0xff] }
  0x7d   :  { %3342 = vst [vmem:[#allocation20_spill] sm:$0xff] %v2252_v40  ;;  %441 = vmatpush.msra.mxu2 %v2252_v40 }
  0x84   :  { %217 = vmatmul.f32.gmra.mxu0 %v127_v41  ;;  %306 = vmatmul.f32.gmra.mxu1 %v127_v41  ;;  %v2254_v41 = vld [vmem:[#allocation10 + $0x30] sm:$0xff] }
  0x85   :  { %3343 = vst [vmem:[#allocation21_spill] sm:$0xff] %v2254_v41  ;;  %482 = vmatpush.msra.mxu3 %v2254_v41  ;;  %v2282_v41 = vld [vmem:[#allocation10 + $0x10] sm:$0xff] }
  0x8c   :  { %220 = vmatmul.f32.gmra.mxu0 %v128_v42  ;;  %309 = vmatmul.f32.gmra.mxu1 %v128_v42 }
  0x94   :  { %223 = vmatmul.f32.gmra.mxu0 %v129_v43  ;;  %312 = vmatmul.f32.gmra.mxu1 %v129_v43 }
  0x9c   :  { %226 = vmatmul.f32.gmra.mxu0 %v130_v44  ;;  %315 = vmatmul.f32.gmra.mxu1 %v130_v44  ;;  %v2262_v44 = vld [vmem:[#allocation11 + $0x28] sm:$0xff] }
  0x9d   :  { %3346 = vst [vmem:[#allocation24_spill] sm:$0xff] %v2262_v44  ;;  %442 = vmatpush.msra.mxu2 %v2262_v44 }
  0xa4   :  { %229 = vmatmul.f32.gmra.mxu0 %v131_v45  ;;  %318 = vmatmul.f32.gmra.mxu1 %v131_v45  ;;  %v2264_v45 = vld [vmem:[#allocation10 + $0x28] sm:$0xff] }
  0xa5   :  { %3347 = vst [vmem:[#allocation25_spill] sm:$0xff] %v2264_v45  ;;  %483 = vmatpush.msra.mxu3 %v2264_v45  ;;  %v2290_v45 = vld [vmem:[#allocation11 + $0x8] sm:$0xff] }
  0xac   :  { %232 = vmatmul.f32.gmra.mxu0 %v132_v46  ;;  %321 = vmatmul.f32.gmra.mxu1 %v132_v46  ;;  %v2266_v46 = vld [vmem:[#allocation11 + $0x20] sm:$0xff] }
  0xad   :  { %3348 = vst [vmem:[#allocation26_spill] sm:$0xff] %v2266_v46  ;;  %443 = vmatpush.msra.mxu2 %v2266_v46  ;;  %v2292_v46 = vld [vmem:[#allocation10 + $0x8] sm:$0xff] }
  0xaf   :  { %444 = vmatpush.msra.mxu2 %v2272_v39 }
  0xb4   :  { %235 = vmatmul.f32.gmra.mxu0 %v133_v47  ;;  %324 = vmatmul.f32.gmra.mxu1 %v133_v47  ;;  %v2268_v47 = vld [vmem:[#allocation10 + $0x20] sm:$0xff] }
  0xb5   :  { %3349 = vst [vmem:[#allocation27_spill] sm:$0xff] %v2268_v47  ;;  %484 = vmatpush.msra.mxu3 %v2268_v47  ;;  %v2294_v47 = vld [vmem:[#allocation11] sm:$0xff] }
  0xb9   :  { %v2186_v48 = vpop.f32.mrf.mxu0  ;;  %v2188_v49 = vpop.f32.mrf.mxu1 }
  0xc1   :  { %v2200_v54 = vpop.f32.mrf.mxu0  ;;  %v2202_v55 = vpop.f32.mrf.mxu1 }
  0xc9   :  { %v2228_v32 = vpop.f32.mrf.mxu0  ;;  %v2230_v33 = vpop.f32.mrf.mxu1 }
  0xd1   :  { %v2256_v42 = vpop.f32.mrf.mxu0  ;;  %v2258_v43 = vpop.f32.mrf.mxu1 }
  0xd2   :  { %3344 = vst [vmem:[#allocation22_spill] sm:$0xff] %v2256_v42  ;;  %v2274_v42 = vld [vmem:[#allocation10 + $0x18] sm:$0xff] }
  0xd3   :  { %3345 = vst [vmem:[#allocation23_spill] sm:$0xff] %v2258_v43  ;;  %485 = vmatpush.msra.mxu3 %v2274_v42  ;;  %v2280_v43 = vld [vmem:[#allocation11 + $0x10] sm:$0xff] }
  0xd4   :  { %3350 = vst [vmem:[#allocation28_spill] sm:$0xff] %v2274_v42  ;;  %445 = vmatpush.msra.mxu2 %v2280_v43  ;;  %v2298_v42 = vld [vmem:[#allocation10] sm:$0xff] }
  0xd5   :  { %486 = vmatpush.msra.mxu3 %v2282_v41 }
  0xd6   :  { %446 = vmatpush.msra.mxu2 %v2290_v45 }
  0xd7   :  { %487 = vmatpush.msra.mxu3 %v2292_v46 }
  0xd8   :  { %447 = vmatpush.msra.mxu2 %v2294_v47 }
  0xd9   :  { %v2284_v40 = vpop.f32.mrf.mxu0  ;;  %v2286_v44 = vpop.f32.mrf.mxu1  ;;  %488 = vmatpush.msra.mxu3 %v2298_v42 }
  0xda   :  { %3351 = vst [vmem:[#allocation29_spill] sm:$0xff] %v2284_v40  ;;  %1500 = vmatpush.msrb.mxu2 %v2090_v0 }
  0xdb   :  { %3352 = vst [vmem:[#allocation30_spill] sm:$0xff] %v2286_v44  ;;  %1541 = vmatpush.msrb.mxu3 %v2092_v1 }
  0xdc   :  { %1501 = vmatpush.msrb.mxu2 %v2094_v2 }
  0xdd   :  { %1542 = vmatpush.msrb.mxu3 %v2098_v3 }
  0xde   :  { %1502 = vmatpush.msrb.mxu2 %v2100_v4 }
  0xdf   :  { %1543 = vmatpush.msrb.mxu3 %v2102_v5 }
  0xe0   :  { %1503 = vmatpush.msrb.mxu2 %v2106_v6 }
  0xe1   :  { %v2306_v44 = vpop.f32.mrf.mxu0  ;;  %v2308_v40 = vpop.f32.mrf.mxu1  ;;  %1544 = vmatpush.msrb.mxu3 %v2108_v7 }
  0xe2   :  { %1504 = vmatpush.msrb.mxu2 %v2112_v8 }
  0xe3   :  { %1545 = vmatpush.msrb.mxu3 %v2114_v9 }
  0xe4   :  { %1505 = vmatpush.msrb.mxu2 %v2118_v10 }
  0xe5   :  { %1546 = vmatpush.msrb.mxu3 %v2120_v11 }
  0xe6   :  { %1506 = vmatpush.msrb.mxu2 %v2124_v12 }
  0xe7   :  { %1547 = vmatpush.msrb.mxu3 %v2126_v13 }
  0xe8   :  { %1507 = vmatpush.msrb.mxu2 %v2130_v14 }
  0xe9   :  { %v2318_v0 = vpop.f32.mrf.mxu0  ;;  %v2320_v1 = vpop.f32.mrf.mxu1  ;;  %1548 = vmatpush.msrb.mxu3 %v2132_v15 }
  0xea   :  { %1508 = vmatpush.msrb.mxu2 %v2136_v16 }
  0xeb   :  { %1549 = vmatpush.msrb.mxu3 %v2138_v17 }
  0xec   :  { %1509 = vmatpush.msrb.mxu2 %v2142_v18 }
  0xed   :  { %1550 = vmatpush.msrb.mxu3 %v2144_v19 }
  0xee   :  { %1510 = vmatpush.msrb.mxu2 %v2148_v20 }
  0xef   :  { %1551 = vmatpush.msrb.mxu3 %v2150_v21 }
  0xf0   :  { %1511 = vmatpush.msrb.mxu2 %v2154_v22 }
  0xf1   :  { %v2330_v2 = vpop.f32.mrf.mxu0  ;;  %v2332_v3 = vpop.f32.mrf.mxu1  ;;  %1552 = vmatpush.msrb.mxu3 %v2156_v23 }
  0xf2   :  { %1512 = vmatpush.msrb.mxu2 %v2160_v24 }
  0xf3   :  { %1553 = vmatpush.msrb.mxu3 %v2162_v25 }
  0xf4   :  { %1513 = vmatpush.msrb.mxu2 %v2166_v26 }
  0xf5   :  { %1554 = vmatpush.msrb.mxu3 %v2168_v27 }
  0xf6   :  { %1514 = vmatpush.msrb.mxu2 %v2172_v28  ;;  %v3353_v28 = vld [vmem:[#allocation19_spill] sm:$0xff] }
  0xf7   :  { %1555 = vmatpush.msrb.mxu3 %v2174_v29 }
  0xf8   :  { %1515 = vmatpush.msrb.mxu2 %v2178_v30 }
  0xf9   :  { %v215_v4 = vpop.f32.mrf.mxu0  ;;  %v304_v5 = vpop.f32.mrf.mxu1  ;;  %1556 = vmatpush.msrb.mxu3 %v2180_v31  ;;  %v3354_v31 = vld [vmem:[#allocation20_spill] sm:$0xff] }
  0xfa   :  { %v352_v6 = vmul.f32 %v215_v4, %v2186_v48  ;;  %v376_v7 = vmul.f32 %v2188_v49, %v215_v4  ;;  %v360_v8 = vmul.f32 %v304_v5, %v2188_v49  ;;  %v384_v9 = vmul.f32 %v304_v5, %v2186_v48  ;;  %v3355_v48 = vld [vmem:[#allocation21_spill] sm:$0xff]  ;;  %v3356_v49 = vld [vmem:[#allocation22_spill] sm:$0xff] }
  0xfc   :  { %v392_v10 = vsub.f32 %v376_v7, %v384_v9  ;;  %v368_v11 = vadd.f32 %v360_v8, %v352_v6 }
  0xfe   :  { %448 = vmatmul.f32.vlgmr.msra.gmra.mxu2 %v392_v10  ;;  %489 = vmatmul.f32.vlgmr.msra.gmra.mxu3 %v368_v11 }
  0xff   :  { %1630 = vmatpush.msra.mxu2 %v2190_v50  ;;  %1671 = vmatpush.msra.mxu3 %v2192_v51  ;;  %v3357_v51 = vld [vmem:[#allocation23_spill] sm:$0xff] }
 0x101   :  { %v218_v12 = vpop.f32.mrf.mxu0  ;;  %v307_v13 = vpop.f32.mrf.mxu1  ;;  %1631 = vmatpush.msra.mxu2 %v2196_v52  ;;  %1672 = vmatpush.msra.mxu3 %v2198_v53 }
 0x102   :  { %v353_v14 = vmul.f32 %v218_v12, %v2200_v54  ;;  %v377_v15 = vmul.f32 %v2202_v55, %v218_v12  ;;  %v361_v16 = vmul.f32 %v307_v13, %v2202_v55  ;;  %v385_v17 = vmul.f32 %v307_v13, %v2200_v54  ;;  %v3358_v55 = vld [vmem:[#allocation24_spill] sm:$0xff] }
 0x103   :  { %1632 = vmatpush.msra.mxu2 %v2206_v56  ;;  %1673 = vmatpush.msra.mxu3 %v2208_v57  ;;  %v3359_v56 = vld [vmem:[#allocation25_spill] sm:$0xff] }
 0x104   :  { %v393_v18 = vsub.f32 %v377_v15, %v385_v17  ;;  %v369_v19 = vadd.f32 %v361_v16, %v353_v14 }
 0x105   :  { %1633 = vmatpush.msra.mxu2 %v2210_v58  ;;  %1674 = vmatpush.msra.mxu3 %v2212_v59  ;;  %v3360_v59 = vld [vmem:[#allocation26_spill] sm:$0xff] }
 0x106   :  { %451 = vmatmul.f32.gmra.mxu2 %v393_v18  ;;  %492 = vmatmul.f32.gmra.mxu3 %v369_v19 }
 0x107   :  { %1634 = vmatpush.msra.mxu2 %v2216_v60  ;;  %1675 = vmatpush.msra.mxu3 %v2218_v61  ;;  %v3361_v60 = vld [vmem:[#allocation27_spill] sm:$0xff]  ;;  %v3362_v61 = vld [vmem:[#allocation28_spill] sm:$0xff] }
 0x109   :  { %v221_v20 = vpop.f32.mrf.mxu0  ;;  %v310_v21 = vpop.f32.mrf.mxu1  ;;  %1635 = vmatpush.msra.mxu2 %v2224_v62  ;;  %1676 = vmatpush.msra.mxu3 %v2226_v63 }
 0x10a   :  { %v354_v22 = vmul.f32 %v221_v20, %v2228_v32  ;;  %v378_v23 = vmul.f32 %v2230_v33, %v221_v20  ;;  %v362_v24 = vmul.f32 %v310_v21, %v2230_v33  ;;  %v386_v25 = vmul.f32 %v310_v21, %v2228_v32  ;;  %v3363_v32 = vld [vmem:[#allocation29_spill] sm:$0xff] }
 0x10b   :  { %1636 = vmatpush.msra.mxu2 %v2234_v34  ;;  %1677 = vmatpush.msra.mxu3 %v2236_v35  ;;  %v3364_v34 = vld [vmem:[#allocation30_spill] sm:$0xff] }
 0x10c   :  { %v394_v26 = vsub.f32 %v378_v23, %v386_v25  ;;  %v370_v27 = vadd.f32 %v362_v24, %v354_v22 }
 0x10d   :  { %1637 = vmatpush.msra.mxu2 %v2238_v36  ;;  %1678 = vmatpush.msra.mxu3 %v2240_v37 }
 0x10e   :  { %454 = vmatmul.f32.gmra.mxu2 %v394_v26  ;;  %495 = vmatmul.f32.gmra.mxu3 %v370_v27 }
 0x10f   :  { %1638 = vmatpush.msra.mxu2 %v2244_v38  ;;  %1679 = vmatpush.msra.mxu3 %v3353_v28 }
 0x111   :  { %v224_v29 = vpop.f32.mrf.mxu0  ;;  %v313_v30 = vpop.f32.mrf.mxu1  ;;  %1639 = vmatpush.msra.mxu2 %v3354_v31  ;;  %1680 = vmatpush.msra.mxu3 %v3355_v48 }
 0x112   :  { %v355_v50 = vmul.f32 %v224_v29, %v3356_v49  ;;  %v379_v52 = vmul.f32 %v3357_v51, %v224_v29  ;;  %v363_v53 = vmul.f32 %v313_v30, %v3357_v51  ;;  %v387_v54 = vmul.f32 %v313_v30, %v3356_v49 }
 0x113   :  { %1640 = vmatpush.msra.mxu2 %v3358_v55  ;;  %1681 = vmatpush.msra.mxu3 %v3359_v56 }
 0x114   :  { %v395_v57 = vsub.f32 %v379_v52, %v387_v54  ;;  %v371_v58 = vadd.f32 %v363_v53, %v355_v50  ;;  %v514_v53 = vlaneseq }
 0x115   :  { %1641 = vmatpush.msra.mxu2 %v3360_v59  ;;  %1682 = vmatpush.msra.mxu3 %v3361_v60 }
 0x116   :  { %457 = vmatmul.f32.gmra.mxu2 %v395_v57  ;;  %498 = vmatmul.f32.gmra.mxu3 %v371_v58  ;;  %v2431_v54 = vand.u32 127, %v514_v53 }
 0x117   :  { %1642 = vmatpush.msra.mxu2 %v2272_v39  ;;  %1683 = vmatpush.msra.mxu3 %v3362_v61 }
 0x119   :  { %v227_v62 = vpop.f32.mrf.mxu0  ;;  %v316_v63 = vpop.f32.mrf.mxu1  ;;  %1643 = vmatpush.msra.mxu2 %v2280_v43  ;;  %1684 = vmatpush.msra.mxu3 %v2282_v41 }
 0x11a   :  { %v356_v33 = vmul.f32 %v227_v62, %v3363_v32  ;;  %v380_v35 = vmul.f32 %v3364_v34, %v227_v62  ;;  %v364_v36 = vmul.f32 %v316_v63, %v3364_v34  ;;  %v388_v37 = vmul.f32 %v316_v63, %v3363_v32 }
 0x11b   :  { %1644 = vmatpush.msra.mxu2 %v2290_v45  ;;  %1685 = vmatpush.msra.mxu3 %v2292_v46 }
 0x11c   :  { %v396_v38 = vsub.f32 %v380_v35, %v388_v37  ;;  %v372_v39 = vadd.f32 %v364_v36, %v356_v33 }
 0x11d   :  { %1645 = vmatpush.msra.mxu2 %v2294_v47  ;;  %1686 = vmatpush.msra.mxu3 %v2298_v42 }
 0x11e   :  { %460 = vmatmul.f32.gmra.mxu2 %v396_v38  ;;  %501 = vmatmul.f32.gmra.mxu3 %v372_v39 }
 0x121   :  { %v230_v41 = vpop.f32.mrf.mxu0  ;;  %v319_v43 = vpop.f32.mrf.mxu1 }
 0x122   :  { %v357_v4 = vmul.f32 %v230_v41, %v2306_v44  ;;  %v381_v5 = vmul.f32 %v2308_v40, %v230_v41  ;;  %v365_v6 = vmul.f32 %v319_v43, %v2308_v40  ;;  %v389_v45 = vmul.f32 %v319_v43, %v2306_v44 }
 0x124   :  { %v397_v7 = vsub.f32 %v381_v5, %v389_v45  ;;  %v373_v46 = vadd.f32 %v365_v6, %v357_v4 }
 0x126   :  { %463 = vmatmul.f32.gmra.mxu2 %v397_v7  ;;  %504 = vmatmul.f32.gmra.mxu3 %v373_v46 }
 0x129   :  { %v233_v8 = vpop.f32.mrf.mxu0  ;;  %v322_v47 = vpop.f32.mrf.mxu1 }
 0x12a   :  { %v358_v42 = vmul.f32 %v233_v8, %v2318_v0  ;;  %v382_v9 = vmul.f32 %v2320_v1, %v233_v8  ;;  %v366_v10 = vmul.f32 %v322_v47, %v2320_v1  ;;  %v390_v11 = vmul.f32 %v322_v47, %v2318_v0 }
 0x12c   :  { %v398_v12 = vsub.f32 %v382_v9, %v390_v11  ;;  %v374_v13 = vadd.f32 %v366_v10, %v358_v42 }
 0x12e   :  { %466 = vmatmul.f32.gmra.mxu2 %v398_v12  ;;  %507 = vmatmul.f32.gmra.mxu3 %v374_v13 }
 0x131   :  { %v236_v40 = vpop.f32.mrf.mxu0  ;;  %v325_v44 = vpop.f32.mrf.mxu1 }
 0x132   :  { %v359_v14 = vmul.f32 %v236_v40, %v2330_v2  ;;  %v383_v15 = vmul.f32 %v2332_v3, %v236_v40  ;;  %v367_v16 = vmul.f32 %v325_v44, %v2332_v3  ;;  %v391_v17 = vmul.f32 %v325_v44, %v2330_v2 }
 0x134   :  { %v399_v18 = vsub.f32 %v383_v15, %v391_v17  ;;  %v375_v19 = vadd.f32 %v367_v16, %v359_v14 }
 0x136   :  { %469 = vmatmul.f32.gmra.mxu2 %v399_v18  ;;  %510 = vmatmul.f32.gmra.mxu3 %v375_v19 }
 0x181   :  { %v449_v1 = vpop.f32.mrf.mxu2  ;;  %v490_v0 = vpop.f32.mrf.mxu3 }
 0x182   :  { %v2410_v20 = vadd.f32 %v490_v0, %v449_v1 }
 0x184   :  { %516 = vmax.xlane.f32.xlu0 %v2410_v20 }
 0x189   :  { %v452_v21 = vpop.f32.mrf.mxu2  ;;  %v493_v22 = vpop.f32.mrf.mxu3 }
 0x18a   :  { %v2413_v23 = vadd.f32 %v493_v22, %v452_v21 }
 0x18c   :  { %518 = vmax.xlane.f32.xlu0 %v2413_v23 }
 0x191   :  { %v455_v24 = vpop.f32.mrf.mxu2  ;;  %v496_v3 = vpop.f32.mrf.mxu3 }
 0x192   :  { %v2416_v25 = vadd.f32 %v496_v3, %v455_v24 }
 0x194   :  { %520 = vmax.xlane.f32.xlu1 %v2416_v25 }
 0x199   :  { %v458_v2 = vpop.f32.mrf.mxu2  ;;  %v499_v26 = vpop.f32.mrf.mxu3 }
 0x19a   :  { %v2419_v27 = vadd.f32 %v499_v26, %v458_v2 }
 0x19c   :  { %522 = vmax.xlane.f32.xlu1 %v2419_v27 }
 0x1a1   :  { %v461_v28 = vpop.f32.mrf.mxu2  ;;  %v502_v29 = vpop.f32.mrf.mxu3 }
 0x1a2   :  { %v2422_v30 = vadd.f32 %v502_v29, %v461_v28 }
 0x1a4   :  { %524 = vmax.xlane.f32.xlu2 %v2422_v30 }
 0x1a9   :  { %v464_v31 = vpop.f32.mrf.mxu2  ;;  %v505_v48 = vpop.f32.mrf.mxu3 }
 0x1aa   :  { %v2425_v49 = vadd.f32 %v505_v48, %v464_v31 }
 0x1ac   :  { %526 = vmax.xlane.f32.xlu2 %v2425_v49 }
 0x1b1   :  { %v467_v50 = vpop.f32.mrf.mxu2  ;;  %v508_v51 = vpop.f32.mrf.mxu3 }
 0x1b2   :  { %v2428_v52 = vadd.f32 %v508_v51, %v467_v50 }
 0x1b4   :  { %528 = vmax.xlane.f32.xlu1 %v2428_v52 }
 0x1b9   :  { %v470_v60 = vpop.f32.mrf.mxu2  ;;  %v511_v61 = vpop.f32.mrf.mxu3 }
 0x1ba   :  { %v2443_v32 = vadd.f32 %v511_v61, %v470_v60 }
 0x1f7   :  { %v2433_v55 = vpop.xlane.xlu0 %516 }
 0x1f8   :  { %vm532_vm0 = vcmp.eq.f32.partialorder %v2410_v20, %v2433_v55 }
 0x1f9   :  { %v540_v56 = vsel %vm532_vm0, %v2431_v54, 128 }
 0x1fa   :  { %v549_v57 = vshra.s32 %v540_v56, 16  ;;  %v548_v12 = vand.u32 65535, %v540_v56 }
 0x1fc   :  { %v551_v58 = vcvt.s32.f32 %v549_v57  ;;  %v550_v40 = vcvt.s32.f32 %v548_v12 }
 0x1fe   :  { %552 = vmin.xlane.f32.xlu0 %v551_v58 }
 0x1ff   :  { %v2438_v59 = vpop.xlane.xlu0 %518 }
 0x200   :  { %vm533_vm1 = vcmp.eq.f32.partialorder %v2413_v23, %v2438_v59 }
 0x201   :  { %v541_v62 = vsel %vm533_vm1, %v2431_v54, 128 }
 0x202   :  { %v563_v63 = vshra.s32 %v541_v62, 16  ;;  %v562_v14 = vand.u32 65535, %v541_v62 }
 0x204   :  { %v565_v33 = vcvt.s32.f32 %v563_v63  ;;  %v564_v17 = vcvt.s32.f32 %v562_v14 }
 0x206   :  { %566 = vmin.xlane.f32.xlu2 %v565_v33  ;;  %530 = vmax.xlane.f32.xlu0 %v2443_v32 }
 0x207   :  { %v2446_v34 = vpop.xlane.xlu1 %520 }
 0x208   :  { %vm534_vm2 = vcmp.eq.f32.partialorder %v2416_v25, %v2446_v34 }
 0x209   :  { %v542_v35 = vsel %vm534_vm2, %v2431_v54, 128 }
 0x20a   :  { %v577_v36 = vshra.s32 %v542_v35, 16  ;;  %v576_v0 = vand.u32 65535, %v542_v35 }
 0x20c   :  { %v579_v37 = vcvt.s32.f32 %v577_v36  ;;  %v578_v24 = vcvt.s32.f32 %v576_v0 }
 0x20e   :  { %580 = vmin.xlane.f32.xlu1 %v579_v37 }
 0x20f   :  { %v2451_v38 = vpop.xlane.xlu1 %522 }
 0x210   :  { %vm535_vm3 = vcmp.eq.f32.partialorder %v2419_v27, %v2451_v38 }
 0x211   :  { %v543_v39 = vsel %vm535_vm3, %v2431_v54, 128 }
 0x212   :  { %v591_v41 = vshra.s32 %v543_v39, 16  ;;  %v590_v2 = vand.u32 65535, %v543_v39 }
 0x214   :  { %v593_v43 = vcvt.s32.f32 %v591_v41  ;;  %v592_v28 = vcvt.s32.f32 %v590_v2 }
 0x216   :  { %594 = vmin.xlane.f32.xlu2 %v593_v43 }
 0x217   :  { %v2456_v4 = vpop.xlane.xlu2 %524 }
 0x218   :  { %vm536_vm4 = vcmp.eq.f32.partialorder %v2422_v30, %v2456_v4 }
 0x219   :  { %v544_v5 = vsel %vm536_vm4, %v2431_v54, 128 }
 0x21a   :  { %v605_v6 = vshra.s32 %v544_v5, 16  ;;  %v604_v31 = vand.u32 65535, %v544_v5 }
 0x21c   :  { %v607_v45 = vcvt.s32.f32 %v605_v6  ;;  %v606_v50 = vcvt.s32.f32 %v604_v31 }
 0x21e   :  { %608 = vmin.xlane.f32.xlu0 %v607_v45 }
 0x21f   :  { %v2461_v7 = vpop.xlane.xlu2 %526 }
 0x220   :  { %vm537_vm5 = vcmp.eq.f32.partialorder %v2425_v49, %v2461_v7 }
 0x221   :  { %v545_v46 = vsel %vm537_vm5, %v2431_v54, 128 }
 0x222   :  { %v619_v8 = vshra.s32 %v545_v46, 16  ;;  %v618_v53 = vand.u32 65535, %v545_v46 }
 0x224   :  { %v621_v47 = vcvt.s32.f32 %v619_v8  ;;  %v620_v57 = vcvt.s32.f32 %v618_v53 }
 0x226   :  { %622 = vmin.xlane.f32.xlu1 %v621_v47 }
 0x227   :  { %v2466_v42 = vpop.xlane.xlu1 %528 }
 0x228   :  { %vm538_vm6 = vcmp.eq.f32.partialorder %v2428_v52, %v2466_v42 }
 0x229   :  { %v546_v9 = vsel %vm538_vm6, %v2431_v54, 128 }
 0x22a   :  { %v633_v10 = vshra.s32 %v546_v9, 16  ;;  %v632_v60 = vand.u32 65535, %v546_v9 }
 0x22c   :  { %v635_v11 = vcvt.s32.f32 %v633_v10  ;;  %v634_v62 = vcvt.s32.f32 %v632_v60 }
 0x22e   :  { %636 = vmin.xlane.f32.xlu0 %v635_v11 }
 0x271   :  { %v553_v13 = vpop.xlane.xlu0 %552 }
 0x272   :  { %vm554_vm7 = vcmp.eq.f32.partialorder %v551_v58, %v553_v13 }
 0x273   :  { %v555_v44 = vsel %vm554_vm7, %v550_v40, inf }
 0x274   :  { %556 = vmin.xlane.f32.xlu2 %v555_v44 }
 0x279   :  { %v567_v15 = vpop.xlane.xlu2 %566  ;;  %v2471_v16 = vpop.xlane.xlu0 %530 }
 0x27a   :  { %3365 = vst [vmem:[#allocation19_spill] sm:$0xff] %v2471_v16  ;;  %vm539_vm8 = vcmp.eq.f32.partialorder %v2443_v32, %v2471_v16  ;;  %vm568_vm9 = vcmp.eq.f32.partialorder %v565_v33, %v567_v15  ;;  %v559_v33 = vcvt.f32.s32 %v553_v13  ;;  %v573_v41 = vcvt.f32.s32 %v567_v15 }
 0x27b   :  { %v569_v18 = vsel %vm568_vm9, %v564_v17, inf  ;;  %v547_v19 = vsel %vm539_vm8, %v2431_v54, 128 }
 0x27c   :  { %570 = vmin.xlane.f32.xlu1 %v569_v18  ;;  %v647_v1 = vshra.s32 %v547_v19, 16  ;;  %v560_v36 = vshll.u32 %v559_v33, 16  ;;  %v646_v6 = vand.u32 65535, %v547_v19 }
 0x27e   :  { %v649_v21 = vcvt.s32.f32 %v647_v1  ;;  %v648_v9 = vcvt.s32.f32 %v646_v6 }
 0x280   :  { %650 = vmin.xlane.f32.xlu2 %v649_v21 }
 0x281   :  { %v581_v22 = vpop.xlane.xlu1 %580 }
 0x282   :  { %vm582_vm10 = vcmp.eq.f32.partialorder %v579_v37, %v581_v22  ;;  %v587_v10 = vcvt.f32.s32 %v581_v22 }
 0x283   :  { %v583_v3 = vsel %vm582_vm10, %v578_v24, inf }
 0x284   :  { %584 = vmin.xlane.f32.xlu0 %v583_v3  ;;  %v588_v13 = vshll.u32 %v587_v10, 16 }
 0x289   :  { %v595_v26 = vpop.xlane.xlu2 %594 }
 0x28a   :  { %vm596_vm11 = vcmp.eq.f32.partialorder %v593_v43, %v595_v26  ;;  %v601_v14 = vcvt.f32.s32 %v595_v26 }
 0x28b   :  { %v597_v29 = vsel %vm596_vm11, %v592_v28, inf }
 0x28c   :  { %598 = vmin.xlane.f32.xlu1 %v597_v29  ;;  %v602_v17 = vshll.u32 %v601_v14, 16 }
 0x291   :  { %v609_v48 = vpop.xlane.xlu0 %608 }
 0x292   :  { %vm610_vm12 = vcmp.eq.f32.partialorder %v607_v45, %v609_v48  ;;  %v574_v45 = vshll.u32 %v573_v41, 16  ;;  %v615_v1 = vcvt.f32.s32 %v609_v48 }
 0x293   :  { %v611_v51 = vsel %vm610_vm12, %v606_v50, inf }
 0x294   :  { %612 = vmin.xlane.f32.xlu2 %v611_v51 }
 0x299   :  { %v623_v56 = vpop.xlane.xlu1 %622 }
 0x29a   :  { %vm624_vm13 = vcmp.eq.f32.partialorder %v621_v47, %v623_v56  ;;  %v629_v3 = vcvt.f32.s32 %v623_v56 }
 0x29b   :  { %v625_v58 = vsel %vm624_vm13, %v620_v57, inf }
 0x29c   :  { %626 = vmin.xlane.f32.xlu0 %v625_v58  ;;  %v630_v26 = vshll.u32 %v629_v3, 16 }
 0x2a1   :  { %v637_v61 = vpop.xlane.xlu0 %636 }
 0x2a2   :  { %vm638_vm14 = vcmp.eq.f32.partialorder %v635_v11, %v637_v61  ;;  %v643_v31 = vcvt.f32.s32 %v637_v61 }
 0x2a3   :  { %v639_v63 = vsel %vm638_vm14, %v634_v62, inf }
 0x2a4   :  { %640 = vmin.xlane.f32.xlu2 %v639_v63  ;;  %v644_v50 = vshll.u32 %v643_v31, 16 }
 0x2e7   :  { %v557_v35 = vpop.xlane.xlu2 %556 }
 0x2e8   :  { %v558_v37 = vcvt.f32.s32 %v557_v35 }
 0x2ea   :  { %v2476_v39 = vadd.s32 %v560_v36, %v558_v37 }
 0x2ec   :  { %vm660_vm15 = vcmp.eq.s32.totalorder %v2431_v54, %v2476_v39 }
 0x2ed   :  { %v2484_v43 = vsel %vm660_vm15, -inf, %v2410_v20 }
 0x2ee   :  { %676 = vmax.xlane.f32.xlu1 %v2484_v43 }
 0x2ef   :  { %v571_v5 = vpop.xlane.xlu1 %570 }
 0x2f0   :  { %v572_v46 = vcvt.f32.s32 %v571_v5 }
 0x2f2   :  { %v2487_v8 = vadd.s32 %v574_v45, %v572_v46 }
 0x2f3   :  { %v651_v47 = vpop.xlane.xlu2 %650 }
 0x2f4   :  { %vm661_vm0 = vcmp.eq.s32.totalorder %v2431_v54, %v2487_v8  ;;  %vm652_vm1 = vcmp.eq.f32.partialorder %v649_v21, %v651_v47  ;;  %v616_v21 = vshll.u32 %v615_v1, 16  ;;  %v657_v60 = vcvt.f32.s32 %v651_v47 }
 0x2f5   :  { %v2495_v20 = vsel %vm661_vm0, -inf, %v2413_v23  ;;  %v653_v11 = vsel %vm652_vm1, %v648_v9, inf }
 0x2f6   :  { %678 = vmax.xlane.f32.xlu0 %v2495_v20  ;;  %654 = vmin.xlane.f32.xlu1 %v653_v11  ;;  %v658_v33 = vshll.u32 %v657_v60, 16 }
 0x2f7   :  { %v585_v12 = vpop.xlane.xlu0 %584 }
 0x2f8   :  { %v586_v40 = vcvt.f32.s32 %v585_v12 }
 0x2fa   :  { %v2498_v44 = vadd.s32 %v588_v13, %v586_v40 }
 0x2fc   :  { %vm662_vm2 = vcmp.eq.s32.totalorder %v2431_v54, %v2498_v44 }
 0x2fd   :  { %v2506_v15 = vsel %vm662_vm2, -inf, %v2416_v25 }
 0x2fe   :  { %680 = vmax.xlane.f32.xlu2 %v2506_v15 }
 0x2ff   :  { %v599_v23 = vpop.xlane.xlu1 %598 }
 0x300   :  { %v600_v18 = vcvt.f32.s32 %v599_v23 }
 0x302   :  { %v2509_v19 = vadd.s32 %v602_v17, %v600_v18 }
 0x304   :  { %3366 = vst [vmem:[#allocation20_spill] sm:$0xff] %v2509_v19  ;;  %vm663_vm3 = vcmp.eq.s32.totalorder %v2431_v54, %v2509_v19 }
 0x305   :  { %v2517_v0 = vsel %vm663_vm3, -inf, %v2419_v27 }
 0x306   :  { %682 = vmax.xlane.f32.xlu0 %v2517_v0 }
 0x307   :  { %v613_v25 = vpop.xlane.xlu2 %612 }
 0x308   :  { %v614_v22 = vcvt.f32.s32 %v613_v25 }
 0x30a   :  { %v2520_v24 = vadd.s32 %v616_v21, %v614_v22 }
 0x30c   :  { %3367 = vst [vmem:[#allocation21_spill] sm:$0xff] %v2520_v24  ;;  %vm3338_vm4 = vcmp.eq.s32.totalorder %v2431_v54, %v2520_v24 }
 0x30d   :  { %v2528_v2 = vsel %vm3338_vm4, -inf, %v2422_v30 }
 0x30e   :  { %684 = vmax.xlane.f32.xlu1 %v2528_v2 }
 0x30f   :  { %v627_v27 = vpop.xlane.xlu0 %626 }
 0x310   :  { %v628_v28 = vcvt.f32.s32 %v627_v27 }
 0x312   :  { %v2531_v29 = vadd.s32 %v630_v26, %v628_v28 }
 0x314   :  { %3368 = vst [vmem:[#allocation22_spill] sm:$0xff] %v2531_v29  ;;  %vm3324_vm5 = vcmp.eq.s32.totalorder %v2431_v54, %v2531_v29 }
 0x315   :  { %v2539_v48 = vsel %vm3324_vm5, -inf, %v2425_v49 }
 0x316   :  { %686 = vmax.xlane.f32.xlu2 %v2539_v48 }
 0x317   :  { %v641_v30 = vpop.xlane.xlu2 %640 }
 0x318   :  { %v642_v51 = vcvt.f32.s32 %v641_v30 }
 0x31a   :  { %v2542_v53 = vadd.s32 %v644_v50, %v642_v51 }
 0x31c   :  { %3369 = vst [vmem:[#allocation23_spill] sm:$0xff] %v2542_v53  ;;  %vm3315_vm6 = vcmp.eq.s32.totalorder %v2431_v54, %v2542_v53 }
 0x31d   :  { %v2550_v56 = vsel %vm3315_vm6, -inf, %v2428_v52 }
 0x31e   :  { %688 = vmax.xlane.f32.xlu1 %v2550_v56 }
 0x361   :  { %v2553_v49 = vpop.xlane.xlu1 %676 }
 0x362   :  { %vm692_vm7 = vcmp.eq.f32.partialorder %v2484_v43, %v2553_v49 }
 0x363   :  { %v700_v57 = vsel %vm692_vm7, %v2431_v54, 128 }
 0x364   :  { %v709_v58 = vshra.s32 %v700_v57, 16  ;;  %v708_v27 = vand.u32 65535, %v700_v57 }
 0x366   :  { %v711_v61 = vcvt.s32.f32 %v709_v58  ;;  %v710_v28 = vcvt.s32.f32 %v708_v27 }
 0x368   :  { %712 = vmin.xlane.f32.xlu0 %v711_v61 }
 0x369   :  { %v655_v62 = vpop.xlane.xlu1 %654  ;;  %v2558_v63 = vpop.xlane.xlu0 %678 }
 0x36a   :  { %v656_v35 = vcvt.f32.s32 %v655_v62  ;;  %vm693_vm8 = vcmp.eq.f32.partialorder %v2495_v20, %v2558_v63 }
 0x36b   :  { %v701_v52 = vsel %vm693_vm8, %v2431_v54, 128 }
 0x36c   :  { %v2563_v36 = vadd.s32 %v658_v33, %v656_v35  ;;  %v723_v37 = vshra.s32 %v701_v52, 16  ;;  %v722_v30 = vand.u32 65535, %v701_v52 }
 0x36e   :  { %3370 = vst [vmem:[#allocation24_spill] sm:$0xff] %v2563_v36  ;;  %vm3303_vm9 = vcmp.eq.s32.totalorder %v2431_v54, %v2563_v36  ;;  %v725_v41 = vcvt.s32.f32 %v723_v37  ;;  %v724_v58 = vcvt.s32.f32 %v722_v30 }
 0x36f   :  { %v2571_v5 = vsel %vm3303_vm9, -inf, %v2443_v32 }
 0x370   :  { %690 = vmax.xlane.f32.xlu0 %v2571_v5  ;;  %726 = vmin.xlane.f32.xlu2 %v725_v41 }
 0x371   :  { %v2574_v6 = vpop.xlane.xlu2 %680 }
 0x372   :  { %vm694_vm10 = vcmp.eq.f32.partialorder %v2506_v15, %v2574_v6 }
 0x373   :  { %v702_v45 = vsel %vm694_vm10, %v2431_v54, 128 }
 0x374   :  { %v737_v46 = vshra.s32 %v702_v45, 16  ;;  %v736_v57 = vand.u32 65535, %v702_v45 }
 0x376   :  { %v739_v47 = vcvt.s32.f32 %v737_v46  ;;  %v738_v37 = vcvt.s32.f32 %v736_v57 }
 0x378   :  { %740 = vmin.xlane.f32.xlu1 %v739_v47 }
 0x379   :  { %v2579_v9 = vpop.xlane.xlu0 %682 }
 0x37a   :  { %vm695_vm11 = vcmp.eq.f32.partialorder %v2517_v0, %v2579_v9 }
 0x37b   :  { %v703_v32 = vsel %vm695_vm11, %v2431_v54, 128 }
 0x37c   :  { %v751_v10 = vshra.s32 %v703_v32, 16  ;;  %v750_v46 = vand.u32 65535, %v703_v32 }
 0x37e   :  { %v753_v11 = vcvt.s32.f32 %v751_v10 }
 0x380   :  { %754 = vmin.xlane.f32.xlu2 %v753_v11 }
 0x381   :  { %v2584_v12 = vpop.xlane.xlu1 %684 }
 0x382   :  { %vm696_vm12 = vcmp.eq.f32.partialorder %v2528_v2, %v2584_v12 }
 0x383   :  { %v704_v13 = vsel %vm696_vm12, %v2431_v54, 128 }
 0x384   :  { %v765_v40 = vshra.s32 %v704_v13, 16 }
 0x386   :  { %v767_v14 = vcvt.s32.f32 %v765_v40  ;;  %v752_v40 = vcvt.s32.f32 %v750_v46 }
 0x388   :  { %768 = vmin.xlane.f32.xlu0 %v767_v14 }
 0x389   :  { %v2589_v23 = vpop.xlane.xlu2 %686 }
 0x38a   :  { %vm697_vm13 = vcmp.eq.f32.partialorder %v2539_v48, %v2589_v23 }
 0x38b   :  { %v705_v17 = vsel %vm697_vm13, %v2431_v54, 128 }
 0x38c   :  { %v779_v18 = vshra.s32 %v705_v17, 16  ;;  %v778_v45 = vand.u32 65535, %v705_v17 }
 0x38e   :  { %v781_v1 = vcvt.s32.f32 %v779_v18  ;;  %v780_v30 = vcvt.s32.f32 %v778_v45 }
 0x390   :  { %782 = vmin.xlane.f32.xlu1 %v781_v1 }
 0x391   :  { %v2594_v25 = vpop.xlane.xlu1 %688 }
 0x392   :  { %vm698_vm14 = vcmp.eq.f32.partialorder %v2550_v56, %v2594_v25 }
 0x393   :  { %v706_v21 = vsel %vm698_vm14, %v2431_v54, 128 }
 0x394   :  { %v793_v22 = vshra.s32 %v706_v21, 16 }
 0x396   :  { %v795_v3 = vcvt.s32.f32 %v793_v22 }
 0x398   :  { %796 = vmin.xlane.f32.xlu0 %v795_v3 }
 0x3db   :  { %v713_v26 = vpop.xlane.xlu0 %712 }
 0x3dc   :  { %vm714_vm1 = vcmp.eq.f32.partialorder %v711_v61, %v713_v26 }
 0x3dd   :  { %v715_v31 = vsel %vm714_vm1, %v710_v28, inf }
 0x3de   :  { %716 = vmin.xlane.f32.xlu2 %v715_v31 }
 0x3e3   :  { %v727_v50 = vpop.xlane.xlu2 %726  ;;  %v2599_v51 = vpop.xlane.xlu0 %690 }
 0x3e4   :  { %3371 = vst [vmem:[#allocation25_spill] sm:$0xff] %v2599_v51  ;;  %vm699_vm7 = vcmp.eq.f32.partialorder %v2571_v5, %v2599_v51  ;;  %vm728_vm8 = vcmp.eq.f32.partialorder %v725_v41, %v727_v50  ;;  %v764_v41 = vand.u32 65535, %v704_v13 }
 0x3e5   :  { %v729_v60 = vsel %vm728_vm8, %v724_v58, inf  ;;  %v707_v62 = vsel %vm699_vm7, %v2431_v54, 128 }
 0x3e6   :  { %730 = vmin.xlane.f32.xlu1 %v729_v60  ;;  %v807_v33 = vshra.s32 %v707_v62, 16  ;;  %v766_v27 = vcvt.s32.f32 %v764_v41 }
 0x3e8   :  { %v809_v35 = vcvt.s32.f32 %v807_v33 }
 0x3ea   :  { %810 = vmin.xlane.f32.xlu2 %v809_v35 }
 0x3eb   :  { %v741_v61 = vpop.xlane.xlu1 %740 }
 0x3ec   :  { %vm742_vm10 = vcmp.eq.f32.partialorder %v739_v47, %v741_v61  ;;  %v792_v47 = vand.u32 65535, %v706_v21  ;;  %v806_v21 = vand.u32 65535, %v707_v62 }
 0x3ed   :  { %v743_v52 = vsel %vm742_vm10, %v738_v37, inf }
 0x3ee   :  { %744 = vmin.xlane.f32.xlu0 %v743_v52  ;;  %v794_v32 = vcvt.s32.f32 %v792_v47 }
 0x3f3   :  { %v755_v10 = vpop.xlane.xlu2 %754 }
 0x3f4   :  { %vm756_vm11 = vcmp.eq.f32.partialorder %v753_v11, %v755_v10  ;;  %v719_v11 = vcvt.f32.s32 %v713_v26 }
 0x3f5   :  { %v757_v18 = vsel %vm756_vm11, %v752_v40, inf }
 0x3f6   :  { %758 = vmin.xlane.f32.xlu1 %v757_v18  ;;  %v720_v13 = vshll.u32 %v719_v11, 16  ;;  %v808_v18 = vcvt.s32.f32 %v806_v21 }
 0x3fb   :  { %v769_v22 = vpop.xlane.xlu0 %768 }
 0x3fc   :  { %vm770_vm12 = vcmp.eq.f32.partialorder %v767_v14, %v769_v22  ;;  %v733_v14 = vcvt.f32.s32 %v727_v50  ;;  %v747_v50 = vcvt.f32.s32 %v741_v61  ;;  %v761_v61 = vcvt.f32.s32 %v755_v10 }
 0x3fd   :  { %v771_v28 = vsel %vm770_vm12, %v766_v27, inf }
 0x3fe   :  { %772 = vmin.xlane.f32.xlu2 %v771_v28  ;;  %v748_v27 = vshll.u32 %v747_v50, 16 }
 0x403   :  { %v783_v31 = vpop.xlane.xlu1 %782 }
 0x404   :  { %vm784_vm13 = vcmp.eq.f32.partialorder %v781_v1, %v783_v31 }
 0x405   :  { %v785_v58 = vsel %vm784_vm13, %v780_v30, inf  ;;  %v762_v30 = vshll.u32 %v761_v61, 16 }
 0x406   :  { %786 = vmin.xlane.f32.xlu0 %v785_v58 }
 0x40b   :  { %v797_v60 = vpop.xlane.xlu0 %796 }
 0x40c   :  { %vm798_vm14 = vcmp.eq.f32.partialorder %v795_v3, %v797_v60  ;;  %v734_v3 = vshll.u32 %v733_v14, 16  ;;  %v803_v21 = vcvt.f32.s32 %v797_v60 }
 0x40d   :  { %v799_v33 = vsel %vm798_vm14, %v794_v32, inf  ;;  %v775_v32 = vcvt.f32.s32 %v769_v22 }
 0x40e   :  { %800 = vmin.xlane.f32.xlu2 %v799_v33 }
 0x40f   :  { %v776_v33 = vshll.u32 %v775_v32, 16 }
 0x451   :  { %v717_v57 = vpop.xlane.xlu2 %716 }
 0x452   :  { %v718_v37 = vcvt.f32.s32 %v717_v57 }
 0x454   :  { %v2604_v52 = vadd.s32 %v720_v13, %v718_v37  ;;  %v789_v13 = vcvt.f32.s32 %v783_v31 }
 0x456   :  { %vm820_vm1 = vcmp.eq.s32.totalorder %v2431_v54, %v2604_v52  ;;  %v790_v37 = vshll.u32 %v789_v13, 16 }
 0x457   :  { %v2612_v17 = vsel %vm820_vm1, -inf, %v2484_v43 }
 0x458   :  { %836 = vmax.xlane.f32.xlu1 %v2612_v17 }
 0x459   :  { %v731_v1 = vpop.xlane.xlu1 %730 }
 0x45a   :  { %v732_v26 = vcvt.f32.s32 %v731_v1 }
 0x45c   :  { %v2615_v46 = vadd.s32 %v734_v3, %v732_v26  ;;  %v804_v3 = vshll.u32 %v803_v21, 16 }
 0x45d   :  { %v811_v40 = vpop.xlane.xlu2 %810 }
 0x45e   :  { %vm821_vm7 = vcmp.eq.s32.totalorder %v2431_v54, %v2615_v46  ;;  %vm812_vm8 = vcmp.eq.f32.partialorder %v809_v35, %v811_v40 }
 0x45f   :  { %v2623_v43 = vsel %vm821_vm7, -inf, %v2495_v20  ;;  %v813_v41 = vsel %vm812_vm8, %v808_v18, inf }
 0x460   :  { %838 = vmax.xlane.f32.xlu0 %v2623_v43  ;;  %814 = vmin.xlane.f32.xlu1 %v813_v41 }
 0x461   :  { %v745_v62 = vpop.xlane.xlu0 %744 }
 0x462   :  { %v746_v28 = vcvt.f32.s32 %v745_v62  ;;  %v817_v62 = vcvt.f32.s32 %v811_v40 }
 0x464   :  { %v2626_v45 = vadd.s32 %v748_v27, %v746_v28 }
 0x466   :  { %vm822_vm10 = vcmp.eq.s32.totalorder %v2431_v54, %v2626_v45 }
 0x467   :  { %v2634_v35 = vsel %vm822_vm10, -inf, %v2506_v15 }
 0x468   :  { %840 = vmax.xlane.f32.xlu2 %v2634_v35 }
 0x469   :  { %v759_v20 = vpop.xlane.xlu1 %758 }
 0x46a   :  { %v760_v58 = vcvt.f32.s32 %v759_v20  ;;  %v818_v20 = vshll.u32 %v817_v62, 16 }
 0x46c   :  { %v2637_v47 = vadd.s32 %v762_v30, %v760_v58 }
 0x46e   :  { %3372 = vst [vmem:[#allocation26_spill] sm:$0xff] %v2637_v47  ;;  %vm823_vm11 = vcmp.eq.s32.totalorder %v2431_v54, %v2637_v47 }
 0x46f   :  { %v2645_v10 = vsel %vm823_vm11, -inf, %v2517_v0 }
 0x470   :  { %842 = vmax.xlane.f32.xlu0 %v2645_v10 }
 0x471   :  { %v773_v15 = vpop.xlane.xlu2 %772 }
 0x472   :  { %v774_v11 = vcvt.f32.s32 %v773_v15 }
 0x474   :  { %v2648_v57 = vadd.s32 %v776_v33, %v774_v11 }
 0x476   :  { %3373 = vst [vmem:[#allocation27_spill] sm:$0xff] %v2648_v57  ;;  %vm3326_vm12 = vcmp.eq.s32.totalorder %v2431_v54, %v2648_v57 }
 0x477   :  { %v2656_v22 = vsel %vm3326_vm12, -inf, %v2528_v2 }
 0x478   :  { %844 = vmax.xlane.f32.xlu1 %v2656_v22 }
 0x479   :  { %v787_v0 = vpop.xlane.xlu0 %786 }
 0x47a   :  { %v788_v14 = vcvt.f32.s32 %v787_v0 }
 0x47c   :  { %v2659_v1 = vadd.s32 %v790_v37, %v788_v14 }
 0x47e   :  { %3374 = vst [vmem:[#allocation28_spill] sm:$0xff] %v2659_v1  ;;  %vm3323_vm13 = vcmp.eq.s32.totalorder %v2431_v54, %v2659_v1 }
 0x47f   :  { %v2667_v31 = vsel %vm3323_vm13, -inf, %v2539_v48 }
 0x480   :  { %846 = vmax.xlane.f32.xlu2 %v2667_v31 }
 0x481   :  { %v801_v2 = vpop.xlane.xlu2 %800 }
 0x482   :  { %v802_v26 = vcvt.f32.s32 %v801_v2 }
 0x484   :  { %v2670_v18 = vadd.s32 %v804_v3, %v802_v26 }
 0x486   :  { %3375 = vst [vmem:[#allocation29_spill] sm:$0xff] %v2670_v18  ;;  %vm3304_vm14 = vcmp.eq.s32.totalorder %v2431_v54, %v2670_v18 }
 0x487   :  { %v2678_v60 = vsel %vm3304_vm14, -inf, %v2550_v56 }
 0x488   :  { %848 = vmax.xlane.f32.xlu1 %v2678_v60 }
 0x4cb   :  { %v2681_v48 = vpop.xlane.xlu1 %836 }
 0x4cc   :  { %vm852_vm8 = vcmp.eq.f32.partialorder %v2612_v17, %v2681_v48 }
 0x4cd   :  { %v860_v50 = vsel %vm852_vm8, %v2431_v54, 128 }
 0x4ce   :  { %v869_v41 = vshra.s32 %v860_v50, 16 }
 0x4d0   :  { %v871_v27 = vcvt.s32.f32 %v869_v41 }
 0x4d2   :  { %872 = vmin.xlane.f32.xlu0 %v871_v27 }
 0x4d3   :  { %v815_v28 = vpop.xlane.xlu1 %814  ;;  %v2686_v61 = vpop.xlane.xlu0 %838 }
 0x4d4   :  { %v816_v30 = vcvt.f32.s32 %v815_v28  ;;  %vm853_vm9 = vcmp.eq.f32.partialorder %v2623_v43, %v2686_v61 }
 0x4d5   :  { %v861_v56 = vsel %vm853_vm9, %v2431_v54, 128 }
 0x4d6   :  { %v2691_v58 = vadd.s32 %v818_v20, %v816_v30  ;;  %v883_v32 = vshra.s32 %v861_v56, 16  ;;  %v882_v18 = vand.u32 65535, %v861_v56 }
 0x4d8   :  { %3376 = vst [vmem:[#allocation30_spill] sm:$0xff] %v2691_v58  ;;  %vm3305_vm8 = vcmp.eq.s32.totalorder %v2431_v54, %v2691_v58  ;;  %v885_v15 = vcvt.s32.f32 %v883_v32  ;;  %v868_v58 = vand.u32 65535, %v860_v50  ;;  %v884_v1 = vcvt.s32.f32 %v882_v18 }
 0x4d9   :  { %v2699_v40 = vsel %vm3305_vm8, -inf, %v2571_v5 }
 0x4da   :  { %850 = vmax.xlane.f32.xlu0 %v2699_v40  ;;  %886 = vmin.xlane.f32.xlu2 %v885_v15  ;;  %v870_v16 = vcvt.s32.f32 %v868_v58 }
 0x4db   :  { %v2702_v33 = vpop.xlane.xlu2 %840 }
 0x4dc   :  { %vm854_vm9 = vcmp.eq.f32.partialorder %v2634_v35, %v2702_v33 }
 0x4dd   :  { %v862_v11 = vsel %vm854_vm9, %v2431_v54, 128 }
 0x4de   :  { %v897_v13 = vshra.s32 %v862_v11, 16  ;;  %v896_v50 = vand.u32 65535, %v862_v11 }
 0x4e0   :  { %v899_v0 = vcvt.s32.f32 %v897_v13 }
 0x4e2   :  { %900 = vmin.xlane.f32.xlu1 %v899_v0 }
 0x4e3   :  { %v2707_v37 = vpop.xlane.xlu0 %842 }
 0x4e4   :  { %vm855_vm14 = vcmp.eq.f32.partialorder %v2645_v10, %v2707_v37 }
 0x4e5   :  { %v863_v5 = vsel %vm855_vm14, %v2431_v54, 128 }
 0x4e6   :  { %v911_v14 = vshra.s32 %v863_v5, 16  ;;  %v910_v56 = vand.u32 65535, %v863_v5 }
 0x4e8   :  { %v913_v21 = vcvt.s32.f32 %v911_v14  ;;  %v912_v18 = vcvt.s32.f32 %v910_v56 }
 0x4ea   :  { %914 = vmin.xlane.f32.xlu2 %v913_v21 }
 0x4eb   :  { %v2712_v2 = vpop.xlane.xlu1 %844 }
 0x4ec   :  { %vm856_vm8 = vcmp.eq.f32.partialorder %v2656_v22, %v2712_v2 }
 0x4ed   :  { %v864_v3 = vsel %vm856_vm8, %v2431_v54, 128 }
 0x4ee   :  { %v925_v26 = vshra.s32 %v864_v3, 16 }
 0x4f0   :  { %v927_v41 = vcvt.s32.f32 %v925_v26 }
 0x4f2   :  { %928 = vmin.xlane.f32.xlu0 %v927_v41 }
 0x4f3   :  { %v2717_v62 = vpop.xlane.xlu2 %846 }
 0x4f4   :  { %vm857_vm9 = vcmp.eq.f32.partialorder %v2667_v31, %v2717_v62 }
 0x4f5   :  { %v865_v28 = vsel %vm857_vm9, %v2431_v54, 128 }
 0x4f6   :  { %v939_v20 = vshra.s32 %v865_v28, 16  ;;  %v938_v11 = vand.u32 65535, %v865_v28 }
 0x4f8   :  { %v941_v30 = vcvt.s32.f32 %v939_v20  ;;  %v940_v19 = vcvt.s32.f32 %v938_v11 }
 0x4fa   :  { %942 = vmin.xlane.f32.xlu1 %v941_v30 }
 0x4fb   :  { %v2722_v32 = vpop.xlane.xlu1 %848 }
 0x4fc   :  { %vm858_vm14 = vcmp.eq.f32.partialorder %v2678_v60, %v2722_v32 }
 0x4fd   :  { %v866_v13 = vsel %vm858_vm14, %v2431_v54, 128 }
 0x4fe   :  { %v953_v14 = vshra.s32 %v866_v13, 16 }
 0x500   :  { %v955_v26 = vcvt.s32.f32 %v953_v14 }
 0x502   :  { %956 = vmin.xlane.f32.xlu0 %v955_v26 }
 0x545   :  { %v873_v36 = vpop.xlane.xlu0 %872 }
 0x546   :  { %vm874_vm8 = vcmp.eq.f32.partialorder %v871_v27, %v873_v36 }
 0x547   :  { %v875_v51 = vsel %vm874_vm8, %v870_v16, inf  ;;  %v898_v16 = vcvt.s32.f32 %v896_v50 }
 0x548   :  { %876 = vmin.xlane.f32.xlu2 %v875_v51 }
 0x54d   :  { %v887_v53 = vpop.xlane.xlu2 %886  ;;  %v2727_v20 = vpop.xlane.xlu0 %850 }
 0x54e   :  { %3377 = vst [vmem:[#allocation31_spill] sm:$0xff] %v2727_v20  ;;  %vm859_vm9 = vcmp.eq.f32.partialorder %v2699_v40, %v2727_v20  ;;  %vm888_vm6 = vcmp.eq.f32.partialorder %v885_v15, %v887_v53  ;;  %v924_v15 = vand.u32 65535, %v864_v3 }
 0x54f   :  { %v889_v29 = vsel %vm888_vm6, %v884_v1, inf  ;;  %v867_v57 = vsel %vm859_vm9, %v2431_v54, 128 }
 0x550   :  { %890 = vmin.xlane.f32.xlu1 %v889_v29  ;;  %v967_v14 = vshra.s32 %v867_v57, 16  ;;  %v926_v20 = vcvt.s32.f32 %v924_v15 }
 0x552   :  { %v969_v24 = vcvt.s32.f32 %v967_v14 }
 0x554   :  { %970 = vmin.xlane.f32.xlu2 %v969_v24 }
 0x555   :  { %v901_v27 = vpop.xlane.xlu1 %900 }
 0x556   :  { %vm902_vm14 = vcmp.eq.f32.partialorder %v899_v0, %v901_v27  ;;  %v952_v0 = vand.u32 65535, %v866_v13 }
 0x557   :  { %v903_v51 = vsel %vm902_vm14, %v898_v16, inf }
 0x558   :  { %904 = vmin.xlane.f32.xlu0 %v903_v51  ;;  %v954_v5 = vcvt.s32.f32 %v952_v0 }
 0x55d   :  { %v915_v58 = vpop.xlane.xlu2 %914 }
 0x55e   :  { %vm916_vm8 = vcmp.eq.f32.partialorder %v913_v21, %v915_v58  ;;  %v879_v21 = vcvt.f32.s32 %v873_v36 }
 0x55f   :  { %v917_v47 = vsel %vm916_vm8, %v912_v18, inf }
 0x560   :  { %918 = vmin.xlane.f32.xlu1 %v917_v47  ;;  %v880_v3 = vshll.u32 %v879_v21, 16 }
 0x565   :  { %v929_v1 = vpop.xlane.xlu0 %928 }
 0x566   :  { %vm930_vm6 = vcmp.eq.f32.partialorder %v927_v41, %v929_v1  ;;  %v893_v41 = vcvt.f32.s32 %v887_v53 }
 0x567   :  { %v931_v29 = vsel %vm930_vm6, %v926_v20, inf }
 0x568   :  { %932 = vmin.xlane.f32.xlu2 %v931_v29  ;;  %v894_v13 = vshll.u32 %v893_v41, 16  ;;  %v907_v29 = vcvt.f32.s32 %v901_v27 }
 0x56a   :  { %v908_v11 = vshll.u32 %v907_v29, 16 }
 0x56d   :  { %v943_v14 = vpop.xlane.xlu1 %942 }
 0x56e   :  { %vm944_vm9 = vcmp.eq.f32.partialorder %v941_v30, %v943_v14  ;;  %v966_v30 = vand.u32 65535, %v867_v57 }
 0x56f   :  { %v945_v50 = vsel %vm944_vm9, %v940_v19, inf }
 0x570   :  { %946 = vmin.xlane.f32.xlu0 %v945_v50  ;;  %v968_v15 = vcvt.s32.f32 %v966_v30 }
 0x575   :  { %v957_v16 = vpop.xlane.xlu0 %956 }
 0x576   :  { %vm958_vm14 = vcmp.eq.f32.partialorder %v955_v26, %v957_v16 }
 0x577   :  { %v959_v51 = vsel %vm958_vm14, %v954_v5, inf  ;;  %v921_v5 = vcvt.f32.s32 %v915_v58 }
 0x578   :  { %960 = vmin.xlane.f32.xlu2 %v959_v51 }
 0x5bb   :  { %v877_v47 = vpop.xlane.xlu2 %876 }
 0x5bc   :  { %v878_v56 = vcvt.f32.s32 %v877_v47  ;;  %v935_v47 = vcvt.f32.s32 %v929_v1 }
 0x5be   :  { %v2732_v18 = vadd.s32 %v880_v3, %v878_v56  ;;  %v936_v56 = vshll.u32 %v935_v47, 16 }
 0x5c0   :  { %vm980_vm8 = vcmp.eq.s32.totalorder %v2431_v54, %v2732_v18 }
 0x5c1   :  { %v988_v19 = vsel %vm980_vm8, -inf, %v2612_v17 }
 0x5c2   :  { %996 = vmax.xlane.f32.xlu1 %v988_v19 }
 0x5c3   :  { %v891_v28 = vpop.xlane.xlu1 %890 }
 0x5c4   :  { %v892_v26 = vcvt.f32.s32 %v891_v28  ;;  %v949_v28 = vcvt.f32.s32 %v943_v14 }
 0x5c6   :  { %v2740_v36 = vadd.s32 %v894_v13, %v892_v26  ;;  %v950_v13 = vshll.u32 %v949_v28, 16 }
 0x5c7   :  { %v971_v20 = vpop.xlane.xlu2 %970 }
 0x5c8   :  { %vm981_vm6 = vcmp.eq.s32.totalorder %v2431_v54, %v2740_v36  ;;  %vm972_vm9 = vcmp.eq.f32.partialorder %v969_v24, %v971_v20 }
 0x5c9   :  { %v989_v53 = vsel %vm981_vm6, -inf, %v2623_v43  ;;  %v973_v17 = vsel %vm972_vm9, %v968_v15, inf  ;;  %v922_v43 = vshll.u32 %v921_v5, 16  ;;  %v963_v15 = vcvt.f32.s32 %v957_v16 }
 0x5ca   :  { %998 = vmax.xlane.f32.xlu0 %v989_v53  ;;  %974 = vmin.xlane.f32.xlu1 %v973_v17  ;;  %v977_v5 = vcvt.f32.s32 %v971_v20 }
 0x5cb   :  { %v905_v57 = vpop.xlane.xlu0 %904  ;;  %v964_v17 = vshll.u32 %v963_v15, 16 }
 0x5cc   :  { %v906_v50 = vcvt.f32.s32 %v905_v57  ;;  %v978_v47 = vshll.u32 %v977_v5, 16 }
 0x5ce   :  { %v2748_v0 = vadd.s32 %v908_v11, %v906_v50 }
 0x5d0   :  { %vm982_vm14 = vcmp.eq.s32.totalorder %v2431_v54, %v2748_v0 }
 0x5d1   :  { %v990_v24 = vsel %vm982_vm14, -inf, %v2634_v35 }
 0x5d2   :  { %1000 = vmax.xlane.f32.xlu2 %v990_v24 }
 0x5d3   :  { %v919_v27 = vpop.xlane.xlu1 %918 }
 0x5d4   :  { %v920_v51 = vcvt.f32.s32 %v919_v27 }
 0x5d6   :  { %v2756_v21 = vadd.s32 %v922_v43, %v920_v51 }
 0x5d8   :  { %vm983_vm9 = vcmp.eq.s32.totalorder %v2431_v54, %v2756_v21 }
 0x5d9   :  { %v991_v58 = vsel %vm983_vm9, -inf, %v2645_v10 }
 0x5da   :  { %1002 = vmax.xlane.f32.xlu0 %v991_v58 }
 0x5db   :  { %v933_v3 = vpop.xlane.xlu2 %932 }
 0x5dc   :  { %v934_v41 = vcvt.f32.s32 %v933_v3 }
 0x5de   :  { %v2764_v35 = vadd.s32 %v936_v56, %v934_v41 }
 0x5e0   :  { %3378 = vst [vmem:[#allocation32_spill] sm:$0xff] %v2764_v35  ;;  %vm3325_vm13 = vcmp.eq.s32.totalorder %v2431_v54, %v2764_v35 }
 0x5e1   :  { %v992_v1 = vsel %vm3325_vm13, -inf, %v2656_v22 }
 0x5e2   :  { %1004 = vmax.xlane.f32.xlu1 %v992_v1 }
 0x5e3   :  { %v947_v30 = vpop.xlane.xlu0 %946 }
 0x5e4   :  { %v948_v26 = vcvt.f32.s32 %v947_v30 }
 0x5e6   :  { %v2772_v10 = vadd.s32 %v950_v13, %v948_v26 }
 0x5e8   :  { %3379 = vst [vmem:[#allocation33_spill] sm:$0xff] %v2772_v10  ;;  %vm3327_vm5 = vcmp.eq.s32.totalorder %v2431_v54, %v2772_v10 }
 0x5e9   :  { %v993_v14 = vsel %vm3327_vm5, -inf, %v2667_v31 }
 0x5ea   :  { %1006 = vmax.xlane.f32.xlu2 %v993_v14 }
 0x5eb   :  { %v961_v29 = vpop.xlane.xlu2 %960 }
 0x5ec   :  { %v962_v57 = vcvt.f32.s32 %v961_v29 }
 0x5ee   :  { %v2780_v22 = vadd.s32 %v964_v17, %v962_v57 }
 0x5f0   :  { %3380 = vst [vmem:[#allocation34_spill] sm:$0xff] %v2780_v22  ;;  %vm3328_vm13 = vcmp.eq.s32.totalorder %v2431_v54, %v2780_v22 }
 0x5f1   :  { %v994_v16 = vsel %vm3328_vm13, -inf, %v2678_v60 }
 0x5f2   :  { %1008 = vmax.xlane.f32.xlu1 %v994_v16 }
 0x635   :  { %v2788_v11 = vpop.xlane.xlu1 %996 }
 0x636   :  { %vm1012_vm12 = vcmp.eq.f32.partialorder %v988_v19, %v2788_v11 }
 0x637   :  { %v1020_v31 = vsel %vm1012_vm12, %v2431_v54, 128 }
 0x638   :  { %v1029_v50 = vshra.s32 %v1020_v31, 16 }
 0x63a   :  { %v1031_v27 = vcvt.s32.f32 %v1029_v50 }
 0x63c   :  { %1032 = vmin.xlane.f32.xlu0 %v1031_v27 }
 0x63d   :  { %v975_v43 = vpop.xlane.xlu1 %974  ;;  %v2792_v51 = vpop.xlane.xlu0 %998 }
 0x63e   :  { %v976_v3 = vcvt.f32.s32 %v975_v43  ;;  %vm1013_vm5 = vcmp.eq.f32.partialorder %v989_v53, %v2792_v51 }
 0x63f   :  { %v1021_v60 = vsel %vm1013_vm5, %v2431_v54, 128 }
 0x640   :  { %v2796_v56 = vadd.s32 %v978_v47, %v976_v3  ;;  %v1043_v41 = vshra.s32 %v1021_v60, 16  ;;  %v1042_v22 = vand.u32 65535, %v1021_v60 }
 0x642   :  { %3381 = vst [vmem:[#allocation35_spill] sm:$0xff] %v2796_v56  ;;  %vm3329_vm13 = vcmp.eq.s32.totalorder %v2431_v54, %v2796_v56  ;;  %v1045_v20 = vcvt.s32.f32 %v1043_v41  ;;  %v1044_v35 = vcvt.s32.f32 %v1042_v22 }
 0x643   :  { %v995_v19 = vsel %vm3329_vm13, -inf, %v2699_v40 }
 0x644   :  { %1010 = vmax.xlane.f32.xlu0 %v995_v19  ;;  %1046 = vmin.xlane.f32.xlu2 %v1045_v20 }
 0x645   :  { %v2804_v28 = vpop.xlane.xlu2 %1000 }
 0x646   :  { %vm1014_vm12 = vcmp.eq.f32.partialorder %v990_v24, %v2804_v28 }
 0x647   :  { %v1022_v53 = vsel %vm1014_vm12, %v2431_v54, 128 }
 0x648   :  { %v1057_v30 = vshra.s32 %v1022_v53, 16 }
 0x64a   :  { %v1059_v13 = vcvt.s32.f32 %v1057_v30 }
 0x64c   :  { %1060 = vmin.xlane.f32.xlu1 %v1059_v13 }
 0x64d   :  { %v2808_v26 = vpop.xlane.xlu0 %1002 }
 0x64e   :  { %vm1015_vm5 = vcmp.eq.f32.partialorder %v991_v58, %v2808_v26 }
 0x64f   :  { %v1023_v15 = vsel %vm1015_vm5, %v2431_v54, 128 }
 0x650   :  { %v1071_v29 = vshra.s32 %v1023_v15, 16 }
 0x652   :  { %v1073_v40 = vcvt.s32.f32 %v1071_v29  ;;  %v1028_v29 = vand.u32 65535, %v1020_v31 }
 0x654   :  { %1074 = vmin.xlane.f32.xlu2 %v1073_v40  ;;  %v1030_v56 = vcvt.s32.f32 %v1028_v29 }
 0x655   :  { %v2812_v17 = vpop.xlane.xlu1 %1004 }
 0x656   :  { %vm1016_vm13 = vcmp.eq.f32.partialorder %v992_v1, %v2812_v17 }
 0x657   :  { %v1024_v24 = vsel %vm1016_vm13, %v2431_v54, 128 }
 0x658   :  { %v1085_v57 = vshra.s32 %v1024_v24, 16 }
 0x65a   :  { %v1087_v50 = vcvt.s32.f32 %v1085_v57 }
 0x65c   :  { %1088 = vmin.xlane.f32.xlu0 %v1087_v50 }
 0x65d   :  { %v2816_v5 = vpop.xlane.xlu2 %1006 }
 0x65e   :  { %vm1017_vm12 = vcmp.eq.f32.partialorder %v993_v14, %v2816_v5 }
 0x65f   :  { %v1025_v58 = vsel %vm1017_vm12, %v2431_v54, 128 }
 0x660   :  { %v1099_v43 = vshra.s32 %v1025_v58, 16 }
 0x662   :  { %v1101_v47 = vcvt.s32.f32 %v1099_v43 }
 0x664   :  { %1102 = vmin.xlane.f32.xlu1 %v1101_v47 }
 0x665   :  { %v2820_v3 = vpop.xlane.xlu1 %1008 }
 0x666   :  { %vm1018_vm5 = vcmp.eq.f32.partialorder %v994_v16, %v2820_v3 }
 0x667   :  { %v1026_v1 = vsel %vm1018_vm5, %v2431_v54, 128 }
 0x668   :  { %v1113_v41 = vshra.s32 %v1026_v1, 16 }
 0x66a   :  { %v1115_v30 = vcvt.s32.f32 %v1113_v41 }
 0x66c   :  { %1116 = vmin.xlane.f32.xlu0 %v1115_v30 }
 0x6af   :  { %v2824_v57 = vpop.xlane.xlu0 %1032 }
 0x6b0   :  { %vm1034_vm13 = vcmp.eq.f32.partialorder %v1031_v27, %v2824_v57  ;;  %v1056_v27 = vand.u32 65535, %v1022_v53  ;;  %v1084_v53 = vand.u32 65535, %v1024_v24 }
 0x6b1   :  { %v1035_v14 = vsel %vm1034_vm13, %v1030_v56, inf }
 0x6b2   :  { %1036 = vmin.xlane.f32.xlu2 %v1035_v14  ;;  %v1058_v29 = vcvt.s32.f32 %v1056_v27  ;;  %v1098_v27 = vand.u32 65535, %v1025_v58 }
 0x6b7   :  { %v2827_v43 = vpop.xlane.xlu2 %1046  ;;  %v2829_v10 = vpop.xlane.xlu0 %1010 }
 0x6b8   :  { %3382 = vst [vmem:[#allocation36_spill] sm:$0xff] %v2829_v10  ;;  %vm1019_vm12 = vcmp.eq.f32.partialorder %v995_v19, %v2829_v10  ;;  %vm1048_vm5 = vcmp.eq.f32.partialorder %v1045_v20, %v2827_v43  ;;  %v1070_v19 = vand.u32 65535, %v1023_v15  ;;  %v1140_v15 = vmax.f32 %v2433_v55, %v2553_v49 }
 0x6b9   :  { %v1049_v16 = vsel %vm1048_vm5, %v1044_v35, inf  ;;  %v2834_v31 = vsel %vm1019_vm12, %v2431_v54, 128 }
 0x6ba   :  { %1050 = vmin.xlane.f32.xlu1 %v1049_v16  ;;  %v1127_v41 = vshra.s32 %v2834_v31, 16  ;;  %v1072_v20 = vcvt.s32.f32 %v1070_v19  ;;  %v1148_v24 = vmax.f32 %v1140_v15, %v2681_v48 }
 0x6bc   :  { %v2837_v56 = vcvt.s32.f32 %v1127_v41  ;;  %v1086_v41 = vcvt.s32.f32 %v1084_v53  ;;  %v1156_v19 = vmax.f32 %v1148_v24, %v2788_v11 }
 0x6be   :  { %1130 = vmin.xlane.f32.xlu2 %v2837_v56  ;;  %v1188_v53 = vsub.f32 %v2553_v49, %v1156_v19 }
 0x6bf   :  { %v2840_v60 = vpop.xlane.xlu1 %1060 }
 0x6c0   :  { %vm1062_vm13 = vcmp.eq.f32.partialorder %v1059_v13, %v2840_v60 }
 0x6c1   :  { %v1063_v22 = vsel %vm1062_vm13, %v1058_v29, inf  ;;  %v1100_v29 = vcvt.s32.f32 %v1098_v27  ;;  %v1196_v27 = vmul.f32 1.442695, %v1188_v53 }
 0x6c2   :  { %1064 = vmin.xlane.f32.xlu0 %v1063_v22  ;;  %v1112_v22 = vand.u32 65535, %v1026_v1 }
 0x6c4   :  { %v1114_v58 = vcvt.s32.f32 %v1112_v22  ;;  %v1236_v22 = vsub.f32 %v2788_v11, %v1156_v19 }
 0x6c7   :  { %v2843_v35 = vpop.xlane.xlu2 %1074 }
 0x6c8   :  { %vm1076_vm12 = vcmp.eq.f32.partialorder %v1073_v40, %v2843_v35 }
 0x6c9   :  { %v1077_v14 = vsel %vm1076_vm12, %v1072_v20, inf  ;;  %v1164_v20 = vsub.f32 %v2433_v55, %v1156_v19 }
 0x6ca   :  { %1078 = vmin.xlane.f32.xlu1 %v1077_v14 }
 0x6cf   :  { %v2846_v16 = vpop.xlane.xlu0 %1088 }
 0x6d0   :  { %vm1090_vm5 = vcmp.eq.f32.partialorder %v1087_v50, %v2846_v16  ;;  %v1141_v50 = vmax.f32 %v2438_v59, %v2558_v63 }
 0x6d1   :  { %v1091_v10 = vsel %vm1090_vm5, %v1086_v41, inf  ;;  %v1172_v41 = vmul.f32 1.442695, %v1164_v20 }
 0x6d2   :  { %1092 = vmin.xlane.f32.xlu2 %v1091_v10 }
 0x6d3   :  { %1753 = vpow2.f32 %v1172_v41 }
 0x6d4   :  { %1755 = vpow2.f32 %v1196_v27 }
 0x6d7   :  { %v2849_v13 = vpop.xlane.xlu1 %1102 }
 0x6d8   :  { %3383 = vst [vmem:[#allocation37_spill] sm:$0xff] %v2849_v13  ;;  %vm1104_vm13 = vcmp.eq.f32.partialorder %v1101_v47, %v2849_v13  ;;  %v1149_v47 = vmax.f32 %v1141_v50, %v2686_v61 }
 0x6d9   :  { %v1105_v40 = vsel %vm1104_vm13, %v1100_v29, inf  ;;  %v1212_v29 = vsub.f32 %v2681_v48, %v1156_v19 }
 0x6da   :  { %1106 = vmin.xlane.f32.xlu0 %v1105_v40  ;;  %v1157_v1 = vmax.f32 %v1149_v47, %v2792_v51  ;;  %v1244_v47 = vmul.f32 1.442695, %v1236_v22 }
 0x6db   :  { %v1220_v55 = vmul.f32 1.442695, %v1212_v29 }
 0x6dc   :  { %v1165_v15 = vsub.f32 %v2438_v59, %v1157_v1  ;;  %v1189_v40 = vsub.f32 %v2558_v63, %v1157_v1  ;;  %v2874_v59 = vpop.eup %1753  ;;  %v1237_v20 = vsub.f32 %v2792_v51, %v1157_v1 }
 0x6dd   :  { %1757 = vpow2.f32 %v1220_v55  ;;  %v2876_v63 = vpop.eup %1755 }
 0x6de   :  { %v1174_v24 = vmul.f32 1.442695, %v1165_v15  ;;  %v1198_v50 = vmul.f32 1.442695, %v1189_v40  ;;  %v1246_v15 = vmul.f32 1.442695, %v1237_v20 }
 0x6df   :  { %v2858_v10 = vpop.xlane.xlu0 %1116 }
 0x6e0   :  { %3384 = vst [vmem:[#allocation38_spill] sm:$0xff] %v2858_v10  ;;  %vm1118_vm12 = vcmp.eq.f32.partialorder %v1115_v30, %v2858_v10  ;;  %v1142_v30 = vmax.f32 %v2446_v34, %v2574_v6  ;;  %1759 = vpow2.f32 %v1174_v24 }
 0x6e1   :  { %v1119_v14 = vsel %vm1118_vm12, %v1114_v58, inf  ;;  %v1213_v58 = vsub.f32 %v2686_v61, %v1157_v1  ;;  %1761 = vpow2.f32 %v1198_v50  ;;  %v1260_v61 = vadd.f32 %v2876_v63, %v2874_v59 }
 0x6e2   :  { %1120 = vmin.xlane.f32.xlu1 %v1119_v14  ;;  %v1150_v49 = vmax.f32 %v1142_v30, %v2702_v33  ;;  %v1143_v14 = vmax.f32 %v2451_v38, %v2579_v9  ;;  %1763 = vpow2.f32 %v1244_v47 }
 0x6e3   :  { %v1222_v53 = vmul.f32 1.442695, %v1213_v58  ;;  %v2885_v41 = vpop.eup %1757 }
 0x6e4   :  { %v1158_v48 = vmax.f32 %v1150_v49, %v2804_v28  ;;  %v1151_v27 = vmax.f32 %v1143_v14, %v2707_v37  ;;  %v1144_v49 = vmax.f32 %v2456_v4, %v2584_v12 }
 0x6e5   :  { %1765 = vpow2.f32 %v1222_v53 }
 0x6e6   :  { %v1166_v11 = vsub.f32 %v2446_v34, %v1158_v48  ;;  %v1190_v19 = vsub.f32 %v2574_v6, %v1158_v48  ;;  %v2888_v29 = vpop.eup %1759  ;;  %v1159_v40 = vmax.f32 %v1151_v27, %v2808_v26  ;;  %v1268_v34 = vadd.f32 %v2885_v41, %v1260_v61 }
 0x6e7   :  { %v2890_v51 = vpop.eup %1761  ;;  %1767 = vpow2.f32 %v1246_v15  ;;  %v1214_v55 = vsub.f32 %v2702_v33, %v1158_v48  ;;  %v1152_v20 = vmax.f32 %v1144_v49, %v2712_v2  ;;  %v1238_v33 = vsub.f32 %v2804_v28, %v1158_v48 }
 0x6e8   :  { %v1176_v1 = vmul.f32 1.442695, %v1166_v11  ;;  %v1200_v30 = vmul.f32 1.442695, %v1190_v19  ;;  %v1261_v6 = vadd.f32 %v2890_v51, %v2888_v29  ;;  %v2897_v24 = vpop.eup %1763  ;;  %v1167_v22 = vsub.f32 %v2451_v38, %v1159_v40 }
 0x6e9   :  { %v2903_v50 = vadd.f32 %v2897_v24, %v1268_v34  ;;  %v1191_v58 = vsub.f32 %v2579_v9, %v1159_v40  ;;  %v1224_v53 = vmul.f32 1.442695, %v1214_v55  ;;  %v1160_v61 = vmax.f32 %v1152_v20, %v2812_v17 }
 0x6ea   :  { %1769 = vpow2.f32 %v1176_v1  ;;  %v1178_v11 = vmul.f32 1.442695, %v1167_v22  ;;  %v1248_v9 = vmul.f32 1.442695, %v1238_v33  ;;  %v1215_v28 = vsub.f32 %v2707_v37, %v1159_v40 }
 0x6eb   :  { %1771 = vpow2.f32 %v1200_v30  ;;  %v2906_v47 = vpop.eup %1765  ;;  %v1202_v38 = vmul.f32 1.442695, %v1191_v58  ;;  %v1145_v48 = vmax.f32 %v2461_v7, %v2589_v23  ;;  %v1168_v34 = vsub.f32 %v2456_v4, %v1160_v61 }
 0x6ec   :  { %v1269_v14 = vadd.f32 %v2906_v47, %v1261_v6  ;;  %1773 = vrcp.f32 %v2903_v50  ;;  %v1192_v30 = vsub.f32 %v2584_v12, %v1160_v61  ;;  %v1226_v37 = vmul.f32 1.442695, %v1215_v28 }
 0x6ed   :  { %v2912_v19 = vpop.eup %1767  ;;  %1775 = vpow2.f32 %v1224_v53  ;;  %v1153_v6 = vmax.f32 %v1145_v48, %v2717_v62  ;;  %v1239_v22 = vsub.f32 %v2808_v26, %v1159_v40  ;;  %v1180_v58 = vmul.f32 1.442695, %v1168_v34 }
 0x6ee   :  { %v2920_v1 = vadd.f32 %v2912_v19, %v1269_v14  ;;  %1777 = vpow2.f32 %v1178_v11  ;;  %v1204_v12 = vmul.f32 1.442695, %v1192_v30  ;;  %v1216_v26 = vsub.f32 %v2712_v2, %v1160_v61 }
 0x6ef   :  { %1779 = vpow2.f32 %v1202_v38  ;;  %v2935_v20 = vmax.f32 %v1153_v6, %v2816_v5  ;;  %v1250_v38 = vmul.f32 1.442695, %v1239_v22  ;;  %v1240_v22 = vsub.f32 %v2812_v17, %v1160_v61 }
 0x6f0   :  { %v2915_v27 = vpop.eup %1769  ;;  %1781 = vpow2.f32 %v1248_v9  ;;  %v1146_v9 = vmax.f32 %v2466_v42, %v2594_v25  ;;  %vm1289_vm13 = vweird.f32 %v2903_v50 }
 0x6f1   :  { %v2917_v15 = vpop.eup %1771  ;;  %1783 = vrcp.f32 %v2920_v1  ;;  %v1169_v28 = vsub.f32 %v2461_v7, %v2935_v20  ;;  %v1193_v34 = vsub.f32 %v2589_v23, %v2935_v20  ;;  %v1252_v17 = vmul.f32 1.442695, %v1240_v22 }
 0x6f2   :  { %v1262_v55 = vadd.f32 %v2917_v15, %v2915_v27  ;;  %v2930_v49 = vpop.eup %1773  ;;  %1785 = vpow2.f32 %v1226_v37  ;;  %v1154_v30 = vmax.f32 %v1146_v9, %v2722_v32  ;;  %v1228_v37 = vmul.f32 1.442695, %v1216_v26 }
 0x6f3   :  { %v2937_v4 = vpop.eup %1775  ;;  %v1285_v53 = vmul.f32 %v2930_v49, %v2903_v50  ;;  %1787 = vpow2.f32 %v1180_v58  ;;  %v1182_v7 = vmul.f32 1.442695, %v1169_v28  ;;  %v1206_v9 = vmul.f32 1.442695, %v1193_v34 }
 0x6f4   :  { %v2939_v33 = vpop.eup %1777  ;;  %v1270_v14 = vadd.f32 %v2937_v4, %v1262_v55  ;;  %1789 = vpow2.f32 %v1204_v12  ;;  %v2965_v58 = vmax.f32 %v1154_v30, %v2820_v3  ;;  %v1217_v61 = vsub.f32 %v2717_v62, %v2935_v20 }
 0x6f5   :  { %v2944_v11 = vpop.eup %1779  ;;  %v1286_v55 = vsub.f32 1.0, %v1285_v53  ;;  %1791 = vpow2.f32 %v1250_v38  ;;  %vm1290_vm5 = vweird.f32 %v2930_v49  ;;  %v1241_v22 = vsub.f32 %v2816_v5, %v2935_v20 }
 0x6f6   :  { %v2947_v40 = vpop.eup %1781  ;;  %v1263_v2 = vadd.f32 %v2944_v11, %v2939_v33  ;;  %v1170_v28 = vsub.f32 %v2466_v42, %v2965_v58  ;;  %v1230_v42 = vmul.f32 1.442695, %v1217_v61  ;;  %vm3003_vm12 = vmor %vm1289_vm13, %vm1290_vm5  ;;  %vm1304_vm13 = vweird.f32 %v2920_v1 }
 0x6f7   :  { %v2953_v48 = vpop.eup %1783  ;;  %v2959_v6 = vadd.f32 %v2947_v40, %v1270_v14  ;;  %v1287_v38 = vmul.f32 %v2930_v49, %v1286_v55  ;;  %v1293_v55 = vand.u32 2147483647, %v2903_v50 }
 0x6f8   :  { %v1300_v23 = vmul.f32 %v2953_v48, %v2920_v1  ;;  %v2969_v12 = vpop.eup %1785  ;;  %vm1305_vm5 = vweird.f32 %v2953_v48 }
 0x6f9   :  { %v2971_v14 = vpop.eup %1787  ;;  %1793 = vrcp.f32 %v2959_v6  ;;  %v1271_v53 = vadd.f32 %v2969_v12, %v1263_v2  ;;  %v1194_v2 = vsub.f32 %v2594_v25, %v2965_v58  ;;  %v1288_v62 = vadd.f32 %v2930_v49, %v1287_v38 }
 0x6fa   :  { %v2976_v26 = vpop.eup %1789  ;;  %1795 = vpow2.f32 %v1228_v37  ;;  %v1301_v34 = vsub.f32 1.0, %v1300_v23  ;;  %v1184_v25 = vmul.f32 1.442695, %v1170_v28  ;;  %vm3014_vm4 = vcmp.eq.f32.partialorder %v1293_v55, 8.507059e+37 }
 0x6fb   :  { %1797 = vpow2.f32 %v1182_v7  ;;  %v2982_v30 = vpop.eup %1791  ;;  %v1264_v37 = vadd.f32 %v2976_v26, %v2971_v14  ;;  %v134_v7 = vld [vmem:[#allocation7] sm:$0xff]  ;;  %v1208_v13 = vmul.f32 1.442695, %v1194_v2  ;;  %v1218_v2 = vsub.f32 %v2722_v32, %v2965_v58 }
 0x6fc   :  { %1799 = vpow2.f32 %v1206_v9  ;;  %v2988_v10 = vadd.f32 %v2982_v30, %v1271_v53  ;;  %v1295_v9 = vand.u32 2147483648, %v2903_v50  ;;  %238 = vmatmul.f32.gmra.mxu0 %v134_v7  ;;  %327 = vmatmul.f32.gmra.mxu1 %v134_v7  ;;  %v1302_v53 = vmul.f32 %v2953_v48, %v1301_v34 }
 0x6fd   :  { %1801 = vpow2.f32 %v1252_v17  ;;  %v1292_v50 = vsel %vm3003_vm12, %v2930_v49, %v1288_v62  ;;  %v1254_v34 = vmul.f32 1.442695, %v1241_v22  ;;  %v1308_v55 = vand.u32 2147483647, %v2920_v1  ;;  %vm3040_vm12 = vmor %vm1304_vm13, %vm1305_vm5 }
 0x6fe   :  { %1803 = vrcp.f32 %v2988_v10  ;;  %v1310_v62 = vand.u32 2147483648, %v2920_v1  ;;  %vm1334_vm13 = vweird.f32 %v2988_v10 }
 0x6ff   :  { %v2996_v23 = vpop.eup %1793  ;;  %1805 = vpow2.f32 %v1230_v42  ;;  %v135_v42 = vld [vmem:[#allocation7 + $0x8] sm:$0xff] }
 0x700   :  { %v3001_v38 = vpop.eup %1795  ;;  %v1315_v7 = vmul.f32 %v2996_v23, %v2959_v6  ;;  %1807 = vpow2.f32 %v1184_v25  ;;  %v1242_v25 = vsub.f32 %v2820_v3, %v2965_v58 }
 0x701   :  { %3385 = vst [vmem:[#allocation39_spill] sm:$0xff] %v3001_v38  ;;  %v3007_v5 = vpop.eup %1797  ;;  %v1272_v20 = vadd.f32 %v3001_v38, %v1264_v37  ;;  %v1296_v37 = vor.u32 1.1754944e-38, %v1295_v9  ;;  %v1303_v38 = vadd.f32 %v2953_v48, %v1302_v53  ;;  %1809 = vpow2.f32 %v1208_v13 }
 0x702   :  { %v3018_v28 = vpop.eup %1799  ;;  %1811 = vpow2.f32 %v1254_v34  ;;  %v1232_v13 = vmul.f32 1.442695, %v1218_v2  ;;  %v1316_v1 = vsub.f32 1.0, %v1315_v7  ;;  %v1256_v2 = vmul.f32 1.442695, %v1242_v25 }
 0x703   :  { %v3026_v49 = vpop.eup %1801  ;;  %v1265_v22 = vadd.f32 %v3018_v28, %v3007_v5  ;;  %v1297_v9 = vsel %vm3014_vm4, %v1296_v37, %v1292_v50  ;;  %v1311_v50 = vor.u32 1.1754944e-38, %v1310_v62  ;;  %vm1309_vm4 = vcmp.eq.f32.partialorder %v1308_v55, 8.507059e+37 }
 0x704   :  { %3390 = vst [vmem:[#allocation40_spill] sm:$0xff] %v3026_v49  ;;  %v3032_v32 = vadd.f32 %v3026_v49, %v1272_v20  ;;  %v3044_v17 = vpop.eup %1803  ;;  %v1307_v20 = vsel %vm3040_vm12, %v2953_v48, %v1303_v38  ;;  %241 = vmatmul.f32.gmra.mxu0 %v135_v42  ;;  %330 = vmatmul.f32.gmra.mxu1 %v135_v42 }
 0x705   :  { %v3049_v49 = vpop.eup %1805  ;;  %v1298_v3 = vmul.f32 %v2874_v59, %v1297_v9  ;;  %v1404_v58 = vmul.f32 %v2876_v63, %v1297_v9  ;;  %v3059_v48 = vsel %vm1309_vm4, %v1311_v50, %v1307_v20  ;;  %v1317_v38 = vmul.f32 %v2996_v23, %v1316_v1 }
 0x706   :  { %v3053_v61 = vpop.eup %1807  ;;  %1813 = vrcp.f32 %v3032_v32  ;;  %v1273_v34 = vadd.f32 %v3049_v49, %v1265_v22  ;;  %v1330_v59 = vmul.f32 %v3044_v17, %v2988_v10  ;;  %v1039_v63 = vcvt.f32.s32 %v2824_v57  ;;  %v136_v22 = vld [vmem:[#allocation7 + $0x10] sm:$0xff] }
 0x707   :  { %v3057_v7 = vpop.eup %1809  ;;  %1815 = vpow2.f32 %v1232_v13  ;;  %v1412_v62 = vmul.f32 %v2885_v41, %v1297_v9  ;;  %v1428_v55 = vsel %vm660_vm15, %v1298_v3, 0.0  ;;  %v1444_v42 = vsel %vm820_vm1, %v1404_v58, 0.0 }
 0x708   :  { %v3065_v37 = vpop.eup %1811  ;;  %v1266_v13 = vadd.f32 %v3057_v7, %v3053_v61  ;;  %v1313_v57 = vmul.f32 %v2888_v29, %v3059_v48  ;;  %v1405_v41 = vmul.f32 %v2890_v51, %v3059_v48  ;;  %1817 = vpow2.f32 %v1256_v2 }
 0x709   :  { %v3075_v25 = vadd.f32 %v3065_v37, %v1273_v34  ;;  %v1318_v53 = vadd.f32 %v2996_v23, %v1317_v38  ;;  %vm1320_vm15 = vweird.f32 %v2996_v23  ;;  %v1331_v52 = vsub.f32 1.0, %v1330_v59 }
 0x70a   :  { %v1040_v20 = vshll.u32 %v1039_v63, 16  ;;  %v1452_v58 = vadd.f32 %v1444_v42, %v1428_v55  ;;  %v1325_v50 = vand.u32 2147483648, %v2959_v6  ;;  %v1420_v51 = vmul.f32 %v2897_v24, %v1297_v9 }
 0x70b   :  { %v1460_v34 = vsel %vm980_vm8, %v1412_v62, 0.0  ;;  %vm1319_vm1 = vweird.f32 %v2959_v6  ;;  %v1323_v2 = vand.u32 2147483647, %v2959_v6  ;;  %1819 = vrcp.f32 %v3075_v25 }
 0x70c   :  { %v3085_v1 = vpop.eup %1813  ;;  %244 = vmatmul.f32.gmra.mxu0 %v136_v22  ;;  %333 = vmatmul.f32.gmra.mxu1 %v136_v22  ;;  %v1429_v63 = vsel %vm661_vm0, %v1313_v57, 0.0  ;;  %vm3103_vm5 = vmor %vm1319_vm1, %vm1320_vm15  ;;  %v1445_v18 = vsel %vm821_vm7, %v1405_v41, 0.0  ;;  %v1332_v9 = vmul.f32 %v3044_v17, %v1331_v52  ;;  %v1053_v62 = vcvt.f32.s32 %v2827_v43 }
 0x70d   :  { %v3088_v29 = vpop.eup %1815  ;;  %v1322_v6 = vsel %vm3103_vm5, %v2996_v23, %v1318_v53  ;;  %v1345_v8 = vmul.f32 %v3085_v1, %v3032_v32  ;;  %v1468_v55 = vadd.f32 %v1460_v34, %v1452_v58  ;;  %v1326_v42 = vor.u32 1.1754944e-38, %v1325_v50  ;;  %v137_v53 = vld [vmem:[#allocation7 + $0x18] sm:$0xff] }
 0x70e   :  { %v1274_v38 = vadd.f32 %v3088_v29, %v1266_v13  ;;  %v3118_v22 = vpop.eup %1817  ;;  %v1413_v46 = vmul.f32 %v2906_v47, %v3059_v48  ;;  %vm1324_vm7 = vcmp.eq.f32.partialorder %v1323_v2, 8.507059e+37  ;;  %v1453_v41 = vadd.f32 %v1445_v18, %v1429_v63 }
 0x70f   :  { %v1333_v43 = vadd.f32 %v3044_v17, %v1332_v9  ;;  %vm1335_vm8 = vweird.f32 %v3044_v17  ;;  %v1054_v50 = vshll.u32 %v1053_v62, 16  ;;  %v1340_v34 = vand.u32 2147483648, %v2988_v10 }
 0x710   :  { %v3123_v23 = vadd.f32 %v3118_v22, %v1274_v38  ;;  %v1461_v2 = vsel %vm981_vm6, %v1413_v46, 0.0  ;;  %vm3143_vm12 = vmor %vm1334_vm13, %vm1335_vm8  ;;  %v1067_v18 = vcvt.f32.s32 %v2840_v60  ;;  %vm1350_vm1 = vweird.f32 %v3085_v1 }
 0x711   :  { %v3128_v58 = vpop.eup %1819  ;;  %v1469_v24 = vadd.f32 %v1461_v2, %v1453_v41 }
 0x712   :  { %1821 = vrcp.f32 %v3123_v23  ;;  %v1068_v44 = vshll.u32 %v1067_v18, 16 }
 0x714   :  { %247 = vmatmul.f32.gmra.mxu0 %v137_v53  ;;  %336 = vmatmul.f32.gmra.mxu1 %v137_v53 }
 0x718   :  { %v3168_v41 = vpop.eup %1821 }
 0x725   :  { %v1037_v39 = vpop.xlane.xlu2 %1036 }
 0x726   :  { %v1038_v3 = vcvt.f32.s32 %v1037_v39  ;;  %v1327_v39 = vsel %vm1324_vm7, %v1326_v42, %v1322_v6  ;;  %v1341_v6 = vor.u32 1.1754944e-38, %v1340_v34  ;;  %v138_v42 = vld [vmem:[#allocation7 + $0x20] sm:$0xff] }
 0x727   :  { %v1328_v38 = vmul.f32 %v2915_v27, %v1327_v39  ;;  %v1337_v27 = vsel %vm3143_vm12, %v3044_v17, %v1333_v43  ;;  %v1414_v46 = vmul.f32 %v2937_v4, %v1327_v39  ;;  %v1353_v4 = vand.u32 2147483647, %v3032_v32  ;;  %250 = vmatmul.f32.gmra.mxu0 %v138_v42  ;;  %339 = vmatmul.f32.gmra.mxu1 %v138_v42 }
 0x728   :  { %v1041_v59 = vadd.s32 %v1040_v20, %v1038_v3  ;;  %v1338_v20 = vand.u32 2147483647, %v2988_v10  ;;  %v1346_v3 = vsub.f32 1.0, %v1345_v8  ;;  %vm1380_vm12 = vweird.f32 %v3168_v41 }
 0x729   :  { %v1430_v17 = vsel %vm662_vm2, %v1328_v38, 0.0  ;;  %vm1349_vm2 = vweird.f32 %v3032_v32 }
 0x72a   :  { %vm1476_vm0 = vcmp.eq.s32.totalorder %v2431_v54, %v1041_v59  ;;  %v1406_v59 = vmul.f32 %v2917_v15, %v1327_v39  ;;  %vm1339_vm6 = vcmp.eq.f32.partialorder %v1338_v20, 8.507059e+37  ;;  %v1347_v10 = vmul.f32 %v3085_v1, %v1346_v3 }
 0x72b   :  { %v1484_v13 = vsel %vm1476_vm0, %v1420_v51, 0.0  ;;  %v1126_v51 = vand.u32 65535, %v2834_v31  ;;  %v1421_v31 = vmul.f32 %v2912_v19, %v3059_v48  ;;  %v1360_v15 = vmul.f32 %v3128_v58, %v3075_v25 }
 0x72c   :  { %v1492_v57 = vadd.f32 %v1484_v13, %v1468_v55  ;;  %v1446_v8 = vsel %vm822_vm10, %v1406_v59, 0.0  ;;  %v1342_v55 = vsel %vm1339_vm6, %v1341_v6, %v1337_v27  ;;  %vm1351_vm10 = vmor %vm1349_vm2, %vm1350_vm1  ;;  %vm1365_vm0 = vweird.f32 %v3128_v58 }
 0x72d   :  { %v1051_v52 = vpop.xlane.xlu1 %1050  ;;  %v1128_v48 = vcvt.s32.f32 %v1126_v51  ;;  %v1454_v45 = vadd.f32 %v1446_v8, %v1430_v17  ;;  %v1343_v43 = vmul.f32 %v2939_v33, %v1342_v55  ;;  %v1407_v20 = vmul.f32 %v2944_v11, %v1342_v55 }
 0x72e   :  { %v1052_v47 = vcvt.f32.s32 %v1051_v52  ;;  %1516 = vmatmul.f32.vlgmr.msrb.gmra.mxu2 %v1492_v57  ;;  %1557 = vmatmul.f32.vlgmr.msrb.gmra.mxu3 %v1492_v57  ;;  %v1348_v57 = vadd.f32 %v3085_v1, %v1347_v10  ;;  %v1355_v52 = vand.u32 2147483648, %v3032_v32  ;;  %v1375_v51 = vmul.f32 %v3168_v41, %v3123_v23 }
 0x72f   :  { %v1081_v32 = vcvt.f32.s32 %v2843_v35  ;;  %v1431_v38 = vsel %vm663_vm3, %v1343_v43, 0.0  ;;  %v1415_v35 = vmul.f32 %v2969_v12, %v1342_v55  ;;  %vm1364_vm3 = vweird.f32 %v3075_v25 }
 0x730   :  { %v1055_v63 = vadd.s32 %v1054_v50, %v1052_v47  ;;  %v1422_v50 = vmul.f32 %v2947_v40, %v1327_v39  ;;  %v1462_v47 = vsel %vm982_vm14, %v1414_v46, 0.0  ;;  %v1352_v33 = vsel %vm1351_vm10, %v3085_v1, %v1348_v57  ;;  %v3399_v46 = vld [vmem:[#allocation21_spill] sm:$0xff] }
 0x731   :  { %v3154_v19 = vpop.xlane.xlu2 %1130  ;;  %v1470_v34 = vadd.f32 %v1462_v47, %v1454_v45  ;;  %v1356_v40 = vor.u32 1.1754944e-38, %v1355_v52  ;;  %v1447_v1 = vsel %vm823_vm11, %v1407_v20, 0.0  ;;  %vm1354_vm14 = vcmp.eq.f32.partialorder %v1353_v4, 8.507059e+37  ;;  %vm1366_vm11 = vmor %vm1364_vm3, %vm1365_vm0 }
 0x732   :  { %vm1477_vm4 = vcmp.eq.s32.totalorder %v2431_v54, %v1055_v63  ;;  %vm1132_vm15 = vcmp.eq.f32.partialorder %v2837_v56, %v3154_v19  ;;  %v1361_v56 = vsub.f32 1.0, %v1360_v15  ;;  %v1376_v27 = vsub.f32 1.0, %v1375_v51 }
 0x733   :  { %v1485_v9 = vsel %vm1477_vm4, %v1421_v31, 0.0  ;;  %v1133_v62 = vsel %vm1132_vm15, %v1128_v48, inf  ;;  %v1357_v63 = vsel %vm1354_vm14, %v1356_v40, %v1352_v33  ;;  %v139_v31 = vld [vmem:[#allocation7 + $0x28] sm:$0xff]  ;;  %v1082_v10 = vshll.u32 %v1081_v32, 16 }
 0x734   :  { %v1493_v60 = vadd.f32 %v1485_v9, %v1469_v24  ;;  %1134 = vmin.xlane.f32.xlu2 %v1133_v62  ;;  %v1362_v11 = vmul.f32 %v3128_v58, %v1361_v56  ;;  %v1455_v18 = vadd.f32 %v1447_v1, %v1431_v38  ;;  %v1370_v48 = vand.u32 2147483648, %v3075_v25  ;;  %253 = vmatmul.f32.gmra.mxu0 %v139_v31  ;;  %v140_v56 = vld [vmem:[#allocation7 + $0x30] sm:$0xff]  ;;  %v3405_v32 = vld [vmem:[#allocation32_spill] sm:$0xff] }
 0x735   :  { %v1065_v13 = vpop.xlane.xlu0 %1064  ;;  %v1358_v6 = vmul.f32 %v2971_v14, %v1357_v63  ;;  %v1408_v9 = vmul.f32 %v2976_v26, %v1357_v63  ;;  %v1368_v12 = vand.u32 2147483647, %v3075_v25  ;;  %342 = vmatmul.f32.gmra.mxu1 %v139_v31  ;;  %v1423_v8 = vmul.f32 %v2982_v30, %v1342_v55  ;;  %v3401_v30 = vld [vmem:[#allocation27_spill] sm:$0xff]  ;;  %v3410_v1 = vld [vmem:[#allocation28_spill] sm:$0xff] }
 0x736   :  { %v1066_v53 = vcvt.f32.s32 %v1065_v13  ;;  %1519 = vmatmul.f32.gmra.mxu2 %v1493_v60  ;;  %1560 = vmatmul.f32.gmra.mxu3 %v1493_v60  ;;  %v1363_v36 = vadd.f32 %v3128_v58, %v1362_v11  ;;  %v1463_v62 = vsel %vm983_vm9, %v1415_v35, 0.0  ;;  %v1377_v26 = vmul.f32 %v3168_v41, %v1376_v27  ;;  %v3404_v11 = vld [vmem:[#allocation40_spill] sm:$0xff] }
 0x737   :  { %v1095_v60 = vcvt.f32.s32 %v2846_v16  ;;  %v1471_v42 = vadd.f32 %v1463_v62, %v1455_v18  ;;  %v1371_v25 = vor.u32 1.1754944e-38, %v1370_v48  ;;  %vm3400_vm8 = vcmp.eq.s32.totalorder %v2431_v54, %v3399_v46  ;;  %v3415_v62 = vld [vmem:[#allocation23_spill] sm:$0xff] }
 0x738   :  { %v1069_v3 = vadd.s32 %v1068_v44, %v1066_v53  ;;  %v1367_v14 = vsel %vm1366_vm11, %v3128_v58, %v1363_v36  ;;  %v1432_v57 = vsel %vm3400_vm8, %v1358_v6, 0.0  ;;  %vm3402_vm13 = vcmp.eq.s32.totalorder %v2431_v54, %v3401_v30  ;;  %v3403_v53 = vld [vmem:[#allocation39_spill] sm:$0xff]  ;;  %v3412_v6 = vld [vmem:[#allocation33_spill] sm:$0xff]  ;;  %v3419_v30 = vld [vmem:[#allocation34_spill] sm:$0xff] }
 0x739   :  { %v1448_v21 = vsel %vm3402_vm13, %v1408_v9, 0.0  ;;  %vm1369_vm9 = vcmp.eq.f32.partialorder %v1368_v12, 8.507059e+37  ;;  %v1416_v16 = vmul.f32 %v3403_v53, %v1357_v63  ;;  %v1378_v45 = vadd.f32 %v3168_v41, %v1377_v26  ;;  %v3414_v12 = vld [vmem:[#allocation38_spill] sm:$0xff]  ;;  %v3422_v53 = vld [vmem:[#allocation19_spill] sm:$0xff] }
 0x73a   :  { %vm1478_vm5 = vcmp.eq.s32.totalorder %v2431_v54, %v1069_v3  ;;  %v1372_v58 = vsel %vm1369_vm9, %v1371_v25, %v1367_v14  ;;  %v1096_v52 = vshll.u32 %v1095_v60, 16  ;;  %v1456_v20 = vadd.f32 %v1448_v21, %v1432_v57 }
 0x73b   :  { %v1486_v39 = vsel %vm1478_vm5, %v1422_v50, 0.0  ;;  %v1385_v4 = vand.u32 2147483648, %v3123_v23  ;;  %v1373_v3 = vmul.f32 %v3007_v5, %v1372_v58  ;;  %v1409_v50 = vmul.f32 %v3018_v28, %v1372_v58 }
 0x73c   :  { %v1494_v59 = vadd.f32 %v1486_v39, %v1470_v34  ;;  %vm1379_vm6 = vweird.f32 %v3123_v23  ;;  %v1383_v47 = vand.u32 2147483647, %v3123_v23  ;;  %256 = vmatmul.f32.gmra.mxu0 %v140_v56  ;;  %v1424_v51 = vmul.f32 %v3404_v11, %v1357_v63  ;;  %v3407_v39 = vld [vmem:[#allocation37_spill] sm:$0xff]  ;;  %v3408_v23 = vld [vmem:[#allocation22_spill] sm:$0xff] }
 0x73d   :  { %v1079_v24 = vpop.xlane.xlu1 %1078  ;;  %345 = vmatmul.f32.gmra.mxu1 %v140_v56  ;;  %vm1381_vm4 = vmor %vm1379_vm6, %vm1380_vm12  ;;  %vm3406_vm15 = vcmp.eq.s32.totalorder %v2431_v54, %v3405_v32  ;;  %v1109_v5 = vcvt.f32.s32 %v3407_v39  ;;  %v1386_v28 = vor.u32 1.1754944e-38, %v1385_v4  ;;  %vm3409_vm2 = vcmp.eq.s32.totalorder %v2431_v54, %v3408_v23 }
 0x73e   :  { %v1080_v15 = vcvt.f32.s32 %v1079_v24  ;;  %1522 = vmatmul.f32.gmra.mxu2 %v1494_v59  ;;  %1563 = vmatmul.f32.gmra.mxu3 %v1494_v59  ;;  %v1464_v34 = vsel %vm3406_vm15, %v1416_v16, 0.0  ;;  %v1382_v40 = vsel %vm1381_vm4, %v3168_v41, %v1378_v45  ;;  %v1433_v0 = vsel %vm3409_vm2, %v1373_v3, 0.0  ;;  %v3423_v16 = vld [vmem:[#allocation31_spill] sm:$0xff] }
 0x73f   :  { %v1472_v2 = vadd.f32 %v1464_v34, %v1456_v20  ;;  %vm3411_vm10 = vcmp.eq.s32.totalorder %v2431_v54, %v3410_v1  ;;  %vm1384_vm5 = vcmp.eq.f32.partialorder %v1383_v47, 8.507059e+37  ;;  %v1417_v41 = vmul.f32 %v3049_v49, %v1372_v58  ;;  %v141_v1 = vld [vmem:[#allocation7 + $0x38] sm:$0xff] }
 0x740   :  { %v1083_v17 = vadd.s32 %v1082_v10, %v1080_v15  ;;  %v1449_v59 = vsel %vm3411_vm10, %v1409_v50, 0.0  ;;  %v1387_v31 = vsel %vm1384_vm5, %v1386_v28, %v1382_v40  ;;  %v1110_v35 = vshll.u32 %v1109_v5, 16 }
 0x741   :  { %v1457_v27 = vadd.f32 %v1449_v59, %v1433_v0  ;;  %v1388_v10 = vmul.f32 %v3053_v61, %v1387_v31  ;;  %v1410_v15 = vmul.f32 %v3057_v7, %v1387_v31  ;;  %v1425_v48 = vmul.f32 %v3065_v37, %v1372_v58  ;;  %v3417_v61 = vld [vmem:[#allocation29_spill] sm:$0xff] }
 0x742   :  { %vm1479_vm7 = vcmp.eq.s32.totalorder %v2431_v54, %v1083_v17  ;;  %vm3413_vm14 = vcmp.eq.s32.totalorder %v2431_v54, %v3412_v6  ;;  %v1123_v17 = vcvt.f32.s32 %v3414_v12  ;;  %vm3416_vm3 = vcmp.eq.s32.totalorder %v2431_v54, %v3415_v62 }
 0x743   :  { %v1487_v13 = vsel %vm1479_vm7, %v1423_v8, 0.0  ;;  %v1465_v9 = vsel %vm3413_vm14, %v1417_v41, 0.0  ;;  %v1434_v14 = vsel %vm3416_vm3, %v1388_v10, 0.0  ;;  %vm3418_vm11 = vcmp.eq.s32.totalorder %v2431_v54, %v3417_v61 }
 0x744   :  { %v1495_v55 = vadd.f32 %v1487_v13, %v1471_v42  ;;  %v1473_v8 = vadd.f32 %v1465_v9, %v1457_v27  ;;  %v1450_v7 = vsel %vm3418_vm11, %v1410_v15, 0.0  ;;  %v1418_v60 = vmul.f32 %v3088_v29, %v1387_v31  ;;  %259 = vmatmul.f32.gmra.mxu0 %v141_v1  ;;  %v3427_v9 = vld [vmem:[#allocation30_spill] sm:$0xff] }
 0x745   :  { %v1093_v44 = vpop.xlane.xlu2 %1092  ;;  %v1124_v42 = vshll.u32 %v1123_v17, 16  ;;  %v1458_v13 = vadd.f32 %v1450_v7, %v1434_v14  ;;  %v1426_v57 = vmul.f32 %v3118_v22, %v1387_v31  ;;  %vm3420_vm7 = vcmp.eq.s32.totalorder %v2431_v54, %v3419_v30  ;;  %348 = vmatmul.f32.gmra.mxu1 %v141_v1 }
 0x746   :  { %v1094_v43 = vcvt.f32.s32 %v1093_v44  ;;  %1525 = vmatmul.f32.gmra.mxu2 %v1495_v55  ;;  %1566 = vmatmul.f32.gmra.mxu3 %v1495_v55  ;;  %v1466_v21 = vsel %vm3420_vm7, %v1418_v60, 0.0  ;;  %v3421_v44 = vld [vmem:[#allocation25_spill] sm:$0xff]  ;;  %vm3428_vm15 = vcmp.eq.s32.totalorder %v2431_v54, %v3427_v9 }
 0x747   :  { %v1474_v55 = vadd.f32 %v1466_v21, %v1458_v13  ;;  %v1147_v29 = vmax.f32 %v3422_v53, %v3421_v44 }
 0x748   :  { %v1097_v33 = vadd.s32 %v1096_v52, %v1094_v43  ;;  %v3424_v52 = vld [vmem:[#allocation36_spill] sm:$0xff] }
 0x749   :  { %v1155_v45 = vmax.f32 %v1147_v29, %v3423_v16 }
 0x74a   :  { %vm1480_vm1 = vcmp.eq.s32.totalorder %v2431_v54, %v1097_v33 }
 0x74b   :  { %v1488_v38 = vsel %vm1480_vm1, %v1424_v51, 0.0  ;;  %v1163_v43 = vmax.f32 %v1155_v45, %v3424_v52 }
 0x74c   :  { %v1496_v63 = vadd.f32 %v1488_v38, %v1472_v2 }
 0x74d   :  { %v1107_v24 = vpop.xlane.xlu0 %1106  ;;  %v1171_v22 = vsub.f32 %v3422_v53, %v1163_v43  ;;  %v1195_v20 = vsub.f32 %v3421_v44, %v1163_v43  ;;  %v1219_v50 = vsub.f32 %v3423_v16, %v1163_v43  ;;  %v1243_v33 = vsub.f32 %v3424_v52, %v1163_v43 }
 0x74e   :  { %v1108_v36 = vcvt.f32.s32 %v1107_v24  ;;  %1528 = vmatmul.f32.gmra.mxu2 %v1496_v63  ;;  %1569 = vmatmul.f32.gmra.mxu3 %v1496_v63 }
 0x74f   :  { %v1186_v4 = vmul.f32 1.442695, %v1171_v22  ;;  %v1210_v3 = vmul.f32 1.442695, %v1195_v20  ;;  %v1234_v47 = vmul.f32 1.442695, %v1219_v50 }
 0x750   :  { %v1111_v18 = vadd.s32 %v1110_v35, %v1108_v36  ;;  %v1258_v32 = vmul.f32 1.442695, %v1243_v33 }
 0x751   :  { %1823 = vpow2.f32 %v1186_v4 }
 0x752   :  { %vm1481_vm0 = vcmp.eq.s32.totalorder %v2431_v54, %v1111_v18  ;;  %1825 = vpow2.f32 %v1210_v3  ;;  %v1137_v18 = vcvt.f32.s32 %v3154_v19 }
 0x753   :  { %v1489_v49 = vsel %vm1481_vm0, %v1425_v48, 0.0  ;;  %1827 = vpow2.f32 %v1234_v47  ;;  %v3425_v48 = vld [vmem:[#allocation24_spill] sm:$0xff] }
 0x754   :  { %v1497_v26 = vadd.f32 %v1489_v49, %v1473_v8  ;;  %1829 = vpow2.f32 %v1258_v32  ;;  %vm3426_vm4 = vcmp.eq.s32.totalorder %v2431_v54, %v3425_v48  ;;  %v1138_v49 = vshll.u32 %v1137_v18, 16 }
 0x755   :  { %v1121_v37 = vpop.xlane.xlu1 %1120 }
 0x756   :  { %v1122_v25 = vcvt.f32.s32 %v1121_v37  ;;  %1531 = vmatmul.f32.gmra.mxu2 %v1497_v26  ;;  %1572 = vmatmul.f32.gmra.mxu3 %v1497_v26  ;;  %v3429_v26 = vld [vmem:[#allocation35_spill] sm:$0xff] }
 0x757   :  { %v1824_v11 = vpop.eup %1823  ;;  %vm3430_vm1 = vcmp.eq.s32.totalorder %v2431_v54, %v3429_v26 }
 0x758   :  { %v1125_v46 = vadd.s32 %v1124_v42, %v1122_v25  ;;  %v1826_v51 = vpop.eup %1825 }
 0x759   :  { %v1267_v34 = vadd.f32 %v1826_v51, %v1824_v11  ;;  %v1828_v40 = vpop.eup %1827 }
 0x75a   :  { %vm1482_vm8 = vcmp.eq.s32.totalorder %v2431_v54, %v1125_v46  ;;  %v1830_v5 = vpop.eup %1829 }
 0x75b   :  { %v1490_v58 = vsel %vm1482_vm8, %v1426_v57, 0.0  ;;  %v1275_v39 = vadd.f32 %v1828_v40, %v1267_v34 }
 0x75c   :  { %v1498_v56 = vadd.f32 %v1490_v58, %v1474_v55 }
 0x75d   :  { %v1283_v2 = vadd.f32 %v1830_v5, %v1275_v39 }
 0x75e   :  { %1534 = vmatmul.f32.gmra.mxu2 %v1498_v56  ;;  %1575 = vmatmul.f32.gmra.mxu3 %v1498_v56 }
 0x75f   :  { %1831 = vrcp.f32 %v1283_v2  ;;  %v1400_v63 = vand.u32 2147483648, %v1283_v2  ;;  %vm1394_vm9 = vweird.f32 %v1283_v2  ;;  %v1398_v31 = vand.u32 2147483647, %v1283_v2 }
 0x761   :  { %v1401_v41 = vor.u32 1.1754944e-38, %v1400_v63  ;;  %vm1399_vm6 = vcmp.eq.f32.partialorder %v1398_v31, 8.507059e+37 }
 0x765   :  { %v1832_v28 = vpop.eup %1831 }
 0x766   :  { %v1390_v38 = vmul.f32 %v1832_v28, %v1283_v2  ;;  %vm1395_vm13 = vweird.f32 %v1832_v28 }
 0x767   :  { %vm1396_vm12 = vmor %vm1394_vm9, %vm1395_vm13 }
 0x768   :  { %v1391_v23 = vsub.f32 1.0, %v1390_v38 }
 0x76a   :  { %v1392_v0 = vmul.f32 %v1832_v28, %v1391_v23 }
 0x76c   :  { %v1393_v59 = vadd.f32 %v1832_v28, %v1392_v0 }
 0x76e   :  { %v1397_v24 = vsel %vm1396_vm12, %v1832_v28, %v1393_v59 }
 0x76f   :  { %v1402_v35 = vsel %vm1399_vm6, %v1401_v41, %v1397_v24 }
 0x770   :  { %v1403_v36 = vmul.f32 %v1824_v11, %v1402_v35  ;;  %v1411_v27 = vmul.f32 %v1826_v51, %v1402_v35  ;;  %v1419_v8 = vmul.f32 %v1828_v40, %v1402_v35  ;;  %v1427_v7 = vmul.f32 %v1830_v5, %v1402_v35 }
 0x772   :  { %v1435_v6 = vsel %vm3426_vm4, %v1403_v36, 0.0  ;;  %v1451_v12 = vsel %vm3428_vm15, %v1411_v27, 0.0  ;;  %v1467_v37 = vsel %vm3430_vm1, %v1419_v8, 0.0 }
 0x773   :  { %v1459_v14 = vadd.f32 %v1451_v12, %v1435_v6 }
 0x775   :  { %v1475_v19 = vadd.f32 %v1467_v37, %v1459_v14 }
 0x779   :  { %v239_v10 = vpop.f32.mrf.mxu0  ;;  %v328_v15 = vpop.f32.mrf.mxu1 }
 0x781   :  { %v242_v42 = vpop.f32.mrf.mxu0  ;;  %v331_v25 = vpop.f32.mrf.mxu1 }
 0x789   :  { %v245_v53 = vpop.f32.mrf.mxu0  ;;  %v334_v29 = vpop.f32.mrf.mxu1 }
 0x791   :  { %v248_v47 = vpop.f32.mrf.mxu0  ;;  %v337_v33 = vpop.f32.mrf.mxu1 }
 0x7a4   :  { %v251_v1 = vpop.f32.mrf.mxu0  ;;  %v340_v59 = vpop.f32.mrf.mxu1 }
 0x7a7   :  { %v1135_v17 = vpop.xlane.xlu2 %1134 }
 0x7a8   :  { %v1136_v62 = vcvt.f32.s32 %v1135_v17 }
 0x7aa   :  { %v1139_v61 = vadd.s32 %v1138_v49, %v1136_v62 }
 0x7ac   :  { %vm1483_vm2 = vcmp.eq.s32.totalorder %v2431_v54, %v1139_v61 }
 0x7ad   :  { %v1491_v60 = vsel %vm1483_vm2, %v1427_v7, 0.0 }
 0x7ae   :  { %v1499_v13 = vadd.f32 %v1491_v60, %v1475_v19 }
 0x7b0   :  { %1537 = vmatmul.f32.gmra.mxu2 %v1499_v13  ;;  %1578 = vmatmul.f32.gmra.mxu3 %v1499_v13 }
 0x7b1   :  { %v1517_v46 = vpop.f32.mrf.mxu2  ;;  %v1558_v57 = vpop.f32.mrf.mxu3 }
 0x7b2   :  { %v1582_v30 = vmul.f32 %v1517_v46, %v239_v10  ;;  %v1606_v21 = vmul.f32 %v1517_v46, %v328_v15  ;;  %v1590_v55 = vmul.f32 %v1558_v57, %v328_v15  ;;  %v1614_v58 = vmul.f32 %v1558_v57, %v239_v10  ;;  %v254_v15 = vpop.f32.mrf.mxu0  ;;  %v343_v18 = vpop.f32.mrf.mxu1 }
 0x7b4   :  { %v1598_v56 = vadd.f32 %v1590_v55, %v1582_v30  ;;  %v1622_v44 = vsub.f32 %v1606_v21, %v1614_v58 }
 0x7b8   :  { %1646 = vmatmul.f32.vlgmr.msra.gmra.mxu2 %v1622_v44  ;;  %1687 = vmatmul.f32.vlgmr.msra.gmra.mxu3 %v1598_v56 }
 0x7b9   :  { %v1520_v16 = vpop.f32.mrf.mxu2  ;;  %v1561_v54 = vpop.f32.mrf.mxu3 }
 0x7ba   :  { %v1583_v45 = vmul.f32 %v1520_v16, %v242_v42  ;;  %v1607_v52 = vmul.f32 %v1520_v16, %v331_v25  ;;  %v1591_v43 = vmul.f32 %v1561_v54, %v331_v25  ;;  %v1615_v22 = vmul.f32 %v1561_v54, %v242_v42  ;;  %v257_v7 = vpop.f32.mrf.mxu0  ;;  %v346_v26 = vpop.f32.mrf.mxu1 }
 0x7bc   :  { %v1623_v20 = vsub.f32 %v1607_v52, %v1615_v22  ;;  %v1599_v4 = vadd.f32 %v1591_v43, %v1583_v45 }
 0x7c0   :  { %1649 = vmatmul.f32.gmra.mxu2 %v1623_v20  ;;  %1690 = vmatmul.f32.gmra.mxu3 %v1599_v4 }
 0x7c1   :  { %v1523_v3 = vpop.f32.mrf.mxu2  ;;  %v1564_v50 = vpop.f32.mrf.mxu3 }
 0x7c2   :  { %v1584_v11 = vmul.f32 %v1523_v3, %v245_v53  ;;  %v1608_v51 = vmul.f32 %v1523_v3, %v334_v29  ;;  %v1592_v32 = vmul.f32 %v1564_v50, %v334_v29  ;;  %v1616_v34 = vmul.f32 %v1564_v50, %v245_v53  ;;  %v260_v30 = vpop.f32.mrf.mxu0  ;;  %v349_v21 = vpop.f32.mrf.mxu1 }
 0x7c4   :  { %v1624_v40 = vsub.f32 %v1608_v51, %v1616_v34  ;;  %v1600_v39 = vadd.f32 %v1592_v32, %v1584_v11 }
 0x7c8   :  { %1652 = vmatmul.f32.gmra.mxu2 %v1624_v40  ;;  %1693 = vmatmul.f32.gmra.mxu3 %v1600_v39 }
 0x7c9   :  { %v1526_v5 = vpop.f32.mrf.mxu2  ;;  %v1567_v2 = vpop.f32.mrf.mxu3 }
 0x7ca   :  { %v1585_v28 = vmul.f32 %v1526_v5, %v248_v47  ;;  %v1609_v38 = vmul.f32 %v1526_v5, %v337_v33  ;;  %v1593_v23 = vmul.f32 %v1567_v2, %v337_v33  ;;  %v1617_v0 = vmul.f32 %v1567_v2, %v248_v47 }
 0x7cc   :  { %v1625_v63 = vsub.f32 %v1609_v38, %v1617_v0  ;;  %v1601_v31 = vadd.f32 %v1593_v23, %v1585_v28 }
 0x7d0   :  { %1655 = vmatmul.f32.gmra.mxu2 %v1625_v63  ;;  %1696 = vmatmul.f32.gmra.mxu3 %v1601_v31 }
 0x7d1   :  { %v1529_v24 = vpop.f32.mrf.mxu2  ;;  %v1570_v41 = vpop.f32.mrf.mxu3 }
 0x7d2   :  { %v1586_v35 = vmul.f32 %v1529_v24, %v251_v1  ;;  %v1610_v36 = vmul.f32 %v1529_v24, %v340_v59  ;;  %v1594_v27 = vmul.f32 %v1570_v41, %v340_v59  ;;  %v1618_v10 = vmul.f32 %v1570_v41, %v251_v1 }
 0x7d4   :  { %v1626_v48 = vsub.f32 %v1610_v36, %v1618_v10  ;;  %v1602_v6 = vadd.f32 %v1594_v27, %v1586_v35 }
 0x7d8   :  { %1658 = vmatmul.f32.gmra.mxu2 %v1626_v48  ;;  %1699 = vmatmul.f32.gmra.mxu3 %v1602_v6 }
 0x7d9   :  { %v1532_v9 = vpop.f32.mrf.mxu2  ;;  %v1573_v12 = vpop.f32.mrf.mxu3 }
 0x7da   :  { %v1587_v17 = vmul.f32 %v1532_v9, %v254_v15  ;;  %v1611_v8 = vmul.f32 %v1532_v9, %v343_v18  ;;  %v1595_v49 = vmul.f32 %v1573_v12, %v343_v18  ;;  %v1619_v62 = vmul.f32 %v1573_v12, %v254_v15 }
 0x7dc   :  { %v1627_v14 = vsub.f32 %v1611_v8, %v1619_v62  ;;  %v1603_v61 = vadd.f32 %v1595_v49, %v1587_v17 }
 0x7e0   :  { %1661 = vmatmul.f32.gmra.mxu2 %v1627_v14  ;;  %1702 = vmatmul.f32.gmra.mxu3 %v1603_v61 }
 0x7e1   :  { %v1535_v37 = vpop.f32.mrf.mxu2  ;;  %v1576_v19 = vpop.f32.mrf.mxu3 }
 0x7e2   :  { %v1588_v60 = vmul.f32 %v1535_v37, %v257_v7  ;;  %v1612_v42 = vmul.f32 %v1535_v37, %v346_v26  ;;  %v1596_v25 = vmul.f32 %v1576_v19, %v346_v26  ;;  %v1620_v13 = vmul.f32 %v1576_v19, %v257_v7 }
 0x7e4   :  { %v1628_v46 = vsub.f32 %v1612_v42, %v1620_v13  ;;  %v1604_v57 = vadd.f32 %v1596_v25, %v1588_v60 }
 0x7e8   :  { %1664 = vmatmul.f32.gmra.mxu2 %v1628_v46  ;;  %1705 = vmatmul.f32.gmra.mxu3 %v1604_v57 }
 0x833   :  { %v1538_v55 = vpop.f32.mrf.mxu2  ;;  %v1579_v58 = vpop.f32.mrf.mxu3 }
 0x834   :  { %v1589_v56 = vmul.f32 %v1538_v55, %v260_v30  ;;  %v1613_v44 = vmul.f32 %v1538_v55, %v349_v21  ;;  %v1597_v53 = vmul.f32 %v1579_v58, %v349_v21  ;;  %v1621_v29 = vmul.f32 %v1579_v58, %v260_v30 }
 0x836   :  { %v1629_v16 = vsub.f32 %v1613_v44, %v1621_v29  ;;  %v1605_v54 = vadd.f32 %v1597_v53, %v1589_v56 }
 0x838   :  { %1667 = vmatmul.f32.gmra.mxu2 %v1629_v16  ;;  %1708 = vmatmul.f32.gmra.mxu3 %v1605_v54 }
 0x83b   :  { %v1647_v45 = vpop.f32.mrf.mxu2  ;;  %v1688_v52 = vpop.f32.mrf.mxu3 }
 0x83c   :  { %v1689_v43 = vadd.f32 %v1688_v52, %v1647_v45 }
 0x83e   :  { %1712 = vst [vmem:[#allocation13] sm:$0xff] %v1689_v43 }
 0x843   :  { %v1650_v22 = vpop.f32.mrf.mxu2  ;;  %v1691_v20 = vpop.f32.mrf.mxu3 }
 0x844   :  { %v1692_v4 = vadd.f32 %v1691_v20, %v1650_v22 }
 0x846   :  { %1713 = vst [vmem:[#allocation13 + $0x8] sm:$0xff] %v1692_v4 }
 0x84b   :  { %v1653_v3 = vpop.f32.mrf.mxu2  ;;  %v1694_v50 = vpop.f32.mrf.mxu3 }
 0x84c   :  { %v1695_v47 = vadd.f32 %v1694_v50, %v1653_v3 }
 0x84e   :  { %1714 = vst [vmem:[#allocation13 + $0x10] sm:$0xff] %v1695_v47 }
 0x853   :  { %v1656_v33 = vpop.f32.mrf.mxu2  ;;  %v1697_v11 = vpop.f32.mrf.mxu3 }
 0x854   :  { %v1698_v51 = vadd.f32 %v1697_v11, %v1656_v33 }
 0x856   :  { %1715 = vst [vmem:[#allocation13 + $0x18] sm:$0xff] %v1698_v51 }
 0x85b   :  { %v1659_v32 = vpop.f32.mrf.mxu2  ;;  %v1700_v34 = vpop.f32.mrf.mxu3 }
 0x85c   :  { %v1701_v40 = vadd.f32 %v1700_v34, %v1659_v32 }
 0x85e   :  { %1716 = vst [vmem:[#allocation13 + $0x20] sm:$0xff] %v1701_v40 }
 0x863   :  { %v1662_v39 = vpop.f32.mrf.mxu2  ;;  %v1703_v5 = vpop.f32.mrf.mxu3 }
 0x864   :  { %v1704_v2 = vadd.f32 %v1703_v5, %v1662_v39 }
 0x866   :  { %1717 = vst [vmem:[#allocation13 + $0x28] sm:$0xff] %v1704_v2 }
 0x86b   :  { %v1665_v28 = vpop.f32.mrf.mxu2  ;;  %v1706_v38 = vpop.f32.mrf.mxu3 }
 0x86c   :  { %v1707_v23 = vadd.f32 %v1706_v38, %v1665_v28 }
 0x86e   :  { %1718 = vst [vmem:[#allocation13 + $0x30] sm:$0xff] %v1707_v23 }
 0x8bb   :  { %v1668_v0 = vpop.f32.mrf.mxu2  ;;  %v1709_v1 = vpop.f32.mrf.mxu3 }
 0x8bc   :  { %v1710_v59 = vadd.f32 %v1709_v1, %v1668_v0 }
 0x8be   :  { %1719 = vst [vmem:[#allocation13 + $0x38] sm:$0xff] %v1710_v59 }
 0x8bf   :  { %1732 = dma.vmem_to_hbm [thread:$0]  %s1725_s26, 1024, %s1727_s7, [#allocation4], %s2012_s29, %s2012_s29, %s2013_s30  }
 0x8c0   :  { %2009 = dma.done.wait [#allocation4], 1024  }
 0x8c1   :  { %2010 = vsyncadd [#allocation4], 4294966272 }
 0x8c2   :  { %1737 = vsyncpa [#allocation3], 1 }
 0x8c3   :  { %1738 = vsyncpa [#allocation6], 1 }
 0x8c4   :  { %1739 = vsyncpa [#allocation9], 1 }
 0x8c5   :  { %1740 = vsyncpa [#allocation12], 1 }
 0x8c6   :  { %1741 = vsyncpa [#allocation4], 1 }

</bundles_post_ra>
